<compile_context>
chip_gen: v6e
topology: v6e:2x2x1
jax: 0.10.0
libtpu: 0.0.40
codegen_flags: <defaults>
</compile_context>

<pallas_src>
import functools

import jax
import jax.numpy as jnp
from jax.experimental import pallas as pl
from jax.experimental.pallas import tpu as pltpu

NUM_LAYER = 2  # self.num_layer (must be >= 2 per the module)
_VMEM_LIMIT = 48 * 1024 * 1024   # fits v7x (64 MiB physical); plenty on v5e/v6e


def _round_up(x, m):
    return (x + m - 1) // m * m


# ------------------- fully fused single-call path (small graphs) --------------------
def fused_small_kernel(x_ref, p_ref, a_ref, w_ref, b_ref, pool_ref, wp_ref,
                       bp_ref, o_ref, *, num_layer):
    a = a_ref[...].astype(jnp.bfloat16)              # int8 -> bf16 once (exact)
    h = x_ref[...] + p_ref[...]                      # prompt add (f32)
    for l in range(num_layer):
        agg = jnp.dot(a, h.astype(jnp.bfloat16),     # A @ h on the MXU, f32 acc
                      preferred_element_type=jnp.float32)
        h = jnp.dot(agg, w_ref[l],
                    preferred_element_type=jnp.float32) + b_ref[l]
        if l < num_layer - 1:                        # JK='last': no relu after last
            h = jnp.maximum(h, 0.0)
    emb = jnp.dot(pool_ref[...], h, preferred_element_type=jnp.float32)
    o_ref[...] = jnp.dot(emb, wp_ref[...],
                         preferred_element_type=jnp.float32) + bp_ref[...]


def fused_small(x, prompt, adj_i8, w, b, pool_mat, w_pred, b_pred):
    n, d = x.shape
    L = w.shape[0]
    g = pool_mat.shape[0]
    t = w_pred.shape[1]
    kern = functools.partial(fused_small_kernel, num_layer=L)
    return pl.pallas_call(
        kern,
        out_shape=jax.ShapeDtypeStruct((g, t), jnp.float32),
        grid_spec=pltpu.PrefetchScalarGridSpec(
            num_scalar_prefetch=0,
            grid=(1,),
            in_specs=[
                pl.BlockSpec((n, d), lambda i: (0, 0)),          # x
                pl.BlockSpec((n, d), lambda i: (0, 0)),          # prompt
                pl.BlockSpec((n, n), lambda i: (0, 0)),          # A (int8)
                pl.BlockSpec((L, d, d), lambda i: (0, 0, 0)),    # stacked W
                pl.BlockSpec((L, 1, d), lambda i: (0, 0, 0)),    # stacked b
                pl.BlockSpec((g, n), lambda i: (0, 0)),          # pooling matrix
                pl.BlockSpec((d, t), lambda i: (0, 0)),          # head weight
                pl.BlockSpec((1, t), lambda i: (0, 0)),          # head bias
            ],
            out_specs=pl.BlockSpec((g, t), lambda i: (0, 0)),
        ),
        compiler_params=pltpu.CompilerParams(
            dimension_semantics=("arbitrary",),
            vmem_limit_bytes=_VMEM_LIMIT),
    )(x, prompt, adj_i8, w, b, pool_mat, w_pred, b_pred)


# ----------------------- tiled GIN layer (intermediate layers) ----------------------
def gin_layer_kernel(a_ref, h_ref, w_ref, b_ref, o_ref, acc_ref, *, apply_relu):
    k = pl.program_id(1)

    @pl.when(k == 0)
    def _():
        acc_ref[...] = jnp.zeros_like(acc_ref)

    # Neighbor aggregation (A @ h): int8 A cast to bf16 on the tile, bf16 h stream,
    # f32 accumulation in VMEM.
    acc_ref[...] += jnp.dot(a_ref[...].astype(jnp.bfloat16),   # (tile_n, tile_n)
                            h_ref[...],                        # (tile_n, D) bf16
                            preferred_element_type=jnp.float32)

    @pl.when(k == pl.num_programs(1) - 1)
    def _():
        h_new = jnp.dot(acc_ref[...], w_ref[...],
                        preferred_element_type=jnp.float32) + b_ref[...]
        if apply_relu:
            h_new = jnp.maximum(h_new, 0.0)
        o_ref[...] = h_new.astype(o_ref.dtype)     # bf16 back to HBM (one cast)


def gin_layer(adj_i8, h_bf16, w_l, b_l, *, apply_relu, tile_n):
    n = adj_i8.shape[0]
    d = h_bf16.shape[1]
    kern = functools.partial(gin_layer_kernel, apply_relu=apply_relu)
    return pl.pallas_call(
        kern,
        out_shape=jax.ShapeDtypeStruct((n, d), jnp.bfloat16),
        grid_spec=pltpu.PrefetchScalarGridSpec(
            num_scalar_prefetch=0,
            grid=(n // tile_n, n // tile_n),        # (row tiles, K reduction tiles)
            in_specs=[
                pl.BlockSpec((tile_n, tile_n), lambda i, k: (i, k)),  # A tile (int8)
                pl.BlockSpec((tile_n, d), lambda i, k: (k, 0)),       # h K-tile (bf16)
                pl.BlockSpec((d, d), lambda i, k: (0, 0)),            # W (resident)
                pl.BlockSpec((1, d), lambda i, k: (0, 0)),            # b (resident)
            ],
            out_specs=pl.BlockSpec((tile_n, d), lambda i, k: (i, 0)),
            scratch_shapes=[pltpu.VMEM((tile_n, d), jnp.float32)],
        ),
        compiler_params=pltpu.CompilerParams(
            dimension_semantics=("parallel", "arbitrary"),
            vmem_limit_bytes=_VMEM_LIMIT),
    )(adj_i8, h_bf16, w_l, b_l)


# ------------- last GIN layer fused with mean-pool + prediction head ----------------
def gin_last_pool_head_kernel(a_ref, h_ref, w_ref, b_ref, pool_ref, wp_ref,
                              bp_ref, o_ref, acc_ref, emb_ref):
    i = pl.program_id(0)
    k = pl.program_id(1)
    last_i = pl.num_programs(0) - 1
    last_k = pl.num_programs(1) - 1

    @pl.when((i == 0) & (k == 0))
    def _():
        emb_ref[...] = jnp.zeros_like(emb_ref)     # pooled accumulator (G_pad, D)

    @pl.when(k == 0)
    def _():
        acc_ref[...] = jnp.zeros_like(acc_ref)     # A@h accumulator (tile_n, D)

    acc_ref[...] += jnp.dot(a_ref[...].astype(jnp.bfloat16),
                            h_ref[...],
                            preferred_element_type=jnp.float32)

    @pl.when(k == last_k)
    def _():
        # Last layer: linear + bias, NO relu (JK='last'), then pool this row tile.
        h_new = jnp.dot(acc_ref[...], w_ref[...],
                        preferred_element_type=jnp.float32) + b_ref[...]
        emb_ref[...] += jnp.dot(pool_ref[...], h_new,
                                preferred_element_type=jnp.float32)

    @pl.when((i == last_i) & (k == last_k))
    def _():
        o_ref[...] = jnp.dot(emb_ref[...], wp_ref[...],
                             preferred_element_type=jnp.float32) + bp_ref[...]


def gin_last_pool_head(adj_i8, h_bf16, w_l, b_l, pool_mat, w_pred, b_pred, *, tile_n):
    n = adj_i8.shape[0]
    d = h_bf16.shape[1]
    g = pool_mat.shape[0]
    t = w_pred.shape[1]
    return pl.pallas_call(
        gin_last_pool_head_kernel,
        out_shape=jax.ShapeDtypeStruct((g, t), jnp.float32),
        grid_spec=pltpu.PrefetchScalarGridSpec(
            num_scalar_prefetch=0,
            grid=(n // tile_n, n // tile_n),
            in_specs=[
                pl.BlockSpec((tile_n, tile_n), lambda i, k: (i, k)),  # A tile (int8)
                pl.BlockSpec((tile_n, d), lambda i, k: (k, 0)),       # h K-tile (bf16)
                pl.BlockSpec((d, d), lambda i, k: (0, 0)),            # W (resident)
                pl.BlockSpec((1, d), lambda i, k: (0, 0)),            # b (resident)
                pl.BlockSpec((g, tile_n), lambda i, k: (0, i)),       # P row-tile
                pl.BlockSpec((d, t), lambda i, k: (0, 0)),            # head W (res.)
                pl.BlockSpec((1, t), lambda i, k: (0, 0)),            # head b (res.)
            ],
            out_specs=pl.BlockSpec((g, t), lambda i, k: (0, 0)),      # lane-dense
            scratch_shapes=[pltpu.VMEM((tile_n, d), jnp.float32),
                            pltpu.VMEM((g, d), jnp.float32)],
        ),
        # pooled accumulator is carried across the row axis -> both "arbitrary"
        compiler_params=pltpu.CompilerParams(
            dimension_semantics=("arbitrary", "arbitrary"),
            vmem_limit_bytes=_VMEM_LIMIT),
    )(adj_i8, h_bf16, w_l, b_l, pool_mat, w_pred, b_pred)


# ----------------------------------- wrapper ----------------------------------------
def gnn_graphpred_forward(x, prompt, adj, w, b, pool_mat, w_pred, b_pred,
                          *, tile_n=1024, force_tiled=False, fused_max_n=2048):
    N, D = x.shape
    G = pool_mat.shape[0]
    T = w_pred.shape[1]
    L = w.shape[0]

    # Pad for lane/sublane alignment (features -> x128, graphs -> x8, tasks -> x128).
    n_pad = _round_up(N, 256)
    d_pad = _round_up(D, 128)
    g_pad = _round_up(G, 8)
    t_pad = _round_up(T, 128)

    use_fused = (not force_tiled) and (n_pad <= fused_max_n)
    if not use_fused:
        # Tile sizing: multiple of 256, <= 2048 (v7x VMEM), and >= 2 row tiles so
        # both v7x TensorCores get work.
        tile_n = max(256, (tile_n // 256) * 256)
        tile_n = min(tile_n, 2048)
        tile_n = min(tile_n, max(256, n_pad // 2))
        n_pad = _round_up(n_pad, tile_n)

    f32 = jnp.float32
    xp = jnp.pad(x.astype(f32), ((0, n_pad - N), (0, d_pad - D)))
    pp = jnp.pad(prompt.astype(f32), ((0, n_pad - N), (0, d_pad - D)))
    # Adjacency: cast to int8 BEFORE padding (no f32 N_pad^2 intermediate).  Edge
    # multiplicity + self loop must be <= 127 for exactness (asserted on demo data).
    # TODO(synk): hoist this prep out of the per-call path if adj is reused.
    adj_i8 = jnp.pad(adj.astype(jnp.int8), ((0, n_pad - N), (0, n_pad - N)))
    w_p = jnp.pad(w.astype(f32), ((0, 0), (0, d_pad - D), (0, d_pad - D)))
    b_p = jnp.pad(b.astype(f32), ((0, 0), (0, 0), (0, d_pad - D)))
    pool_p = jnp.pad(pool_mat.astype(f32), ((0, g_pad - G), (0, n_pad - N)))
    wp_p = jnp.pad(w_pred.astype(f32), ((0, d_pad - D), (0, t_pad - T)))
    bp_p = jnp.pad(b_pred.astype(f32), ((0, 0), (0, t_pad - T)))

    if use_fused:
        # Small graph: one kernel does prompt add + all layers + pool + head.
        out = fused_small(xp, pp, adj_i8, w_p, b_p, pool_p, wp_p, bp_p)
    else:
        # prompt add (GNN.forward); h kept bf16 in HBM between layers.
        h = (xp + pp).astype(jnp.bfloat16)
        for l in range(L - 1):
            h = gin_layer(adj_i8, h, w_p[l], b_p[l], apply_relu=True, tile_n=tile_n)
        out = gin_last_pool_head(adj_i8, h, w_p[L - 1], b_p[L - 1],
                                 pool_p, wp_p, bp_p, tile_n=tile_n)
    return out[:G, :T]


if __name__ == "__main__":
    key = jax.random.PRNGKey(0)
    N, D, G, T = 500, 128, 6, 4            # nodes, emb_dim, graphs, num_tasks
    n_edges = 2500
    ks = jax.random.split(key, 8)

    # node features + prompt
    x = jax.random.normal(ks[0], (N, D), jnp.float32)
    prompt = 0.1 * jax.random.normal(ks[1], (N, D), jnp.float32)

    # random edge_index -> dense adjacency with self loops ('add' aggregation;
    # duplicate edges accumulate correctly via .add)
    src = jax.random.randint(ks[2], (n_edges,), 0, N)
    dst = jax.random.randint(ks[3], (n_edges,), 0, N)
    adj = jnp.zeros((N, N), jnp.float32).at[dst, src].add(1.0)
    adj = adj + jnp.eye(N, dtype=jnp.float32)
    # int8 adjacency storage requires counts <= 127
    assert int(jnp.max(adj)) <= 127, "edge multiplicity too large for int8 adjacency"

    # deterministic layer parameters (stacked over layers)
    w = jax.random.normal(ks[4], (NUM_LAYER, D, D), jnp.float32) / jnp.sqrt(D)
    b = 0.01 * jax.random.normal(ks[5], (NUM_LAYER, 1, D), jnp.float32)

    # batch assignment -> mean-pooling matrix P (G, N)
    batch = (jnp.arange(N) * G) // N
    onehot = (batch[None, :] == jnp.arange(G)[:, None]).astype(jnp.float32)
    pool_mat = onehot / jnp.sum(onehot, axis=1, keepdims=True)

    # prediction head (single Linear(emb_dim, num_tasks))
    w_pred = jax.random.normal(ks[6], (D, T), jnp.float32) / jnp.sqrt(D)
    b_pred = 0.01 * jax.random.normal(ks[7], (1, T), jnp.float32)

    # pure-JAX reference mirroring the kernels' dtype choices
    # (A and h in bf16 for aggregation, f32 accumulation, everything else f32)
    h = x + prompt
    for l in range(NUM_LAYER):
        agg = jnp.dot(adj.astype(jnp.bfloat16), h.astype(jnp.bfloat16),
                      preferred_element_type=jnp.float32)
        h = jnp.dot(agg, w[l], preferred_element_type=jnp.float32) + b[l]
        if l < NUM_LAYER - 1:
            h = jnp.maximum(h, 0.0)
    ref = pool_mat @ h @ w_pred + b_pred

    # Path 1: fully fused single-call path (selected automatically at this size).
    fwd_fused = jax.jit(gnn_graphpred_forward)
    out_fused = jax.block_until_ready(
        fwd_fused(x, prompt, adj, w, b, pool_mat, w_pred, b_pred))
    assert out_fused.shape == (G, T)
    assert jnp.allclose(out_fused, ref, atol=2e-3, rtol=2e-3), (
        "fused path mismatch vs JAX reference, max |diff| = "
        f"{float(jnp.max(jnp.abs(out_fused - ref)))}")

    # Path 2: tiled, pipelined path (forced; tile_n=256 -> 2x2 grid at this size).
    fwd_tiled = jax.jit(functools.partial(
        gnn_graphpred_forward, tile_n=256, force_tiled=True))
    out_tiled = jax.block_until_ready(
        fwd_tiled(x, prompt, adj, w, b, pool_mat, w_pred, b_pred))
    assert out_tiled.shape == (G, T)
    assert jnp.allclose(out_tiled, ref, atol=2e-3, rtol=2e-3), (
        "tiled path mismatch vs JAX reference, max |diff| = "
        f"{float(jnp.max(jnp.abs(out_tiled - ref)))}")

    print("KERNEL_OK")
</pallas_src>

<mosaic_0001>
module attributes {stable_mosaic.version = 11 : i64} {
  func.func @fused_small_kernel(%arg0: i32, %arg1: memref<512x128xf32, #tpu.memory_space<vmem>>, %arg2: memref<512x128xf32, #tpu.memory_space<vmem>>, %arg3: memref<512x512xi8, #tpu.memory_space<vmem>>, %arg4: memref<2x128x128xf32, #tpu.memory_space<vmem>>, %arg5: memref<2x1x128xf32, #tpu.memory_space<vmem>>, %arg6: memref<8x512xf32, #tpu.memory_space<vmem>>, %arg7: memref<128x128xf32, #tpu.memory_space<vmem>>, %arg8: memref<1x128xf32, #tpu.memory_space<vmem>>, %arg9: memref<8x128xf32, #tpu.memory_space<vmem>>) attributes {dimension_semantics = [#tpu.dimension_semantics<arbitrary>], iteration_bounds = array<i64: 1>, scalar_prefetch = 0 : i64, scratch_operands = 0 : i64, tpu.core_type = #tpu.core_type<tc>, window_params = [{pipeline_mode = #tpu.pipeline_mode<synchronous>, transform_indices = @transform_0, window_bounds = array<i64: 512, 128>}, {pipeline_mode = #tpu.pipeline_mode<synchronous>, transform_indices = @transform_1, window_bounds = array<i64: 512, 128>}, {pipeline_mode = #tpu.pipeline_mode<synchronous>, transform_indices = @transform_2, window_bounds = array<i64: 512, 512>}, {pipeline_mode = #tpu.pipeline_mode<synchronous>, transform_indices = @transform_3, window_bounds = array<i64: 2, 128, 128>}, {pipeline_mode = #tpu.pipeline_mode<synchronous>, transform_indices = @transform_4, window_bounds = array<i64: 2, 1, 128>}, {pipeline_mode = #tpu.pipeline_mode<synchronous>, transform_indices = @transform_5, window_bounds = array<i64: 8, 512>}, {pipeline_mode = #tpu.pipeline_mode<synchronous>, transform_indices = @transform_6, window_bounds = array<i64: 128, 128>}, {pipeline_mode = #tpu.pipeline_mode<synchronous>, transform_indices = @transform_7, window_bounds = array<i64: 1, 128>}, {pipeline_mode = #tpu.pipeline_mode<synchronous>, transform_indices = @transform_8, window_bounds = array<i64: 8, 128>}]} {
    %c0 = arith.constant 0 : index
    %c0_0 = arith.constant 0 : index
    %0 = vector.load %arg3[%c0, %c0_0] : memref<512x512xi8, #tpu.memory_space<vmem>>, vector<512x512xi8>
    %1 = arith.sitofp %0 : vector<512x512xi8> to vector<512x512xbf16>
    %c0_1 = arith.constant 0 : index
    %c0_2 = arith.constant 0 : index
    %2 = vector.load %arg1[%c0_1, %c0_2] : memref<512x128xf32, #tpu.memory_space<vmem>>, vector<512x128xf32>
    %c0_3 = arith.constant 0 : index
    %c0_4 = arith.constant 0 : index
    %3 = vector.load %arg2[%c0_3, %c0_4] : memref<512x128xf32, #tpu.memory_space<vmem>>, vector<512x128xf32>
    %4 = arith.addf %2, %3 : vector<512x128xf32>
    %5 = arith.truncf %4 : vector<512x128xf32> to vector<512x128xbf16>
    %cst = arith.constant dense<0.000000e+00> : vector<512x128xf32>
    %6 = tpu.matmul %1, %5, %cst {dimension_numbers = #tpu.dot_dimension_numbers<[1], [0], [0], [1], [0, 0, 1, 1], [], []>} : vector<512x512xbf16>, vector<512x128xbf16>, vector<512x128xf32> -> vector<512x128xf32>
    %c0_5 = arith.constant 0 : index
    %c0_6 = arith.constant 0 : index
    %c0_7 = arith.constant 0 : index
    %7 = vector.load %arg4[%c0_5, %c0_6, %c0_7] : memref<2x128x128xf32, #tpu.memory_space<vmem>>, vector<1x128x128xf32>
    %8 = vector.shape_cast %7 : vector<1x128x128xf32> to vector<128x128xf32>
    %cst_8 = arith.constant dense<0.000000e+00> : vector<512x128xf32>
    %9 = tpu.matmul %6, %8, %cst_8 {dimension_numbers = #tpu.dot_dimension_numbers<[1], [0], [0], [1], [0, 0, 1, 1], [], []>} : vector<512x128xf32>, vector<128x128xf32>, vector<512x128xf32> -> vector<512x128xf32>
    %c0_9 = arith.constant 0 : index
    %c0_10 = arith.constant 0 : index
    %c0_11 = arith.constant 0 : index
    %10 = vector.load %arg5[%c0_9, %c0_10, %c0_11] : memref<2x1x128xf32, #tpu.memory_space<vmem>>, vector<1x1x128xf32>
    %11 = vector.shape_cast %10 : vector<1x1x128xf32> to vector<1x128xf32>
    %12 = vector.broadcast %11 : vector<1x128xf32> to vector<512x128xf32>
    %13 = arith.addf %9, %12 : vector<512x128xf32>
    %cst_12 = arith.constant 0.000000e+00 : f32
    %14 = vector.broadcast %cst_12 : f32 to vector<512x128xf32>
    %15 = arith.maximumf %13, %14 : vector<512x128xf32>
    %16 = arith.truncf %15 : vector<512x128xf32> to vector<512x128xbf16>
    %cst_13 = arith.constant dense<0.000000e+00> : vector<512x128xf32>
    %17 = tpu.matmul %1, %16, %cst_13 {dimension_numbers = #tpu.dot_dimension_numbers<[1], [0], [0], [1], [0, 0, 1, 1], [], []>} : vector<512x512xbf16>, vector<512x128xbf16>, vector<512x128xf32> -> vector<512x128xf32>
    %c1 = arith.constant 1 : index
    %c0_14 = arith.constant 0 : index
    %c0_15 = arith.constant 0 : index
    %18 = vector.load %arg4[%c1, %c0_14, %c0_15] : memref<2x128x128xf32, #tpu.memory_space<vmem>>, vector<1x128x128xf32>
    %19 = vector.shape_cast %18 : vector<1x128x128xf32> to vector<128x128xf32>
    %cst_16 = arith.constant dense<0.000000e+00> : vector<512x128xf32>
    %20 = tpu.matmul %17, %19, %cst_16 {dimension_numbers = #tpu.dot_dimension_numbers<[1], [0], [0], [1], [0, 0, 1, 1], [], []>} : vector<512x128xf32>, vector<128x128xf32>, vector<512x128xf32> -> vector<512x128xf32>
    %c1_17 = arith.constant 1 : index
    %c0_18 = arith.constant 0 : index
    %c0_19 = arith.constant 0 : index
    %21 = vector.load %arg5[%c1_17, %c0_18, %c0_19] : memref<2x1x128xf32, #tpu.memory_space<vmem>>, vector<1x1x128xf32>
    %22 = vector.shape_cast %21 : vector<1x1x128xf32> to vector<1x128xf32>
    %23 = vector.broadcast %22 : vector<1x128xf32> to vector<512x128xf32>
    %24 = arith.addf %20, %23 : vector<512x128xf32>
    %c0_20 = arith.constant 0 : index
    %c0_21 = arith.constant 0 : index
    %25 = vector.load %arg6[%c0_20, %c0_21] : memref<8x512xf32, #tpu.memory_space<vmem>>, vector<8x512xf32>
    %cst_22 = arith.constant dense<0.000000e+00> : vector<8x128xf32>
    %26 = tpu.matmul %25, %24, %cst_22 {dimension_numbers = #tpu.dot_dimension_numbers<[1], [0], [0], [1], [0, 0, 1, 1], [], []>} : vector<8x512xf32>, vector<512x128xf32>, vector<8x128xf32> -> vector<8x128xf32>
    %c0_23 = arith.constant 0 : index
    %c0_24 = arith.constant 0 : index
    %27 = vector.load %arg7[%c0_23, %c0_24] : memref<128x128xf32, #tpu.memory_space<vmem>>, vector<128x128xf32>
    %cst_25 = arith.constant dense<0.000000e+00> : vector<8x128xf32>
    %28 = tpu.matmul %26, %27, %cst_25 {dimension_numbers = #tpu.dot_dimension_numbers<[1], [0], [0], [1], [0, 0, 1, 1], [], []>} : vector<8x128xf32>, vector<128x128xf32>, vector<8x128xf32> -> vector<8x128xf32>
    %c0_26 = arith.constant 0 : index
    %c0_27 = arith.constant 0 : index
    %29 = vector.load %arg8[%c0_26, %c0_27] : memref<1x128xf32, #tpu.memory_space<vmem>>, vector<1x128xf32>
    %30 = vector.broadcast %29 : vector<1x128xf32> to vector<8x128xf32>
    %31 = arith.addf %28, %30 : vector<8x128xf32>
    %c0_28 = arith.constant 0 : index
    %c0_29 = arith.constant 0 : index
    %32 = vector.load %arg9[%c0_28, %c0_29] : memref<8x128xf32, #tpu.memory_space<vmem>>, vector<8x128xf32>
    tpu.vector_store %arg9[%c0_28, %c0_29], %31 {strides = array<i32>} : memref<8x128xf32, #tpu.memory_space<vmem>>, vector<8x128xf32>,
    return
  }
  func.func @transform_0(%arg0: i32) -> (i32, i32) {
    %c0_i32 = arith.constant 0 : i32
    %c0_i32_0 = arith.constant 0 : i32
    %c0_i32_1 = arith.constant 0 : i32
    return %c0_i32, %c0_i32_0 : i32, i32
  }
  func.func @transform_1(%arg0: i32) -> (i32, i32) {
    %c0_i32 = arith.constant 0 : i32
    %c0_i32_0 = arith.constant 0 : i32
    %c0_i32_1 = arith.constant 0 : i32
    return %c0_i32, %c0_i32_0 : i32, i32
  }
  func.func @transform_2(%arg0: i32) -> (i32, i32) {
    %c0_i32 = arith.constant 0 : i32
    %c0_i32_0 = arith.constant 0 : i32
    %c0_i32_1 = arith.constant 0 : i32
    return %c0_i32, %c0_i32_0 : i32, i32
  }
  func.func @transform_3(%arg0: i32) -> (i32, i32, i32) {
    %c0_i32 = arith.constant 0 : i32
    %c0_i32_0 = arith.constant 0 : i32
    %c0_i32_1 = arith.constant 0 : i32
    %c0_i32_2 = arith.constant 0 : i32
    return %c0_i32, %c0_i32_0, %c0_i32_1 : i32, i32, i32
  }
  func.func @transform_4(%arg0: i32) -> (i32, i32, i32) {
    %c0_i32 = arith.constant 0 : i32
    %c0_i32_0 = arith.constant 0 : i32
    %c0_i32_1 = arith.constant 0 : i32
    %c0_i32_2 = arith.constant 0 : i32
    return %c0_i32, %c0_i32_0, %c0_i32_1 : i32, i32, i32
  }
  func.func @transform_5(%arg0: i32) -> (i32, i32) {
    %c0_i32 = arith.constant 0 : i32
    %c0_i32_0 = arith.constant 0 : i32
    %c0_i32_1 = arith.constant 0 : i32
    return %c0_i32, %c0_i32_0 : i32, i32
  }
  func.func @transform_6(%arg0: i32) -> (i32, i32) {
    %c0_i32 = arith.constant 0 : i32
    %c0_i32_0 = arith.constant 0 : i32
    %c0_i32_1 = arith.constant 0 : i32
    return %c0_i32, %c0_i32_0 : i32, i32
  }
  func.func @transform_7(%arg0: i32) -> (i32, i32) {
    %c0_i32 = arith.constant 0 : i32
    %c0_i32_0 = arith.constant 0 : i32
    %c0_i32_1 = arith.constant 0 : i32
    return %c0_i32, %c0_i32_0 : i32, i32
  }
  func.func @transform_8(%arg0: i32) -> (i32, i32) {
    %c0_i32 = arith.constant 0 : i32
    %c0_i32_0 = arith.constant 0 : i32
    %c0_i32_1 = arith.constant 0 : i32
    return %c0_i32, %c0_i32_0 : i32, i32
  }
}

</mosaic_0001>

<bundles_post_ra>
// kernel: gnn_graphpred_forward.1
= control target key start
LH: loop header
LB: loop body
LE: loop exit
PB: predicated region body
PF: predicated region fallthrough
CT: control target
= control target key end

     0   :  { %v5591_v0 = vmov 0   ;;  %vm3321_vm0 = vmmov 0   ;;  %s5485_s0 = inlined_call_operand.vmem [shape: f32[512,128], index: 0, kind: input, shape index: {}]   ;;  %s5486_s1 = inlined_call_operand.vmem [shape: f32[512,128], index: 1, kind: input, shape index: {}]   ;;  %s5487_s2 = inlined_call_operand.vmem [shape: s8[512,512], index: 2, kind: input, shape index: {}]   ;;  %s5488_s3 = inlined_call_operand.vmem [shape: f32[2,128,128], index: 3, kind: input, shape index: {}]   ;;  %s5489_s4 = inlined_call_operand.vmem [shape: f32[2,1,128], index: 4, kind: input, shape index: {}]   ;;  %s5490_s5 = inlined_call_operand.vmem [shape: f32[8,512], index: 5, kind: input, shape index: {}]   ;;  %s5491_s6 = inlined_call_operand.vmem [shape: f32[128,128], index: 6, kind: input, shape index: {}]   ;;  %s5492_s7 = inlined_call_operand.vmem [shape: f32[1,128], index: 7, kind: input, shape index: {}]   ;;  %s5493_s8 = inlined_call_operand.vmem [shape: f32[8,128], index: 8, kind: output, shape index: {}]  }
   0x1   :  { %446 = vmatprep.subr.bf16.mxu0 %v5591_v0  ;;  %735 = vmatprep.subr.bf16.mxu1 %v5591_v0  ;;  %v236_v1 = vld [vmem:[%s5485_s0 + $0x70] sm:$0xff]  ;;  %v237_v2 = vld [vmem:[%s5485_s0 + $0x78] sm:$0xff]  ;;  %v234_v11 = vld [vmem:[%s5485_s0 + $0x60] sm:$0xff] }
   0x2   :  { %v300_v3 = vld [vmem:[%s5486_s1 + $0x70] sm:$0xff]  ;;  %v301_v4 = vld [vmem:[%s5486_s1 + $0x78] sm:$0xff]  ;;  %v235_v14 = vld [vmem:[%s5485_s0 + $0x68] sm:$0xff] }
   0x3   :  { %v364_v5 = vadd.f32 %v300_v3, %v236_v1  ;;  %v268_v6 = vld [vmem:[%s5485_s0 + $0x170] sm:$0xff]  ;;  %v269_v7 = vld [vmem:[%s5485_s0 + $0x178] sm:$0xff]  ;;  %v365_v8 = vadd.f32 %v301_v4, %v237_v2  ;;  %v298_v15 = vld [vmem:[%s5486_s1 + $0x60] sm:$0xff] }
   0x4   :  { %v332_v9 = vld [vmem:[%s5486_s1 + $0x170] sm:$0xff]  ;;  %v333_v10 = vld [vmem:[%s5486_s1 + $0x178] sm:$0xff]  ;;  %v299_v16 = vld [vmem:[%s5486_s1 + $0x68] sm:$0xff]  ;;  %v362_v18 = vadd.f32 %v298_v15, %v234_v11 }
   0x5   :  { %v396_v12 = vadd.f32 %v332_v9, %v268_v6  ;;  %v397_v13 = vadd.f32 %v333_v10, %v269_v7  ;;  %v421_v17 = vpack.c.bf16 %v365_v8, %v364_v5  ;;  %v363_v19 = vadd.f32 %v299_v16, %v235_v14  ;;  %v266_v20 = vld [vmem:[%s5485_s0 + $0x160] sm:$0xff]  ;;  %v267_v21 = vld [vmem:[%s5485_s0 + $0x168] sm:$0xff]  ;;  %v232_v26 = vld [vmem:[%s5485_s0 + $0x50] sm:$0xff] }
   0x6   :  { %v330_v22 = vld [vmem:[%s5486_s1 + $0x160] sm:$0xff]  ;;  %v331_v24 = vld [vmem:[%s5486_s1 + $0x168] sm:$0xff]  ;;  %v233_v27 = vld [vmem:[%s5485_s0 + $0x58] sm:$0xff] }
   0x7   :  { %v437_v23 = vpack.c.bf16 %v397_v13, %v396_v12  ;;  %v394_v25 = vadd.f32 %v330_v22, %v266_v20  ;;  %447 = vmatpush1.bf16.msra.mxu0 %v421_v17  ;;  %v420_v28 = vpack.c.bf16 %v363_v19, %v362_v18  ;;  %v395_v29 = vadd.f32 %v331_v24, %v267_v21  ;;  %v296_v30 = vld [vmem:[%s5486_s1 + $0x50] sm:$0xff]  ;;  %v297_v31 = vld [vmem:[%s5486_s1 + $0x58] sm:$0xff]  ;;  %v230_v41 = vld [vmem:[%s5485_s0 + $0x40] sm:$0xff] }
   0x8   :  { %v264_v32 = vld [vmem:[%s5485_s0 + $0x150] sm:$0xff]  ;;  %448 = vmatprep.subr.bf16.mxu0 %v5591_v0  ;;  %v360_v33 = vadd.f32 %v296_v30, %v232_v26  ;;  %v361_v34 = vadd.f32 %v297_v31, %v233_v27  ;;  %v265_v35 = vld [vmem:[%s5485_s0 + $0x158] sm:$0xff]  ;;  %v231_v42 = vld [vmem:[%s5485_s0 + $0x48] sm:$0xff] }
   0x9   :  { %736 = vmatpush1.bf16.msra.mxu1 %v437_v23  ;;  %v328_v36 = vld [vmem:[%s5486_s1 + $0x150] sm:$0xff]  ;;  %v329_v37 = vld [vmem:[%s5486_s1 + $0x158] sm:$0xff]  ;;  %v436_v38 = vpack.c.bf16 %v395_v29, %v394_v25  ;;  %v294_v43 = vld [vmem:[%s5486_s1 + $0x40] sm:$0xff] }
   0xa   :  { %737 = vmatprep.subr.bf16.mxu1 %v5591_v0  ;;  %v392_v39 = vadd.f32 %v328_v36, %v264_v32  ;;  %v393_v40 = vadd.f32 %v329_v37, %v265_v35  ;;  %v295_v44 = vld [vmem:[%s5486_s1 + $0x48] sm:$0xff]  ;;  %v262_v45 = vld [vmem:[%s5485_s0 + $0x140] sm:$0xff]  ;;  %v419_v47 = vpack.c.bf16 %v361_v34, %v360_v33  ;;  %v358_v48 = vadd.f32 %v294_v43, %v230_v41  ;;  %v228_v52 = vld [vmem:[%s5485_s0 + $0x30] sm:$0xff] }
   0xb   :  { %v263_v46 = vld [vmem:[%s5485_s0 + $0x148] sm:$0xff]  ;;  %449 = vmatpush1.bf16.msra.mxu0 %v420_v28  ;;  %v359_v49 = vadd.f32 %v295_v44, %v231_v42  ;;  %v326_v50 = vld [vmem:[%s5486_s1 + $0x140] sm:$0xff]  ;;  %v229_v56 = vld [vmem:[%s5485_s0 + $0x38] sm:$0xff] }
   0xc   :  { %v327_v51 = vld [vmem:[%s5486_s1 + $0x148] sm:$0xff]  ;;  %450 = vmatprep.subr.bf16.mxu0 %v5591_v0  ;;  %v435_v53 = vpack.c.bf16 %v393_v40, %v392_v39  ;;  %v390_v54 = vadd.f32 %v326_v50, %v262_v45  ;;  %v292_v57 = vld [vmem:[%s5486_s1 + $0x30] sm:$0xff]  ;;  %v293_v58 = vld [vmem:[%s5486_s1 + $0x38] sm:$0xff] }
   0xd   :  { %738 = vmatpush1.bf16.msra.mxu1 %v436_v38  ;;  %v391_v55 = vadd.f32 %v327_v51, %v263_v46  ;;  %v260_v59 = vld [vmem:[%s5485_s0 + $0x130] sm:$0xff]  ;;  %v261_v60 = vld [vmem:[%s5485_s0 + $0x138] sm:$0xff]  ;;  %v418_v63 = vpack.c.bf16 %v359_v49, %v358_v48  ;;  %v356_v1 = vadd.f32 %v292_v57, %v228_v52  ;;  %v357_v2 = vadd.f32 %v293_v58, %v229_v56  ;;  %v226_v3 = vld [vmem:[%s5485_s0 + $0x20] sm:$0xff] }
   0xe   :  { %739 = vmatprep.subr.bf16.mxu1 %v5591_v0  ;;  %v324_v61 = vld [vmem:[%s5486_s1 + $0x130] sm:$0xff]  ;;  %v325_v62 = vld [vmem:[%s5486_s1 + $0x138] sm:$0xff]  ;;  %v227_v4 = vld [vmem:[%s5485_s0 + $0x28] sm:$0xff] }
   0xf   :  { %451 = vmatpush1.bf16.msra.mxu0 %v419_v47  ;;  %v434_v5 = vpack.c.bf16 %v391_v55, %v390_v54  ;;  %v388_v6 = vadd.f32 %v324_v61, %v260_v59  ;;  %v389_v7 = vadd.f32 %v325_v62, %v261_v60  ;;  %v290_v8 = vld [vmem:[%s5486_s1 + $0x20] sm:$0xff]  ;;  %v291_v9 = vld [vmem:[%s5486_s1 + $0x28] sm:$0xff]  ;;  %v417_v14 = vpack.c.bf16 %v357_v2, %v356_v1  ;;  %v224_v17 = vld [vmem:[%s5485_s0 + $0x10] sm:$0xff] }
  0x10   :  { %452 = vmatprep.subr.bf16.mxu0 %v5591_v0  ;;  %v258_v10 = vld [vmem:[%s5485_s0 + $0x120] sm:$0xff]  ;;  %v259_v11 = vld [vmem:[%s5485_s0 + $0x128] sm:$0xff]  ;;  %v354_v15 = vadd.f32 %v290_v8, %v226_v3  ;;  %v355_v16 = vadd.f32 %v291_v9, %v227_v4  ;;  %v225_v18 = vld [vmem:[%s5485_s0 + $0x18] sm:$0xff] }
  0x11   :  { %740 = vmatpush1.bf16.msra.mxu1 %v435_v53  ;;  %v322_v12 = vld [vmem:[%s5486_s1 + $0x120] sm:$0xff]  ;;  %v323_v13 = vld [vmem:[%s5486_s1 + $0x128] sm:$0xff]  ;;  %v433_v19 = vpack.c.bf16 %v389_v7, %v388_v6  ;;  %v288_v22 = vld [vmem:[%s5486_s1 + $0x10] sm:$0xff] }
  0x12   :  { %741 = vmatprep.subr.bf16.mxu1 %v5591_v0  ;;  %v386_v20 = vadd.f32 %v322_v12, %v258_v10  ;;  %v387_v21 = vadd.f32 %v323_v13, %v259_v11  ;;  %v289_v23 = vld [vmem:[%s5486_s1 + $0x18] sm:$0xff]  ;;  %v256_v24 = vld [vmem:[%s5485_s0 + $0x110] sm:$0xff]  ;;  %v416_v28 = vpack.c.bf16 %v355_v16, %v354_v15  ;;  %v352_v29 = vadd.f32 %v288_v22, %v224_v17  ;;  %v222_v31 = vld [vmem:[%s5485_s0] sm:$0xff] }
  0x13   :  { %453 = vmatpush1.bf16.msra.mxu0 %v418_v63  ;;  %v257_v25 = vld [vmem:[%s5485_s0 + $0x118] sm:$0xff]  ;;  %v320_v26 = vld [vmem:[%s5486_s1 + $0x110] sm:$0xff]  ;;  %v353_v30 = vadd.f32 %v289_v23, %v225_v18  ;;  %v223_v32 = vld [vmem:[%s5485_s0 + $0x8] sm:$0xff] }
  0x14   :  { %454 = vmatprep.subr.bf16.mxu0 %v5591_v0  ;;  %v321_v27 = vld [vmem:[%s5486_s1 + $0x118] sm:$0xff]  ;;  %v432_v33 = vpack.c.bf16 %v387_v21, %v386_v20  ;;  %v384_v34 = vadd.f32 %v320_v26, %v256_v24  ;;  %v286_v36 = vld [vmem:[%s5486_s1] sm:$0xff]  ;;  %v287_v37 = vld [vmem:[%s5486_s1 + $0x8] sm:$0xff] }
  0x15   :  { %742 = vmatpush1.bf16.msra.mxu1 %v434_v5  ;;  %v385_v35 = vadd.f32 %v321_v27, %v257_v25  ;;  %v254_v38 = vld [vmem:[%s5485_s0 + $0x100] sm:$0xff]  ;;  %v255_v39 = vld [vmem:[%s5485_s0 + $0x108] sm:$0xff]  ;;  %v415_v42 = vpack.c.bf16 %v353_v30, %v352_v29  ;;  %v350_v43 = vadd.f32 %v286_v36, %v222_v31  ;;  %v351_v44 = vadd.f32 %v287_v37, %v223_v32  ;;  %v252_v45 = vld [vmem:[%s5485_s0 + $0xf0] sm:$0xff] }
  0x16   :  { %743 = vmatprep.subr.bf16.mxu1 %v5591_v0  ;;  %v318_v40 = vld [vmem:[%s5486_s1 + $0x100] sm:$0xff]  ;;  %v319_v41 = vld [vmem:[%s5486_s1 + $0x108] sm:$0xff]  ;;  %v253_v46 = vld [vmem:[%s5485_s0 + $0xf8] sm:$0xff] }
  0x17   :  { %455 = vmatpush1.bf16.msra.mxu0 %v417_v14  ;;  %v431_v47 = vpack.c.bf16 %v385_v35, %v384_v34  ;;  %v382_v48 = vadd.f32 %v318_v40, %v254_v38  ;;  %v383_v49 = vadd.f32 %v319_v41, %v255_v39  ;;  %v316_v50 = vld [vmem:[%s5486_s1 + $0xf0] sm:$0xff]  ;;  %v317_v51 = vld [vmem:[%s5486_s1 + $0xf8] sm:$0xff]  ;;  %v414_v56 = vpack.c.bf16 %v351_v44, %v350_v43  ;;  %v250_v59 = vld [vmem:[%s5485_s0 + $0xe0] sm:$0xff] }
  0x18   :  { %456 = vmatprep.subr.bf16.mxu0 %v5591_v0  ;;  %v284_v52 = vld [vmem:[%s5485_s0 + $0x1f0] sm:$0xff]  ;;  %v285_v53 = vld [vmem:[%s5485_s0 + $0x1f8] sm:$0xff]  ;;  %v380_v57 = vadd.f32 %v316_v50, %v252_v45  ;;  %v381_v58 = vadd.f32 %v317_v51, %v253_v46  ;;  %v251_v60 = vld [vmem:[%s5485_s0 + $0xe8] sm:$0xff] }
  0x19   :  { %744 = vmatpush1.bf16.msra.mxu1 %v433_v19  ;;  %v348_v54 = vld [vmem:[%s5486_s1 + $0x1f0] sm:$0xff]  ;;  %v349_v55 = vld [vmem:[%s5486_s1 + $0x1f8] sm:$0xff]  ;;  %v430_v61 = vpack.c.bf16 %v383_v49, %v382_v48  ;;  %v314_v1 = vld [vmem:[%s5486_s1 + $0xe0] sm:$0xff] }
  0x1a   :  { %745 = vmatprep.subr.bf16.mxu1 %v5591_v0  ;;  %v412_v62 = vadd.f32 %v348_v54, %v284_v52  ;;  %v413_v63 = vadd.f32 %v349_v55, %v285_v53  ;;  %v315_v2 = vld [vmem:[%s5486_s1 + $0xe8] sm:$0xff]  ;;  %v282_v3 = vld [vmem:[%s5485_s0 + $0x1e0] sm:$0xff]  ;;  %v429_v7 = vpack.c.bf16 %v381_v58, %v380_v57  ;;  %v378_v8 = vadd.f32 %v314_v1, %v250_v59  ;;  %v248_v10 = vld [vmem:[%s5485_s0 + $0xd0] sm:$0xff] }
  0x1b   :  { %457 = vmatpush1.bf16.msra.mxu0 %v416_v28  ;;  %v283_v4 = vld [vmem:[%s5485_s0 + $0x1e8] sm:$0xff]  ;;  %v346_v5 = vld [vmem:[%s5486_s1 + $0x1e0] sm:$0xff]  ;;  %v379_v9 = vadd.f32 %v315_v2, %v251_v60  ;;  %v249_v11 = vld [vmem:[%s5485_s0 + $0xd8] sm:$0xff] }
  0x1c   :  { %458 = vmatprep.subr.bf16.mxu0 %v5591_v0  ;;  %v347_v6 = vld [vmem:[%s5486_s1 + $0x1e8] sm:$0xff]  ;;  %v445_v12 = vpack.c.bf16 %v413_v63, %v412_v62  ;;  %v410_v13 = vadd.f32 %v346_v5, %v282_v3  ;;  %v312_v15 = vld [vmem:[%s5486_s1 + $0xd0] sm:$0xff]  ;;  %v313_v16 = vld [vmem:[%s5486_s1 + $0xd8] sm:$0xff] }
  0x1d   :  { %746 = vmatpush1.bf16.msra.mxu1 %v432_v33  ;;  %v411_v14 = vadd.f32 %v347_v6, %v283_v4  ;;  %v280_v17 = vld [vmem:[%s5485_s0 + $0x1d0] sm:$0xff]  ;;  %v281_v18 = vld [vmem:[%s5485_s0 + $0x1d8] sm:$0xff]  ;;  %v428_v21 = vpack.c.bf16 %v379_v9, %v378_v8  ;;  %v376_v22 = vadd.f32 %v312_v15, %v248_v10  ;;  %v377_v23 = vadd.f32 %v313_v16, %v249_v11  ;;  %v246_v24 = vld [vmem:[%s5485_s0 + $0xc0] sm:$0xff] }
  0x1e   :  { %747 = vmatprep.subr.bf16.mxu1 %v5591_v0  ;;  %v344_v19 = vld [vmem:[%s5486_s1 + $0x1d0] sm:$0xff]  ;;  %v345_v20 = vld [vmem:[%s5486_s1 + $0x1d8] sm:$0xff]  ;;  %v247_v25 = vld [vmem:[%s5485_s0 + $0xc8] sm:$0xff] }
  0x1f   :  { %459 = vmatpush1.bf16.msra.mxu0 %v415_v42  ;;  %v444_v26 = vpack.c.bf16 %v411_v14, %v410_v13  ;;  %v408_v27 = vadd.f32 %v344_v19, %v280_v17  ;;  %v409_v28 = vadd.f32 %v345_v20, %v281_v18  ;;  %v310_v29 = vld [vmem:[%s5486_s1 + $0xc0] sm:$0xff]  ;;  %v311_v30 = vld [vmem:[%s5486_s1 + $0xc8] sm:$0xff]  ;;  %v244_v35 = vld [vmem:[%s5485_s0 + $0xb0] sm:$0xff]  ;;  %v427_v36 = vpack.c.bf16 %v377_v23, %v376_v22 }
  0x20   :  { %460 = vmatprep.subr.bf16.mxu0 %v5591_v0  ;;  %v278_v31 = vld [vmem:[%s5485_s0 + $0x1c0] sm:$0xff]  ;;  %v279_v32 = vld [vmem:[%s5485_s0 + $0x1c8] sm:$0xff]  ;;  %v374_v37 = vadd.f32 %v310_v29, %v246_v24  ;;  %v375_v38 = vadd.f32 %v311_v30, %v247_v25  ;;  %v245_v39 = vld [vmem:[%s5485_s0 + $0xb8] sm:$0xff] }
  0x21   :  { %748 = vmatpush1.bf16.msra.mxu1 %v431_v47  ;;  %v342_v33 = vld [vmem:[%s5486_s1 + $0x1c0] sm:$0xff]  ;;  %v343_v34 = vld [vmem:[%s5486_s1 + $0x1c8] sm:$0xff]  ;;  %v308_v40 = vld [vmem:[%s5486_s1 + $0xb0] sm:$0xff]  ;;  %v443_v42 = vpack.c.bf16 %v409_v28, %v408_v27 }
  0x22   :  { %749 = vmatprep.subr.bf16.mxu1 %v5591_v0  ;;  %v3687_v41 = vld [vmem:[%s5487_s2 + $0x8] sm:$0xff]  ;;  %v406_v43 = vadd.f32 %v342_v33, %v278_v31  ;;  %v407_v44 = vadd.f32 %v343_v34, %v279_v32  ;;  %v309_v45 = vld [vmem:[%s5486_s1 + $0xb8] sm:$0xff]  ;;  %v276_v46 = vld [vmem:[%s5485_s0 + $0x1b0] sm:$0xff]  ;;  %v426_v53 = vpack.c.bf16 %v375_v38, %v374_v37  ;;  %v372_v54 = vadd.f32 %v308_v40, %v244_v35 }
  0x23   :  { %461 = vmatpush1.bf16.msra.mxu0 %v414_v56  ;;  %v5597_v47 = vunpack.c.l.s8.bf16 %v3687_v41  ;;  %v3700_v48 = vld [vmem:[%s5487_s2 + $0x18] sm:$0xff]  ;;  %v340_v50 = vld [vmem:[%s5486_s1 + $0x1b0] sm:$0xff]  ;;  %v373_v55 = vadd.f32 %v309_v45, %v245_v39  ;;  %v242_v56 = vld [vmem:[%s5485_s0 + $0xa0] sm:$0xff] }
  0x24   :  { %462 = vmatprep.subr.bf16.mxu0 %v5591_v0  ;;  %v277_v49 = vld [vmem:[%s5485_s0 + $0x1b8] sm:$0xff]  ;;  %v5596_v52 = vunpack.c.l.s8.bf16 %v3700_v48  ;;  %v243_v57 = vld [vmem:[%s5485_s0 + $0xa8] sm:$0xff]  ;;  %v442_v58 = vpack.c.bf16 %v407_v44, %v406_v43  ;;  %v404_v59 = vadd.f32 %v340_v50, %v276_v46  ;;  %v274_v63 = vld [vmem:[%s5485_s0 + $0x1a0] sm:$0xff]  ;;  %v5588_v44 = vunpack.c.h.s8.bf16 %v3687_v41 }
  0x25   :  { %750 = vmatpush1.bf16.msra.mxu1 %v430_v61  ;;  %v341_v51 = vld [vmem:[%s5486_s1 + $0x1b8] sm:$0xff]  ;;  %478 = vmatprep.mubr.bf16.mxu0 %v5597_v47  ;;  %v306_v61 = vld [vmem:[%s5486_s1 + $0xa0] sm:$0xff]  ;;  %v307_v62 = vld [vmem:[%s5486_s1 + $0xa8] sm:$0xff]  ;;  %v425_v4 = vpack.c.bf16 %v373_v55, %v372_v54  ;;  %v5517_v46 = vunpack.c.h.s8.bf16 %v3700_v48 }
  0x26   :  { %751 = vmatprep.subr.bf16.mxu1 %v5591_v0  ;;  %767 = vmatprep.mubr.bf16.mxu1 %v5596_v52  ;;  %v405_v60 = vadd.f32 %v341_v51, %v277_v49  ;;  %v275_v1 = vld [vmem:[%s5485_s0 + $0x1a8] sm:$0xff]  ;;  %v338_v2 = vld [vmem:[%s5486_s1 + $0x1a0] sm:$0xff]  ;;  %v370_v5 = vadd.f32 %v306_v61, %v242_v56  ;;  %v371_v6 = vadd.f32 %v307_v62, %v243_v57  ;;  %v241_v8 = vld [vmem:[%s5485_s0 + $0x98] sm:$0xff] }
  0x27   :  { %463 = vmatpush2.bf16.msra.mxu0 %v429_v7  ;;  %v339_v3 = vld [vmem:[%s5486_s1 + $0x1a8] sm:$0xff]  ;;  %v240_v7 = vld [vmem:[%s5485_s0 + $0x90] sm:$0xff]  ;;  %v402_v10 = vadd.f32 %v338_v2, %v274_v63  ;;  %v305_v13 = vld [vmem:[%s5486_s1 + $0x98] sm:$0xff] }
  0x28   :  { %464 = vmatprep.subr.bf16.mxu0 %v5591_v0  ;;  %v441_v9 = vpack.c.bf16 %v405_v60, %v404_v59  ;;  %v403_v11 = vadd.f32 %v339_v3, %v275_v1  ;;  %v272_v14 = vld [vmem:[%s5485_s0 + $0x190] sm:$0xff]  ;;  %v273_v15 = vld [vmem:[%s5485_s0 + $0x198] sm:$0xff]  ;;  %v424_v18 = vpack.c.bf16 %v371_v6, %v370_v5  ;;  %v369_v20 = vadd.f32 %v305_v13, %v241_v8  ;;  %v239_v22 = vld [vmem:[%s5485_s0 + $0x88] sm:$0xff] }
  0x29   :  { %752 = vmatpush2.bf16.msra.mxu1 %v445_v12  ;;  %v304_v12 = vld [vmem:[%s5486_s1 + $0x90] sm:$0xff]  ;;  %v337_v17 = vld [vmem:[%s5486_s1 + $0x198] sm:$0xff]  ;;  %v303_v27 = vld [vmem:[%s5486_s1 + $0x88] sm:$0xff] }
  0x2a   :  { %753 = vmatprep.subr.bf16.mxu1 %v5591_v0  ;;  %v336_v16 = vld [vmem:[%s5486_s1 + $0x190] sm:$0xff]  ;;  %v368_v19 = vadd.f32 %v304_v12, %v240_v7  ;;  %v440_v23 = vpack.c.bf16 %v403_v11, %v402_v10  ;;  %v401_v25 = vadd.f32 %v337_v17, %v273_v15  ;;  %v270_v28 = vld [vmem:[%s5485_s0 + $0x180] sm:$0xff]  ;;  %v271_v29 = vld [vmem:[%s5485_s0 + $0x188] sm:$0xff]  ;;  %v367_v34 = vadd.f32 %v303_v27, %v239_v22 }
  0x2b   :  { %465 = vmatpush2.bf16.msra.mxu0 %v428_v21  ;;  %v238_v21 = vld [vmem:[%s5485_s0 + $0x80] sm:$0xff]  ;;  %v400_v24 = vadd.f32 %v336_v16, %v272_v14  ;;  %v335_v31 = vld [vmem:[%s5486_s1 + $0x188] sm:$0xff]  ;;  %v3830_v50 = vld [vmem:[%s5487_s2 + $0x38] sm:$0xff] }
  0x2c   :  { %466 = vmatprep.subr.bf16.mxu0 %v5591_v0  ;;  %v334_v30 = vld [vmem:[%s5486_s1 + $0x180] sm:$0xff]  ;;  %v423_v32 = vpack.c.bf16 %v369_v20, %v368_v19  ;;  %v399_v37 = vadd.f32 %v335_v31, %v271_v29  ;;  %v3825_v49 = vld [vmem:[%s5487_s2 + $0x28] sm:$0xff]  ;;  %v5514_v55 = vunpack.c.l.s8.bf16 %v3830_v50  ;;  %v3852_v57 = vld [vmem:[%s5487_s2 + $0x30] sm:$0xff]  ;;  %v5511_v61 = vunpack.c.h.s8.bf16 %v3830_v50 }
  0x2d   :  { %754 = vmatpush2.bf16.msra.mxu1 %v444_v26  ;;  %v302_v26 = vld [vmem:[%s5486_s1 + $0x80] sm:$0xff]  ;;  %v439_v35 = vpack.c.bf16 %v401_v25, %v400_v24  ;;  %v5585_v54 = vunpack.c.l.s8.bf16 %v3825_v49  ;;  %v5512_v59 = vunpack.c.l.s8.bf16 %v3852_v57  ;;  %v5580_v60 = vunpack.c.h.s8.bf16 %v3825_v49  ;;  %v3869_v62 = vld [vmem:[%s5487_s2 + $0x48] sm:$0xff]  ;;  %v3874_v63 = vld [vmem:[%s5487_s2 + $0x58] sm:$0xff] }
  0x2e   :  { %755 = vmatprep.subr.bf16.mxu1 %v5591_v0  ;;  %v366_v33 = vadd.f32 %v302_v26, %v238_v21  ;;  %v3800_v39 = vld [vmem:[%s5487_s2] sm:$0xff]  ;;  %5703 = vst [vmem:[#allocation2_spill] sm:$0xff] %v3874_v63  ;;  %v5509_v2 = vunpack.c.h.s8.bf16 %v3852_v57  ;;  %v5574_v3 = vunpack.c.l.s8.bf16 %v3869_v62  ;;  %v3896_v6 = vld [vmem:[%s5487_s2 + $0x50] sm:$0xff]  ;;  %v5505_v10 = vunpack.c.h.s8.bf16 %v3874_v63  ;;  %v3913_v11 = vld [vmem:[%s5487_s2 + $0x68] sm:$0xff] }
  0x2f   :  { %467 = vmatpush2.bf16.msra.mxu0 %v427_v36  ;;  %v398_v36 = vadd.f32 %v334_v30, %v270_v28  ;;  %v5589_v43 = vunpack.c.l.s8.bf16 %v3800_v39  ;;  %v5586_v51 = vunpack.c.h.s8.bf16 %v3800_v39  ;;  %v3845_v56 = vld [vmem:[%s5487_s2 + $0x20] sm:$0xff]  ;;  %5704 = vst [vmem:[#allocation3_spill] sm:$0xff] %v3896_v6  ;;  %v5507_v8 = vunpack.c.l.s8.bf16 %v3896_v6  ;;  %v1039_v12 = vld [vmem:[%s5488_s3 + $0x78] sm:$0xff]  ;;  %v3943_v19 = vld [vmem:[%s5487_s2 + $0x70] sm:$0xff] }
  0x30   :  { %468 = vmatprep.subr.bf16.mxu0 %v5591_v0  ;;  %v422_v38 = vpack.c.bf16 %v367_v34, %v366_v33  ;;  %v5577_v1 = vunpack.c.h.s8.bf16 %v3845_v56  ;;  %v3889_v5 = vld [vmem:[%s5487_s2 + $0x40] sm:$0xff]  ;;  %v3921_v13 = vld [vmem:[%s5487_s2 + $0x78] sm:$0xff]  ;;  %v5504_v15 = vunpack.c.h.s8.bf16 %v3896_v6  ;;  %v5562_v16 = vunpack.c.l.s8.bf16 %v3913_v11  ;;  %5706 = vst [vmem:[#allocation5_spill] sm:$0xff] %v3943_v19  ;;  %v1038_v24 = vld [vmem:[%s5488_s3 + $0x70] sm:$0xff] }
  0x31   :  { %756 = vmatpush2.bf16.msra.mxu1 %v443_v42  ;;  %v438_v40 = vpack.c.bf16 %v399_v37, %v398_v36  ;;  %v3806_v42 = vld [vmem:[%s5487_s2 + $0x10] sm:$0xff]  ;;  %v5571_v7 = vunpack.c.l.s8.bf16 %v3889_v5  ;;  %5705 = vst [vmem:[#allocation4_spill] sm:$0xff] %v3921_v13  ;;  %v5565_v14 = vunpack.c.h.s8.bf16 %v3889_v5  ;;  %v5502_v17 = vunpack.c.l.s8.bf16 %v3921_v13  ;;  %v3963_v25 = vld [vmem:[%s5487_s2 + $0x88] sm:$0xff]  ;;  %v3968_v26 = vld [vmem:[%s5487_s2 + $0x98] sm:$0xff] }
  0x32   :  { %757 = vmatprep.subr.bf16.mxu1 %v5591_v0  ;;  %v5519_v45 = vunpack.c.l.s8.bf16 %v3806_v42  ;;  %v5500_v21 = vunpack.c.l.s8.bf16 %v3943_v19  ;;  %v5556_v22 = vunpack.c.h.s8.bf16 %v3913_v11  ;;  %5707 = vst [vmem:[#allocation6_spill] sm:$0xff] %v3968_v26  ;;  %v5497_v28 = vunpack.c.h.s8.bf16 %v3943_v19  ;;  %v3983_v31 = vld [vmem:[%s5487_s2 + $0x80] sm:$0xff]  ;;  %v4007_v37 = vld [vmem:[%s5487_s2 + $0xa8] sm:$0xff] }
  0x33   :  { %469 = vmatpush2.bf16.msra.mxu0 %v426_v53  ;;  %v5516_v53 = vunpack.c.h.s8.bf16 %v3806_v42  ;;  %v5550_v29 = vunpack.c.l.s8.bf16 %v3963_v25  ;;  %v5496_v30 = vunpack.c.l.s8.bf16 %v3968_v26  ;;  %v5547_v33 = vunpack.c.l.s8.bf16 %v3983_v31 }
  0x34   :  { %470 = vmatprep.subr.bf16.mxu0 %v5591_v0  ;;  %v5494_v36 = vunpack.c.h.s8.bf16 %v3968_v26 }
  0x35   :  { %758 = vmatpush2.bf16.msra.mxu1 %v442_v58  ;;  %v5583_v58 = vunpack.c.l.s8.bf16 %v3845_v56 }
  0x36   :  { %759 = vmatprep.subr.bf16.mxu1 %v5591_v0 }
  0x37   :  { %471 = vmatpush2.bf16.msra.mxu0 %v425_v4  ;;  %v5508_v4 = vunpack.c.l.s8.bf16 %v3874_v63 }
  0x38   :  { %472 = vmatprep.subr.bf16.mxu0 %v5591_v0 }
  0x39   :  { %760 = vmatpush2.bf16.msra.mxu1 %v441_v9  ;;  %v5568_v9 = vunpack.c.h.s8.bf16 %v3869_v62 }
  0x3a   :  { %761 = vmatprep.subr.bf16.mxu1 %v5591_v0 }
  0x3b   :  { %473 = vmatpush2.bf16.msra.mxu0 %v424_v18  ;;  %v3936_v18 = vld [vmem:[%s5487_s2 + $0x60] sm:$0xff] }
  0x3c   :  { %474 = vmatprep.subr.bf16.mxu0 %v5591_v0  ;;  %v5559_v20 = vunpack.c.l.s8.bf16 %v3936_v18  ;;  %v5553_v27 = vunpack.c.h.s8.bf16 %v3936_v18 }
  0x3d   :  { %762 = vmatpush2.bf16.msra.mxu1 %v440_v23  ;;  %v5499_v23 = vunpack.c.h.s8.bf16 %v3921_v13 }
  0x3e   :  { %763 = vmatprep.subr.bf16.mxu1 %v5591_v0 }
  0x3f   :  { %475 = vmatpush2.bf16.msra.mxu0 %v423_v32  ;;  %v3990_v32 = vld [vmem:[%s5487_s2 + $0x90] sm:$0xff] }
  0x40   :  { %476 = vmatprep.subr.bf16.mxu0 %v5591_v0  ;;  %5708 = vst [vmem:[#allocation7_spill] sm:$0xff] %v3990_v32  ;;  %v5495_v34 = vunpack.c.l.s8.bf16 %v3990_v32 }
  0x41   :  { %764 = vmatpush2.bf16.msra.mxu1 %v439_v35  ;;  %v5540_v35 = vunpack.c.h.s8.bf16 %v3963_v25 }
  0x42   :  { %765 = vmatprep.subr.bf16.mxu1 %v5591_v0 }
  0x43   :  { %477 = vmatpush2.bf16.msra.mxu0 %v422_v38  ;;  %v4012_v38 = vld [vmem:[%s5487_s2 + $0xb8] sm:$0xff] }
  0x44   :  { %3025 = vmatprep.subr.mxu0 %v1039_v12  ;;  %5709 = vst [vmem:[#allocation8_spill] sm:$0xff] %v4012_v38 }
  0x45   :  { %766 = vmatpush2.bf16.msra.mxu1 %v438_v40  ;;  %v1037_v40 = vld [vmem:[%s5488_s3 + $0x68] sm:$0xff] }
  0x46   :  { %1528 = vmatprep.subr.bf16.mxu1 %v5591_v0  ;;  %479 = vmatmul.mubr.bf16.vlgmr.msra.gmra.mxu0 %v5589_v43 }
  0x47   :  { %486 = vmatprep.mubr.bf16.mxu0 %v5588_v44  ;;  %3026 = vmatpush3.msra.mxu0 %v1039_v12  ;;  %v5539_v12 = vunpack.c.h.s8.bf16 %v3983_v31  ;;  %v4406_v44 = vld [vmem:[%s5487_s2 + $0x1a8] sm:$0xff] }
  0x48   :  { %768 = vmatmul.mubr.bf16.vlgmr.msra.gmra.mxu1 %v5519_v45  ;;  %3027 = vmatprep.subr.mxu0 %v1038_v24  ;;  %5732 = vst [vmem:[#allocation31_spill] sm:$0xff] %v4406_v44 }
  0x49   :  { %775 = vmatprep.mubr.bf16.mxu1 %v5517_v46  ;;  %3028 = vmatpush3.msra.mxu0 %v1038_v24  ;;  %v5498_v24 = vunpack.c.h.s8.bf16 %v3990_v32 }
  0x4a   :  { %3029 = vmatprep.subr.mxu0 %v1037_v40 }
  0x4b   :  { %3030 = vmatpush3.msra.mxu0 %v1037_v40  ;;  %v4037_v40 = vld [vmem:[%s5487_s2 + $0xb0] sm:$0xff] }
  0x4c   :  { %5710 = vst [vmem:[#allocation9_spill] sm:$0xff] %v4037_v40 }
  0x4e   :  { %487 = vmatmul.mubr.bf16.gmra.mxu0 %v5586_v51 }
  0x4f   :  { %494 = vmatprep.mubr.bf16.mxu0 %v5585_v54 }
  0x50   :  { %776 = vmatmul.mubr.bf16.gmra.mxu1 %v5516_v53 }
  0x51   :  { %783 = vmatprep.mubr.bf16.mxu1 %v5514_v55  ;;  %v4106_v55 = vld [vmem:[%s5487_s2 + $0xf8] sm:$0xff] }
  0x52   :  { %5713 = vst [vmem:[#allocation12_spill] sm:$0xff] %v4106_v55  ;;  %v5525_v45 = vunpack.c.l.s8.bf16 %v4106_v55 }
  0x56   :  { %495 = vmatmul.mubr.bf16.gmra.mxu0 %v5583_v58 }
  0x57   :  { %502 = vmatprep.mubr.bf16.mxu0 %v5580_v60  ;;  %v4385_v60 = vld [vmem:[%s5487_s2 + $0x190] sm:$0xff] }
  0x58   :  { %784 = vmatmul.mubr.bf16.gmra.mxu1 %v5512_v59  ;;  %5731 = vst [vmem:[#allocation30_spill] sm:$0xff] %v4385_v60 }
  0x59   :  { %791 = vmatprep.mubr.bf16.mxu1 %v5511_v61 }
  0x5e   :  { %503 = vmatmul.mubr.bf16.gmra.mxu0 %v5577_v1 }
  0x5f   :  { %510 = vmatprep.mubr.bf16.mxu0 %v5574_v3  ;;  %v4363_v3 = vld [vmem:[%s5487_s2 + $0x198] sm:$0xff] }
  0x60   :  { %792 = vmatmul.mubr.bf16.gmra.mxu1 %v5509_v2  ;;  %5729 = vst [vmem:[#allocation28_spill] sm:$0xff] %v4363_v3 }
  0x61   :  { %799 = vmatprep.mubr.bf16.mxu1 %v5508_v4  ;;  %v4077_v4 = vld [vmem:[%s5487_s2 + $0xc0] sm:$0xff] }
  0x62   :  { %v5524_v2 = vunpack.c.l.s8.bf16 %v4077_v4  ;;  %v5523_v53 = vunpack.c.h.s8.bf16 %v4077_v4 }
  0x66   :  { %511 = vmatmul.mubr.bf16.gmra.mxu0 %v5571_v7 }
  0x67   :  { %518 = vmatprep.mubr.bf16.mxu0 %v5568_v9  ;;  %v4341_v9 = vld [vmem:[%s5487_s2 + $0x170] sm:$0xff] }
  0x68   :  { %800 = vmatmul.mubr.bf16.gmra.mxu1 %v5507_v8  ;;  %5727 = vst [vmem:[#allocation26_spill] sm:$0xff] %v4341_v9 }
  0x69   :  { %807 = vmatprep.mubr.bf16.mxu1 %v5505_v10  ;;  %v5510_v10 = vunpack.c.h.s8.bf16 %v4037_v40 }
  0x6e   :  { %519 = vmatmul.mubr.bf16.gmra.mxu0 %v5565_v14 }
  0x6f   :  { %526 = vmatprep.mubr.bf16.mxu0 %v5562_v16  ;;  %v4319_v16 = vld [vmem:[%s5487_s2 + $0x178] sm:$0xff] }
  0x70   :  { %808 = vmatmul.mubr.bf16.gmra.mxu1 %v5504_v15  ;;  %5725 = vst [vmem:[#allocation24_spill] sm:$0xff] %v4319_v16 }
  0x71   :  { %815 = vmatprep.mubr.bf16.mxu1 %v5502_v17  ;;  %v4059_v17 = vld [vmem:[%s5487_s2 + $0xd8] sm:$0xff] }
  0x72   :  { %5711 = vst [vmem:[#allocation10_spill] sm:$0xff] %v4059_v17  ;;  %v5513_v8 = vunpack.c.l.s8.bf16 %v4059_v17  ;;  %v5518_v59 = vunpack.c.h.s8.bf16 %v4059_v17 }
  0x76   :  { %527 = vmatmul.mubr.bf16.gmra.mxu0 %v5559_v20 }
  0x77   :  { %534 = vmatprep.mubr.bf16.mxu0 %v5556_v22  ;;  %v4297_v22 = vld [vmem:[%s5487_s2 + $0x150] sm:$0xff] }
  0x78   :  { %816 = vmatmul.mubr.bf16.gmra.mxu1 %v5500_v21  ;;  %v5506_v21 = vunpack.c.h.s8.bf16 %v4012_v38  ;;  %5723 = vst [vmem:[#allocation22_spill] sm:$0xff] %v4297_v22 }
  0x79   :  { %823 = vmatprep.mubr.bf16.mxu1 %v5499_v23  ;;  %v5532_v23 = vunpack.c.h.s8.bf16 %v4007_v37 }
  0x7e   :  { %535 = vmatmul.mubr.bf16.gmra.mxu0 %v5553_v27 }
  0x7f   :  { %542 = vmatprep.mubr.bf16.mxu0 %v5550_v29  ;;  %v4275_v29 = vld [vmem:[%s5487_s2 + $0x158] sm:$0xff] }
  0x80   :  { %824 = vmatmul.mubr.bf16.gmra.mxu1 %v5497_v28  ;;  %5721 = vst [vmem:[#allocation20_spill] sm:$0xff] %v4275_v29 }
  0x81   :  { %831 = vmatprep.mubr.bf16.mxu1 %v5496_v30  ;;  %v4030_v30 = vld [vmem:[%s5487_s2 + $0xa0] sm:$0xff] }
  0x82   :  { %v5533_v28 = vunpack.c.l.s8.bf16 %v4030_v30  ;;  %v5527_v15 = vunpack.c.h.s8.bf16 %v4030_v30 }
  0x86   :  { %543 = vmatmul.mubr.bf16.gmra.mxu0 %v5547_v33 }
  0x87   :  { %550 = vmatprep.mubr.bf16.mxu0 %v5540_v35 }
  0x88   :  { %832 = vmatmul.mubr.bf16.gmra.mxu1 %v5495_v34  ;;  %v5501_v34 = vunpack.c.l.s8.bf16 %v4012_v38 }
  0x89   :  { %839 = vmatprep.mubr.bf16.mxu1 %v5494_v36  ;;  %v5534_v36 = vunpack.c.l.s8.bf16 %v4007_v37 }
  0x8e   :  { %551 = vmatmul.mubr.bf16.gmra.mxu0 %v5539_v12 }
  0x8f   :  { %558 = vmatprep.mubr.bf16.mxu0 %v5534_v36  ;;  %v4189_v36 = vld [vmem:[%s5487_s2 + $0x100] sm:$0xff] }
  0x90   :  { %840 = vmatmul.mubr.bf16.gmra.mxu1 %v5498_v24  ;;  %v5503_v24 = vunpack.c.l.s8.bf16 %v4037_v40 }
  0x91   :  { %847 = vmatprep.mubr.bf16.mxu1 %v5501_v34  ;;  %v4054_v34 = vld [vmem:[%s5487_s2 + $0xc8] sm:$0xff] }
  0x92   :  { %v5520_v61 = vunpack.c.h.s8.bf16 %v4054_v34 }
  0x96   :  { %559 = vmatmul.mubr.bf16.gmra.mxu0 %v5533_v28 }
  0x97   :  { %566 = vmatprep.mubr.bf16.mxu0 %v5532_v23 }
  0x98   :  { %848 = vmatmul.mubr.bf16.gmra.mxu1 %v5503_v24  ;;  %v1036_v24 = vld [vmem:[%s5488_s3 + $0x60] sm:$0xff] }
  0x99   :  { %855 = vmatprep.mubr.bf16.mxu1 %v5506_v21  ;;  %3031 = vmatprep.subr.mxu0 %v1036_v24  ;;  %v5526_v21 = vunpack.c.l.s8.bf16 %v4054_v34 }
  0x9a   :  { %3032 = vmatpush3.msra.mxu0 %v1036_v24  ;;  %v4084_v24 = vld [vmem:[%s5487_s2 + $0xd0] sm:$0xff] }
  0x9b   :  { %5712 = vst [vmem:[#allocation11_spill] sm:$0xff] %v4084_v24  ;;  %v5521_v46 = vunpack.c.h.s8.bf16 %v4084_v24 }
  0x9e   :  { %567 = vmatmul.mubr.bf16.gmra.mxu0 %v5527_v15  ;;  %v1032_v15 = vld [vmem:[%s5488_s3 + $0x40] sm:$0xff] }
  0x9f   :  { %574 = vmatprep.mubr.bf16.mxu0 %v5526_v21  ;;  %v5531_v21 = vunpack.c.h.s8.bf16 %v4106_v55 }
  0xa0   :  { %856 = vmatmul.mubr.bf16.gmra.mxu1 %v5510_v10  ;;  %v5515_v10 = vunpack.c.l.s8.bf16 %v4084_v24 }
  0xa1   :  { %863 = vmatprep.mubr.bf16.mxu1 %v5513_v8  ;;  %v4101_v8 = vld [vmem:[%s5487_s2 + $0xe8] sm:$0xff] }
  0xa6   :  { %575 = vmatmul.mubr.bf16.gmra.mxu0 %v5524_v2 }
  0xa7   :  { %582 = vmatprep.mubr.bf16.mxu0 %v5520_v61  ;;  %v4124_v61 = vld [vmem:[%s5487_s2 + $0xe0] sm:$0xff] }
  0xa8   :  { %864 = vmatmul.mubr.bf16.gmra.mxu1 %v5515_v10  ;;  %v1035_v10 = vld [vmem:[%s5488_s3 + $0x58] sm:$0xff] }
  0xa9   :  { %871 = vmatprep.mubr.bf16.mxu1 %v5518_v59  ;;  %3033 = vmatprep.subr.mxu0 %v1035_v10  ;;  %v5522_v59 = vunpack.c.l.s8.bf16 %v4101_v8 }
  0xaa   :  { %3034 = vmatpush3.msra.mxu0 %v1035_v10  ;;  %v4131_v10 = vld [vmem:[%s5487_s2 + $0xf0] sm:$0xff] }
  0xab   :  { %5714 = vst [vmem:[#allocation13_spill] sm:$0xff] %v4131_v10  ;;  %v5529_v2 = vunpack.c.l.s8.bf16 %v4131_v10  ;;  %v5535_v23 = vunpack.c.h.s8.bf16 %v4131_v10 }
  0xae   :  { %583 = vmatmul.mubr.bf16.gmra.mxu0 %v5523_v53  ;;  %v1033_v53 = vld [vmem:[%s5488_s3 + $0x48] sm:$0xff] }
  0xaf   :  { %590 = vmatprep.mubr.bf16.mxu0 %v5522_v59  ;;  %v5528_v59 = vunpack.c.l.s8.bf16 %v4124_v61 }
  0xb0   :  { %872 = vmatmul.mubr.bf16.gmra.mxu1 %v5521_v46  ;;  %v1034_v46 = vld [vmem:[%s5488_s3 + $0x50] sm:$0xff] }
  0xb1   :  { %879 = vmatprep.mubr.bf16.mxu1 %v5525_v45  ;;  %3035 = vmatprep.subr.mxu0 %v1034_v46  ;;  %v5530_v45 = vunpack.c.h.s8.bf16 %v4101_v8 }
  0xb2   :  { %3036 = vmatpush3.msra.mxu0 %v1034_v46  ;;  %v1031_v46 = vld [vmem:[%s5488_s3 + $0x38] sm:$0xff] }
  0xb3   :  { %3037 = vmatprep.subr.mxu0 %v1033_v53 }
  0xb4   :  { %3038 = vmatpush3.msra.mxu0 %v1033_v53  ;;  %v4160_v53 = vld [vmem:[%s5487_s2 + $0x108] sm:$0xff] }
  0xb5   :  { %3039 = vmatprep.subr.mxu0 %v1032_v15  ;;  %v5542_v12 = vunpack.c.h.s8.bf16 %v4160_v53 }
  0xb6   :  { %591 = vmatmul.mubr.bf16.gmra.mxu0 %v5528_v59  ;;  %v1030_v59 = vld [vmem:[%s5488_s3 + $0x30] sm:$0xff] }
  0xb7   :  { %598 = vmatprep.mubr.bf16.mxu0 %v5530_v45  ;;  %3040 = vmatpush3.msra.mxu0 %v1032_v15  ;;  %v5537_v45 = vunpack.c.h.s8.bf16 %v4124_v61  ;;  %v5536_v15 = vunpack.c.l.s8.bf16 %v4160_v53 }
  0xb8   :  { %880 = vmatmul.mubr.bf16.gmra.mxu1 %v5529_v2  ;;  %v4168_v2 = vld [vmem:[%s5487_s2 + $0x118] sm:$0xff]  ;;  %3041 = vmatprep.subr.mxu0 %v1031_v46 }
  0xb9   :  { %887 = vmatprep.mubr.bf16.mxu1 %v5531_v21  ;;  %5715 = vst [vmem:[#allocation14_spill] sm:$0xff] %v4168_v2  ;;  %3042 = vmatpush3.msra.mxu0 %v1031_v46  ;;  %v1029_v21 = vld [vmem:[%s5488_s3 + $0x28] sm:$0xff]  ;;  %v5538_v28 = vunpack.c.l.s8.bf16 %v4168_v2  ;;  %v1028_v46 = vld [vmem:[%s5488_s3 + $0x20] sm:$0xff]  ;;  %v5543_v35 = vunpack.c.h.s8.bf16 %v4168_v2 }
  0xba   :  { %3043 = vmatprep.subr.mxu0 %v1030_v59 }
  0xbb   :  { %3044 = vmatpush3.msra.mxu0 %v1030_v59  ;;  %v4196_v59 = vld [vmem:[%s5487_s2 + $0x110] sm:$0xff] }
  0xbc   :  { %3045 = vmatprep.subr.mxu0 %v1029_v21  ;;  %5716 = vst [vmem:[#allocation15_spill] sm:$0xff] %v4196_v59 }
  0xbd   :  { %3046 = vmatpush3.msra.mxu0 %v1029_v21  ;;  %v1025_v21 = vld [vmem:[%s5488_s3 + $0x8] sm:$0xff] }
  0xbe   :  { %599 = vmatmul.mubr.bf16.gmra.mxu0 %v5537_v45  ;;  %3047 = vmatprep.subr.mxu0 %v1028_v46  ;;  %v1026_v45 = vld [vmem:[%s5488_s3 + $0x10] sm:$0xff] }
  0xbf   :  { %606 = vmatprep.mubr.bf16.mxu0 %v5536_v15  ;;  %v5544_v15 = vunpack.c.l.s8.bf16 %v4189_v36  ;;  %3048 = vmatpush3.msra.mxu0 %v1028_v46  ;;  %v1024_v46 = vld [vmem:[%s5488_s3] sm:$0xff] }
  0xc0   :  { %888 = vmatmul.mubr.bf16.gmra.mxu1 %v5535_v23  ;;  %v1027_v23 = vld [vmem:[%s5488_s3 + $0x18] sm:$0xff] }
  0xc1   :  { %895 = vmatprep.mubr.bf16.mxu1 %v5538_v28  ;;  %v5541_v28 = vunpack.c.l.s8.bf16 %v4196_v59  ;;  %3049 = vmatprep.subr.mxu0 %v1027_v23 }
  0xc2   :  { %3050 = vmatpush3.msra.mxu0 %v1027_v23  ;;  %v4222_v23 = vld [vmem:[%s5487_s2 + $0x128] sm:$0xff] }
  0xc3   :  { %3051 = vmatprep.subr.mxu0 %v1026_v45  ;;  %v5554_v33 = vunpack.c.h.s8.bf16 %v4222_v23 }
  0xc4   :  { %3052 = vmatpush3.msra.mxu0 %v1026_v45 }
  0xc5   :  { %3053 = vmatprep.subr.mxu0 %v1025_v21 }
  0xc6   :  { %607 = vmatmul.mubr.bf16.gmra.mxu0 %v5544_v15  ;;  %v5548_v15 = vunpack.c.l.s8.bf16 %v4222_v23 }
  0xc7   :  { %614 = vmatprep.mubr.bf16.mxu0 %v5542_v12  ;;  %v5545_v12 = vunpack.c.h.s8.bf16 %v4189_v36  ;;  %3054 = vmatpush3.msra.mxu0 %v1025_v21  ;;  %v4246_v21 = vld [vmem:[%s5487_s2 + $0x120] sm:$0xff] }
  0xc8   :  { %896 = vmatmul.mubr.bf16.gmra.mxu1 %v5541_v28  ;;  %v4230_v28 = vld [vmem:[%s5487_s2 + $0x138] sm:$0xff]  ;;  %3055 = vmatprep.subr.mxu0 %v1024_v46  ;;  %5718 = vst [vmem:[#allocation17_spill] sm:$0xff] %v4246_v21 }
  0xc9   :  { %903 = vmatprep.mubr.bf16.mxu1 %v5543_v35  ;;  %5717 = vst [vmem:[#allocation16_spill] sm:$0xff] %v4230_v28  ;;  %v5546_v35 = vunpack.c.h.s8.bf16 %v4196_v59  ;;  %v5549_v45 = vunpack.c.l.s8.bf16 %v4230_v28  ;;  %3056 = vmatpush3.msra.mxu0 %v1024_v46  ;;  %v4253_v46 = vld [vmem:[%s5487_s2 + $0x130] sm:$0xff] }
  0xca   :  { %1817 = vmatprep.subr.bf16.mxu0 %v5591_v0  ;;  %5719 = vst [vmem:[#allocation18_spill] sm:$0xff] %v4253_v46 }
  0xce   :  { %615 = vmatmul.mubr.bf16.gmra.mxu0 %v5545_v12  ;;  %v5551_v12 = vunpack.c.l.s8.bf16 %v4246_v21 }
  0xcf   :  { %622 = vmatprep.mubr.bf16.mxu0 %v5548_v15  ;;  %v5555_v15 = vunpack.c.h.s8.bf16 %v4230_v28 }
  0xd0   :  { %904 = vmatmul.mubr.bf16.gmra.mxu1 %v5546_v35  ;;  %v5552_v35 = vunpack.c.l.s8.bf16 %v4253_v46 }
  0xd1   :  { %911 = vmatprep.mubr.bf16.mxu1 %v5549_v45  ;;  %v4270_v45 = vld [vmem:[%s5487_s2 + $0x148] sm:$0xff] }
  0xd2   :  { %5720 = vst [vmem:[#allocation19_spill] sm:$0xff] %v4270_v45  ;;  %v5560_v27 = vunpack.c.l.s8.bf16 %v4270_v45  ;;  %v5566_v20 = vunpack.c.h.s8.bf16 %v4270_v45 }
  0xd6   :  { %623 = vmatmul.mubr.bf16.gmra.mxu0 %v5551_v12  ;;  %v5557_v12 = vunpack.c.h.s8.bf16 %v4246_v21 }
  0xd7   :  { %630 = vmatprep.mubr.bf16.mxu0 %v5554_v33  ;;  %v5561_v33 = vunpack.c.l.s8.bf16 %v4275_v29 }
  0xd8   :  { %912 = vmatmul.mubr.bf16.gmra.mxu1 %v5552_v35  ;;  %v5558_v35 = vunpack.c.h.s8.bf16 %v4253_v46 }
  0xd9   :  { %919 = vmatprep.mubr.bf16.mxu1 %v5555_v15  ;;  %v4290_v15 = vld [vmem:[%s5487_s2 + $0x140] sm:$0xff] }
  0xda   :  { %5722 = vst [vmem:[#allocation21_spill] sm:$0xff] %v4290_v15 }
  0xde   :  { %631 = vmatmul.mubr.bf16.gmra.mxu0 %v5557_v12  ;;  %v5563_v12 = vunpack.c.l.s8.bf16 %v4290_v15 }
  0xdf   :  { %638 = vmatprep.mubr.bf16.mxu0 %v5560_v27  ;;  %v5567_v27 = vunpack.c.h.s8.bf16 %v4275_v29  ;;  %v5623_v29 = vunpack.c.h.s8.bf16 %v4406_v44 }
  0xe0   :  { %920 = vmatmul.mubr.bf16.gmra.mxu1 %v5558_v35  ;;  %v5564_v35 = vunpack.c.l.s8.bf16 %v4297_v22 }
  0xe1   :  { %927 = vmatprep.mubr.bf16.mxu1 %v5561_v33  ;;  %v4314_v33 = vld [vmem:[%s5487_s2 + $0x168] sm:$0xff] }
  0xe2   :  { %5724 = vst [vmem:[#allocation23_spill] sm:$0xff] %v4314_v33  ;;  %v5572_v14 = vunpack.c.l.s8.bf16 %v4314_v33  ;;  %v5578_v7 = vunpack.c.h.s8.bf16 %v4314_v33 }
  0xe6   :  { %639 = vmatmul.mubr.bf16.gmra.mxu0 %v5563_v12  ;;  %v5569_v12 = vunpack.c.h.s8.bf16 %v4290_v15 }
  0xe7   :  { %646 = vmatprep.mubr.bf16.mxu0 %v5566_v20  ;;  %v5573_v20 = vunpack.c.l.s8.bf16 %v4319_v16 }
  0xe8   :  { %928 = vmatmul.mubr.bf16.gmra.mxu1 %v5564_v35  ;;  %v5570_v35 = vunpack.c.h.s8.bf16 %v4297_v22 }
  0xe9   :  { %935 = vmatprep.mubr.bf16.mxu1 %v5567_v27  ;;  %v4334_v27 = vld [vmem:[%s5487_s2 + $0x160] sm:$0xff] }
  0xea   :  { %5726 = vst [vmem:[#allocation25_spill] sm:$0xff] %v4334_v27 }
  0xee   :  { %647 = vmatmul.mubr.bf16.gmra.mxu0 %v5569_v12  ;;  %v5575_v12 = vunpack.c.l.s8.bf16 %v4334_v27 }
  0xef   :  { %654 = vmatprep.mubr.bf16.mxu0 %v5572_v14  ;;  %v5579_v14 = vunpack.c.h.s8.bf16 %v4319_v16 }
  0xf0   :  { %936 = vmatmul.mubr.bf16.gmra.mxu1 %v5570_v35  ;;  %v5576_v35 = vunpack.c.l.s8.bf16 %v4341_v9 }
  0xf1   :  { %943 = vmatprep.mubr.bf16.mxu1 %v5573_v20  ;;  %v4358_v20 = vld [vmem:[%s5487_s2 + $0x188] sm:$0xff] }
  0xf2   :  { %5728 = vst [vmem:[#allocation27_spill] sm:$0xff] %v4358_v20  ;;  %v5584_v1 = vunpack.c.l.s8.bf16 %v4358_v20  ;;  %v5594_v58 = vunpack.c.h.s8.bf16 %v4358_v20 }
  0xf6   :  { %655 = vmatmul.mubr.bf16.gmra.mxu0 %v5575_v12  ;;  %v5581_v12 = vunpack.c.h.s8.bf16 %v4334_v27 }
  0xf7   :  { %662 = vmatprep.mubr.bf16.mxu0 %v5578_v7  ;;  %v5587_v7 = vunpack.c.l.s8.bf16 %v4363_v3 }
  0xf8   :  { %944 = vmatmul.mubr.bf16.gmra.mxu1 %v5576_v35  ;;  %v5582_v35 = vunpack.c.h.s8.bf16 %v4341_v9 }
  0xf9   :  { %951 = vmatprep.mubr.bf16.mxu1 %v5579_v14  ;;  %v4378_v14 = vld [vmem:[%s5487_s2 + $0x180] sm:$0xff] }
  0xfa   :  { %5730 = vst [vmem:[#allocation29_spill] sm:$0xff] %v4378_v14 }
  0xfe   :  { %663 = vmatmul.mubr.bf16.gmra.mxu0 %v5581_v12  ;;  %v5590_v12 = vunpack.c.l.s8.bf16 %v4378_v14 }
  0xff   :  { %670 = vmatprep.mubr.bf16.mxu0 %v5584_v1  ;;  %v5595_v1 = vunpack.c.h.s8.bf16 %v4363_v3 }
 0x100   :  { %952 = vmatmul.mubr.bf16.gmra.mxu1 %v5582_v35  ;;  %v5593_v35 = vunpack.c.l.s8.bf16 %v4385_v60 }
 0x101   :  { %959 = vmatprep.mubr.bf16.mxu1 %v5587_v7 }
 0x106   :  { %v4391_v54 = vpop.f32.mrf.mxu0  ;;  %671 = vmatmul.mubr.bf16.gmra.mxu0 %v5590_v12  ;;  %v4411_v12 = vld [vmem:[%s5487_s2 + $0x1b8] sm:$0xff] }
 0x107   :  { %678 = vmatprep.mubr.bf16.mxu0 %v5594_v58  ;;  %5733 = vst [vmem:[#allocation32_spill] sm:$0xff] %v4411_v12  ;;  %v5624_v46 = vunpack.c.h.s8.bf16 %v4411_v12 }
 0x108   :  { %v4395_v51 = vpop.f32.mrf.mxu1  ;;  %960 = vmatmul.mubr.bf16.gmra.mxu1 %v5593_v35  ;;  %v482_v7 = vpop.f32.mrf.mxu0  ;;  %v5602_v35 = vunpack.c.h.s8.bf16 %v4378_v14 }
 0x109   :  { %967 = vmatprep.mubr.bf16.mxu1 %v5595_v1  ;;  %v5607_v7 = vunpack.c.h.s8.bf16 %v4385_v60  ;;  %v5608_v1 = vunpack.c.l.s8.bf16 %v4406_v44 }
 0x10a   :  { %v771_v43 = vpop.f32.mrf.mxu1  ;;  %v4413_v0 = vpop.f32.mrf.mxu0 }
 0x10c   :  { %v4416_v58 = vpop.f32.mrf.mxu1  ;;  %v485_v52 = vpop.f32.mrf.mxu0 }
 0x10d   :  { %v4434_v52 = vld [vmem:[%s5487_s2 + $0x1a0] sm:$0xff] }
 0x10e   :  { %v774_v3 = vpop.f32.mrf.mxu1  ;;  %v4421_v43 = vpop.f32.mrf.mxu0  ;;  %679 = vmatmul.mubr.bf16.gmra.mxu0 %v5602_v35  ;;  %5734 = vst [vmem:[#allocation33_spill] sm:$0xff] %v4434_v52  ;;  %v4441_v35 = vld [vmem:[%s5487_s2 + $0x1b0] sm:$0xff] }
 0x10f   :  { %686 = vmatprep.mubr.bf16.mxu0 %v5608_v1  ;;  %v5735_v3 = vunpack.c.l.s8.bf16 %v4411_v12  ;;  %5736 = vst [vmem:[#allocation34_spill] sm:$0xff] %v4441_v35  ;;  %v5622_v22 = vunpack.c.l.s8.bf16 %v4441_v35 }
 0x110   :  { %v4425_v9 = vpop.f32.mrf.mxu1  ;;  %968 = vmatmul.mubr.bf16.gmra.mxu1 %v5607_v7  ;;  %v490_v47 = vpop.f32.mrf.mxu0  ;;  %v5619_v7 = vunpack.c.l.s8.bf16 %v4434_v52 }
 0x111   :  { %975 = vmatprep.mubr.bf16.mxu1 %v5735_v3 }
 0x112   :  { %v779_v16 = vpop.f32.mrf.mxu1  ;;  %v4443_v60 = vpop.f32.mrf.mxu0 }
 0x114   :  { %v4446_v1 = vpop.f32.mrf.mxu1  ;;  %v493_v47 = vpop.f32.mrf.mxu0 }
 0x115   :  { %v4466_v47 = vld [vmem:[%s5487_s2 + $0x1c8] sm:$0xff] }
 0x116   :  { %v782_v3 = vpop.f32.mrf.mxu1  ;;  %v4451_v28 = vpop.f32.mrf.mxu0  ;;  %687 = vmatmul.mubr.bf16.gmra.mxu0 %v5619_v7  ;;  %5737 = vst [vmem:[#allocation35_spill] sm:$0xff] %v4466_v47  ;;  %v4471_v7 = vld [vmem:[%s5487_s2 + $0x1d8] sm:$0xff]  ;;  %v5654_v40 = vunpack.c.h.s8.bf16 %v4466_v47 }
 0x117   :  { %694 = vmatprep.mubr.bf16.mxu0 %v5623_v29  ;;  %5738 = vst [vmem:[#allocation36_spill] sm:$0xff] %v4471_v7  ;;  %v5655_v44 = vunpack.c.h.s8.bf16 %v4471_v7 }
 0x118   :  { %v4455_v16 = vpop.f32.mrf.mxu1  ;;  %976 = vmatmul.mubr.bf16.gmra.mxu1 %v5622_v22  ;;  %v498_v59 = vpop.f32.mrf.mxu0  ;;  %v5633_v22 = vunpack.c.h.s8.bf16 %v4434_v52 }
 0x119   :  { %983 = vmatprep.mubr.bf16.mxu1 %v5624_v46  ;;  %v5638_v59 = vunpack.c.h.s8.bf16 %v4441_v35  ;;  %v5639_v46 = vunpack.c.l.s8.bf16 %v4466_v47 }
 0x11a   :  { %v787_v3 = vpop.f32.mrf.mxu1  ;;  %v4473_v2 = vpop.f32.mrf.mxu0 }
 0x11c   :  { %v4476_v29 = vpop.f32.mrf.mxu1  ;;  %v501_v12 = vpop.f32.mrf.mxu0 }
 0x11d   :  { %v4494_v12 = vld [vmem:[%s5487_s2 + $0x1c0] sm:$0xff] }
 0x11e   :  { %v790_v55 = vpop.f32.mrf.mxu1  ;;  %v4481_v3 = vpop.f32.mrf.mxu0  ;;  %695 = vmatmul.mubr.bf16.gmra.mxu0 %v5633_v22  ;;  %5739 = vst [vmem:[#allocation37_spill] sm:$0xff] %v4494_v12  ;;  %v4501_v22 = vld [vmem:[%s5487_s2 + $0x1d0] sm:$0xff] }
 0x11f   :  { %702 = vmatprep.mubr.bf16.mxu0 %v5639_v46  ;;  %v5740_v55 = vunpack.c.l.s8.bf16 %v4471_v7  ;;  %5741 = vst [vmem:[#allocation38_spill] sm:$0xff] %v4501_v22  ;;  %v5653_v52 = vunpack.c.l.s8.bf16 %v4501_v22 }
 0x120   :  { %v4485_v24 = vpop.f32.mrf.mxu1  ;;  %984 = vmatmul.mubr.bf16.gmra.mxu1 %v5638_v59  ;;  %v506_v10 = vpop.f32.mrf.mxu0  ;;  %v5650_v59 = vunpack.c.l.s8.bf16 %v4494_v12 }
 0x121   :  { %991 = vmatprep.mubr.bf16.mxu1 %v5740_v55 }
 0x122   :  { %v795_v17 = vpop.f32.mrf.mxu1  ;;  %v4503_v35 = vpop.f32.mrf.mxu0 }
 0x124   :  { %v4506_v46 = vpop.f32.mrf.mxu1  ;;  %v509_v10 = vpop.f32.mrf.mxu0 }
 0x125   :  { %v4526_v10 = vld [vmem:[%s5487_s2 + $0x1e8] sm:$0xff] }
 0x126   :  { %v798_v55 = vpop.f32.mrf.mxu1  ;;  %v4511_v38 = vpop.f32.mrf.mxu0  ;;  %703 = vmatmul.mubr.bf16.gmra.mxu0 %v5650_v59  ;;  %5742 = vst [vmem:[#allocation39_spill] sm:$0xff] %v4526_v10  ;;  %v4531_v59 = vld [vmem:[%s5487_s2 + $0x1f8] sm:$0xff]  ;;  %v5694_v19 = vunpack.c.h.s8.bf16 %v4526_v10 }
 0x127   :  { %710 = vmatprep.mubr.bf16.mxu0 %v5654_v40  ;;  %5743 = vst [vmem:[#allocation40_spill] sm:$0xff] %v4531_v59  ;;  %v5693_v33 = vunpack.c.h.s8.bf16 %v4531_v59 }
 0x128   :  { %v4515_v17 = vpop.f32.mrf.mxu1  ;;  %992 = vmatmul.mubr.bf16.gmra.mxu1 %v5653_v52  ;;  %v514_v14 = vpop.f32.mrf.mxu0  ;;  %v5664_v52 = vunpack.c.h.s8.bf16 %v4494_v12 }
 0x129   :  { %999 = vmatprep.mubr.bf16.mxu1 %v5655_v44  ;;  %v5669_v14 = vunpack.c.h.s8.bf16 %v4501_v22  ;;  %v5670_v44 = vunpack.c.l.s8.bf16 %v4526_v10 }
 0x12a   :  { %v803_v55 = vpop.f32.mrf.mxu1  ;;  %v4533_v32 = vpop.f32.mrf.mxu0 }
 0x12c   :  { %v4536_v40 = vpop.f32.mrf.mxu1  ;;  %v517_v7 = vpop.f32.mrf.mxu0 }
 0x12d   :  { %v4554_v7 = vld [vmem:[%s5487_s2 + $0x1e0] sm:$0xff] }
 0x12e   :  { %v806_v20 = vpop.f32.mrf.mxu1  ;;  %v4541_v55 = vpop.f32.mrf.mxu0  ;;  %711 = vmatmul.mubr.bf16.gmra.mxu0 %v5664_v52  ;;  %5744 = vst [vmem:[#allocation41_spill] sm:$0xff] %v4554_v7  ;;  %v4561_v52 = vld [vmem:[%s5487_s2 + $0x1f0] sm:$0xff] }
 0x12f   :  { %718 = vmatprep.mubr.bf16.mxu0 %v5670_v44  ;;  %v5745_v20 = vunpack.c.l.s8.bf16 %v4531_v59  ;;  %5746 = vst [vmem:[#allocation42_spill] sm:$0xff] %v4561_v52  ;;  %v5688_v27 = vunpack.c.l.s8.bf16 %v4561_v52 }
 0x130   :  { %v4545_v26 = vpop.f32.mrf.mxu1  ;;  %1000 = vmatmul.mubr.bf16.gmra.mxu1 %v5669_v14  ;;  %v522_v47 = vpop.f32.mrf.mxu0  ;;  %v5685_v14 = vunpack.c.l.s8.bf16 %v4554_v7 }
 0x131   :  { %1007 = vmatprep.mubr.bf16.mxu1 %v5745_v20 }
 0x132   :  { %v811_v12 = vpop.f32.mrf.mxu1  ;;  %v4563_v22 = vpop.f32.mrf.mxu0 }
 0x134   :  { %v4566_v44 = vpop.f32.mrf.mxu1  ;;  %v525_v47 = vpop.f32.mrf.mxu0 }
 0x136   :  { %v814_v20 = vpop.f32.mrf.mxu1  ;;  %v4571_v13 = vpop.f32.mrf.mxu0  ;;  %719 = vmatmul.mubr.bf16.gmra.mxu0 %v5685_v14  ;;  %v5702_v14 = vunpack.c.h.s8.bf16 %v4561_v52 }
 0x137   :  { %726 = vmatprep.mubr.bf16.mxu0 %v5694_v19  ;;  %v5697_v20 = vunpack.c.h.s8.bf16 %v4554_v7 }
 0x138   :  { %v4575_v12 = vpop.f32.mrf.mxu1  ;;  %1008 = vmatmul.mubr.bf16.gmra.mxu1 %v5688_v27  ;;  %v530_v15 = vpop.f32.mrf.mxu0  ;;  %v770_v27 = vadd.f32 %v4395_v51, %v4391_v54  ;;  %v773_v51 = vadd.f32 %v4416_v58, %v4413_v0  ;;  %v789_v58 = vadd.f32 %v4476_v29, %v4473_v2  ;;  %v805_v29 = vadd.f32 %v4536_v40, %v4533_v32 }
 0x139   :  { %1015 = vmatprep.mubr.bf16.mxu1 %v5693_v33  ;;  %v5747_v33 = vunpack.c.l.s8.bf16 %v3687_v41 }
 0x13a   :  { %v819_v47 = vpop.f32.mrf.mxu1  ;;  %v4583_v6 = vpop.f32.mrf.mxu0 }
 0x13c   :  { %v4586_v45 = vpop.f32.mrf.mxu1  ;;  %v533_v63 = vpop.f32.mrf.mxu0 }
 0x13e   :  { %v822_v21 = vpop.f32.mrf.mxu1  ;;  %v536_v10 = vpop.f32.mrf.mxu0  ;;  %727 = vmatmul.mubr.bf16.gmra.mxu0 %v5697_v20 }
 0x13f   :  { %3057 = vmatprep.mubr.f32.mxu0 %v770_v27  ;;  %v778_v21 = vadd.f32 %v4425_v9, %v4421_v43  ;;  %v781_v27 = vadd.f32 %v4446_v1, %v4443_v60  ;;  %v794_v43 = vadd.f32 %v4485_v24, %v4481_v3  ;;  %v797_v1 = vadd.f32 %v4506_v46, %v4503_v35 }
 0x140   :  { %v825_v15 = vpop.f32.mrf.mxu1  ;;  %1016 = vmatmul.mubr.bf16.gmra.mxu1 %v5702_v14  ;;  %v538_v47 = vpop.f32.mrf.mxu0  ;;  %v810_v3 = vadd.f32 %v4545_v26, %v4541_v55  ;;  %v821_v26 = vadd.f32 %v4586_v45, %v4583_v6 }
 0x141   :  { %1560 = vmatprep.mubr.bf16.mxu1 %v5747_v33  ;;  %v826_v55 = vadd.f32 %v825_v15, %v536_v10 }
 0x142   :  { %v827_v19 = vpop.f32.mrf.mxu1  ;;  %v539_v59 = vpop.f32.mrf.mxu0 }
 0x143   :  { %v786_v19 = vadd.f32 %v4455_v16, %v4451_v28  ;;  %v802_v16 = vadd.f32 %v4515_v17, %v4511_v38  ;;  %v813_v38 = vadd.f32 %v4566_v44, %v4563_v22  ;;  %v818_v17 = vadd.f32 %v4575_v12, %v4571_v13 }
 0x144   :  { %v828_v63 = vpop.f32.mrf.mxu1  ;;  %v541_v54 = vpop.f32.mrf.mxu0 }
 0x145   :  { %v829_v44 = vadd.f32 %v828_v63, %v539_v59 }
 0x146   :  { %v830_v20 = vpop.f32.mrf.mxu1  ;;  %v544_v7 = vpop.f32.mrf.mxu0  ;;  %3058 = vmatmul.mubr.f32.vlgmr.msra.gmra.mxu0 %v773_v51 }
 0x147   :  { %3060 = vmatprep.mubr.f32.mxu0 %v778_v21 }
 0x148   :  { %v833_v52 = vpop.f32.mrf.mxu1  ;;  %v546_v47 = vpop.f32.mrf.mxu0 }
 0x14a   :  { %v835_v33 = vpop.f32.mrf.mxu1  ;;  %v547_v14 = vpop.f32.mrf.mxu0  ;;  %3061 = vmatmul.mubr.f32.gmra.mxu0 %v781_v27 }
 0x14b   :  { %3063 = vmatprep.mubr.f32.mxu0 %v786_v19 }
 0x14c   :  { %v836_v0 = vpop.f32.mrf.mxu1  ;;  %v549_v9 = vpop.f32.mrf.mxu0 }
 0x14e   :  { %v838_v20 = vpop.f32.mrf.mxu1  ;;  %v552_v51 = vpop.f32.mrf.mxu0  ;;  %3064 = vmatmul.mubr.f32.gmra.mxu0 %v789_v58 }
 0x14f   :  { %3066 = vmatprep.mubr.f32.mxu0 %v794_v43  ;;  %v834_v20 = vadd.f32 %v833_v52, %v544_v7 }
 0x150   :  { %v841_v60 = vpop.f32.mrf.mxu1  ;;  %v554_v28 = vpop.f32.mrf.mxu0 }
 0x151   :  { %v837_v28 = vadd.f32 %v836_v0, %v547_v14 }
 0x152   :  { %v843_v54 = vpop.f32.mrf.mxu1  ;;  %v555_v21 = vpop.f32.mrf.mxu0  ;;  %3067 = vmatmul.mubr.f32.gmra.mxu0 %v797_v1 }
 0x153   :  { %3069 = vmatprep.mubr.f32.mxu0 %v802_v16  ;;  %v842_v54 = vadd.f32 %v841_v60, %v552_v51 }
 0x154   :  { %v844_v2 = vpop.f32.mrf.mxu1  ;;  %v557_v24 = vpop.f32.mrf.mxu0 }
 0x155   :  { %v845_v10 = vadd.f32 %v844_v2, %v555_v21 }
 0x156   :  { %v846_v27 = vpop.f32.mrf.mxu1  ;;  %v560_v47 = vpop.f32.mrf.mxu0  ;;  %3070 = vmatmul.mubr.f32.gmra.mxu0 %v805_v29 }
 0x157   :  { %3072 = vmatprep.mubr.f32.mxu0 %v810_v3 }
 0x158   :  { %v849_v35 = vpop.f32.mrf.mxu1  ;;  %v562_v46 = vpop.f32.mrf.mxu0 }
 0x159   :  { %v850_v24 = vadd.f32 %v849_v35, %v560_v47 }
 0x15a   :  { %v851_v19 = vpop.f32.mrf.mxu1  ;;  %v563_v33 = vpop.f32.mrf.mxu0  ;;  %3073 = vmatmul.mubr.f32.gmra.mxu0 %v813_v38 }
 0x15b   :  { %3075 = vmatprep.mubr.f32.mxu0 %v818_v17 }
 0x15c   :  { %v852_v32 = vpop.f32.mrf.mxu1  ;;  %v565_v40 = vpop.f32.mrf.mxu0 }
 0x15d   :  { %v853_v7 = vadd.f32 %v852_v32, %v563_v33 }
 0x15e   :  { %v854_v58 = vpop.f32.mrf.mxu1  ;;  %v568_v9 = vpop.f32.mrf.mxu0  ;;  %3076 = vmatmul.mubr.f32.gmra.mxu0 %v821_v26 }
 0x15f   :  { %3078 = vmatprep.mubr.f32.mxu0 %v826_v55 }
 0x160   :  { %v857_v43 = vpop.f32.mrf.mxu1  ;;  %v570_v22 = vpop.f32.mrf.mxu0 }
 0x161   :  { %v858_v27 = vadd.f32 %v857_v43, %v568_v9 }
 0x162   :  { %v859_v1 = vpop.f32.mrf.mxu1  ;;  %v571_v13 = vpop.f32.mrf.mxu0  ;;  %3079 = vmatmul.mubr.f32.gmra.mxu0 %v829_v44 }
 0x163   :  { %3081 = vmatprep.mubr.f32.mxu0 %v834_v20 }
 0x164   :  { %v860_v12 = vpop.f32.mrf.mxu1  ;;  %v573_v16 = vpop.f32.mrf.mxu0 }
 0x165   :  { %v861_v51 = vadd.f32 %v860_v12, %v571_v13 }
 0x166   :  { %v862_v29 = vpop.f32.mrf.mxu1  ;;  %v576_v6 = vpop.f32.mrf.mxu0  ;;  %3082 = vmatmul.mubr.f32.gmra.mxu0 %v837_v28 }
 0x167   :  { %3084 = vmatprep.mubr.f32.mxu0 %v842_v54 }
 0x168   :  { %v865_v45 = vpop.f32.mrf.mxu1  ;;  %v578_v15 = vpop.f32.mrf.mxu0 }
 0x169   :  { %v866_v46 = vadd.f32 %v865_v45, %v576_v6 }
 0x16a   :  { %v867_v3 = vpop.f32.mrf.mxu1  ;;  %v579_v59 = vpop.f32.mrf.mxu0  ;;  %3085 = vmatmul.mubr.f32.gmra.mxu0 %v845_v10 }
 0x16b   :  { %3087 = vmatprep.mubr.f32.mxu0 %v850_v24 }
 0x16c   :  { %v868_v52 = vpop.f32.mrf.mxu1  ;;  %v581_v63 = vpop.f32.mrf.mxu0 }
 0x16d   :  { %v869_v47 = vadd.f32 %v868_v52, %v579_v59 }
 0x16e   :  { %v870_v38 = vpop.f32.mrf.mxu1  ;;  %v584_v14 = vpop.f32.mrf.mxu0  ;;  %3088 = vmatmul.mubr.f32.gmra.mxu0 %v853_v7 }
 0x16f   :  { %3090 = vmatprep.mubr.f32.mxu0 %v858_v27 }
 0x170   :  { %v873_v0 = vpop.f32.mrf.mxu1  ;;  %v586_v60 = vpop.f32.mrf.mxu0 }
 0x171   :  { %v874_v19 = vadd.f32 %v873_v0, %v584_v14 }
 0x172   :  { %v875_v17 = vpop.f32.mrf.mxu1  ;;  %v587_v21 = vpop.f32.mrf.mxu0  ;;  %3091 = vmatmul.mubr.f32.gmra.mxu0 %v861_v51 }
 0x173   :  { %3093 = vmatprep.mubr.f32.mxu0 %v866_v46 }
 0x174   :  { %v876_v2 = vpop.f32.mrf.mxu1  ;;  %v589_v35 = vpop.f32.mrf.mxu0 }
 0x175   :  { %v877_v40 = vadd.f32 %v876_v2, %v587_v21 }
 0x176   :  { %v878_v26 = vpop.f32.mrf.mxu1  ;;  %v592_v33 = vpop.f32.mrf.mxu0  ;;  %3094 = vmatmul.mubr.f32.gmra.mxu0 %v869_v47 }
 0x177   :  { %3096 = vmatprep.mubr.f32.mxu0 %v874_v19 }
 0x178   :  { %v881_v32 = vpop.f32.mrf.mxu1  ;;  %v594_v55 = vpop.f32.mrf.mxu0 }
 0x179   :  { %v882_v58 = vadd.f32 %v881_v32, %v592_v33 }
 0x17a   :  { %v883_v9 = vpop.f32.mrf.mxu1  ;;  %v595_v43 = vpop.f32.mrf.mxu0  ;;  %3097 = vmatmul.mubr.f32.gmra.mxu0 %v877_v40 }
 0x17b   :  { %3099 = vmatprep.mubr.f32.mxu0 %v882_v58 }
 0x17c   :  { %v884_v44 = vpop.f32.mrf.mxu1  ;;  %v597_v20 = vpop.f32.mrf.mxu0 }
 0x17d   :  { %v885_v22 = vadd.f32 %v884_v44, %v595_v43 }
 0x17e   :  { %v886_v1 = vpop.f32.mrf.mxu1  ;;  %v600_v13 = vpop.f32.mrf.mxu0 }
 0x17f   :  { %3100 = vmatmul.mubr.f32.gmra.mxu0 %v885_v22 }
 0x180   :  { %v889_v12 = vpop.f32.mrf.mxu1  ;;  %v602_v16 = vpop.f32.mrf.mxu0 }
 0x181   :  { %v890_v28 = vadd.f32 %v889_v12, %v600_v13 }
 0x182   :  { %v891_v54 = vpop.f32.mrf.mxu1  ;;  %v603_v29 = vpop.f32.mrf.mxu0 }
 0x183   :  { %3102 = vmatprep.mubr.f32.mxu0 %v890_v28 }
 0x184   :  { %v892_v6 = vpop.f32.mrf.mxu1  ;;  %v605_v10 = vpop.f32.mrf.mxu0 }
 0x185   :  { %v893_v45 = vadd.f32 %v892_v6, %v603_v29 }
 0x186   :  { %v894_v15 = vpop.f32.mrf.mxu1  ;;  %v608_v24 = vpop.f32.mrf.mxu0 }
 0x187   :  { %3103 = vmatmul.mubr.f32.gmra.mxu0 %v893_v45 }
 0x188   :  { %v897_v3 = vpop.f32.mrf.mxu1  ;;  %v610_v52 = vpop.f32.mrf.mxu0 }
 0x189   :  { %v898_v59 = vadd.f32 %v897_v3, %v608_v24 }
 0x18a   :  { %v899_v7 = vpop.f32.mrf.mxu1  ;;  %v611_v63 = vpop.f32.mrf.mxu0 }
 0x18b   :  { %3105 = vmatprep.mubr.f32.mxu0 %v898_v59 }
 0x18c   :  { %v900_v27 = vpop.f32.mrf.mxu1  ;;  %v613_v14 = vpop.f32.mrf.mxu0 }
 0x18d   :  { %v901_v38 = vadd.f32 %v900_v27, %v611_v63 }
 0x18e   :  { %v902_v0 = vpop.f32.mrf.mxu1  ;;  %v616_v51 = vpop.f32.mrf.mxu0 }
 0x18f   :  { %3106 = vmatmul.mubr.f32.gmra.mxu0 %v901_v38 }
 0x190   :  { %v905_v60 = vpop.f32.mrf.mxu1  ;;  %v618_v17 = vpop.f32.mrf.mxu0 }
 0x191   :  { %v906_v46 = vadd.f32 %v905_v60, %v616_v51 }
 0x192   :  { %v907_v21 = vpop.f32.mrf.mxu1  ;;  %v619_v2 = vpop.f32.mrf.mxu0 }
 0x193   :  { %3108 = vmatprep.mubr.f32.mxu0 %v906_v46 }
 0x194   :  { %v908_v47 = vpop.f32.mrf.mxu1  ;;  %v621_v19 = vpop.f32.mrf.mxu0 }
 0x195   :  { %v909_v35 = vadd.f32 %v908_v47, %v619_v2 }
 0x196   :  { %v910_v26 = vpop.f32.mrf.mxu1  ;;  %v624_v33 = vpop.f32.mrf.mxu0 }
 0x197   :  { %3109 = vmatmul.mubr.f32.gmra.mxu0 %v909_v35 }
 0x198   :  { %v913_v32 = vpop.f32.mrf.mxu1  ;;  %v626_v55 = vpop.f32.mrf.mxu0 }
 0x199   :  { %v914_v40 = vadd.f32 %v913_v32, %v624_v33 }
 0x19a   :  { %v915_v58 = vpop.f32.mrf.mxu1  ;;  %v627_v9 = vpop.f32.mrf.mxu0 }
 0x19b   :  { %3111 = vmatprep.mubr.f32.mxu0 %v914_v40 }
 0x19c   :  { %v916_v43 = vpop.f32.mrf.mxu1  ;;  %v629_v22 = vpop.f32.mrf.mxu0 }
 0x19d   :  { %v917_v44 = vadd.f32 %v916_v43, %v627_v9 }
 0x19e   :  { %v918_v20 = vpop.f32.mrf.mxu1  ;;  %v632_v1 = vpop.f32.mrf.mxu0 }
 0x19f   :  { %3112 = vmatmul.mubr.f32.gmra.mxu0 %v917_v44 }
 0x1a0   :  { %v921_v13 = vpop.f32.mrf.mxu1  ;;  %v634_v28 = vpop.f32.mrf.mxu0 }
 0x1a1   :  { %v922_v12 = vadd.f32 %v921_v13, %v632_v1 }
 0x1a2   :  { %v923_v16 = vpop.f32.mrf.mxu1  ;;  %v635_v54 = vpop.f32.mrf.mxu0 }
 0x1a3   :  { %3114 = vmatprep.mubr.f32.mxu0 %v922_v12 }
 0x1a4   :  { %v924_v29 = vpop.f32.mrf.mxu1  ;;  %v637_v45 = vpop.f32.mrf.mxu0 }
 0x1a5   :  { %v925_v6 = vadd.f32 %v924_v29, %v635_v54 }
 0x1a6   :  { %v926_v10 = vpop.f32.mrf.mxu1  ;;  %v640_v15 = vpop.f32.mrf.mxu0 }
 0x1a7   :  { %3115 = vmatmul.mubr.f32.gmra.mxu0 %v925_v6 }
 0x1a8   :  { %v929_v24 = vpop.f32.mrf.mxu1  ;;  %v642_v59 = vpop.f32.mrf.mxu0 }
 0x1a9   :  { %v930_v3 = vadd.f32 %v929_v24, %v640_v15 }
 0x1aa   :  { %v931_v52 = vpop.f32.mrf.mxu1  ;;  %v643_v7 = vpop.f32.mrf.mxu0 }
 0x1ab   :  { %3117 = vmatprep.mubr.f32.mxu0 %v930_v3 }
 0x1ac   :  { %v932_v63 = vpop.f32.mrf.mxu1  ;;  %v645_v38 = vpop.f32.mrf.mxu0 }
 0x1ad   :  { %v933_v27 = vadd.f32 %v932_v63, %v643_v7 }
 0x1ae   :  { %v934_v14 = vpop.f32.mrf.mxu1  ;;  %v648_v0 = vpop.f32.mrf.mxu0 }
 0x1af   :  { %3118 = vmatmul.mubr.f32.gmra.mxu0 %v933_v27 }
 0x1b0   :  { %v937_v51 = vpop.f32.mrf.mxu1  ;;  %v650_v46 = vpop.f32.mrf.mxu0 }
 0x1b1   :  { %v938_v60 = vadd.f32 %v937_v51, %v648_v0 }
 0x1b2   :  { %v939_v17 = vpop.f32.mrf.mxu1  ;;  %v651_v21 = vpop.f32.mrf.mxu0 }
 0x1b3   :  { %3120 = vmatprep.mubr.f32.mxu0 %v938_v60 }
 0x1b4   :  { %v940_v2 = vpop.f32.mrf.mxu1  ;;  %v653_v35 = vpop.f32.mrf.mxu0 }
 0x1b5   :  { %v941_v47 = vadd.f32 %v940_v2, %v651_v21 }
 0x1b6   :  { %v942_v19 = vpop.f32.mrf.mxu1  ;;  %v656_v26 = vpop.f32.mrf.mxu0 }
 0x1b7   :  { %3121 = vmatmul.mubr.f32.gmra.mxu0 %v941_v47 }
 0x1b8   :  { %v945_v33 = vpop.f32.mrf.mxu1  ;;  %v658_v40 = vpop.f32.mrf.mxu0 }
 0x1b9   :  { %v946_v32 = vadd.f32 %v945_v33, %v656_v26 }
 0x1ba   :  { %v947_v55 = vpop.f32.mrf.mxu1  ;;  %v659_v58 = vpop.f32.mrf.mxu0 }
 0x1bb   :  { %3123 = vmatprep.mubr.f32.mxu0 %v946_v32 }
 0x1bc   :  { %v948_v9 = vpop.f32.mrf.mxu1  ;;  %v661_v44 = vpop.f32.mrf.mxu0 }
 0x1bd   :  { %v949_v43 = vadd.f32 %v948_v9, %v659_v58 }
 0x1be   :  { %v950_v22 = vpop.f32.mrf.mxu1  ;;  %v664_v20 = vpop.f32.mrf.mxu0 }
 0x1bf   :  { %3124 = vmatmul.mubr.f32.gmra.mxu0 %v949_v43 }
 0x1c0   :  { %v953_v1 = vpop.f32.mrf.mxu1  ;;  %v666_v12 = vpop.f32.mrf.mxu0 }
 0x1c1   :  { %v954_v13 = vadd.f32 %v953_v1, %v664_v20 }
 0x1c2   :  { %v955_v28 = vpop.f32.mrf.mxu1  ;;  %v667_v16 = vpop.f32.mrf.mxu0 }
 0x1c3   :  { %3126 = vmatprep.mubr.f32.mxu0 %v954_v13 }
 0x1c4   :  { %v956_v54 = vpop.f32.mrf.mxu1  ;;  %v669_v6 = vpop.f32.mrf.mxu0 }
 0x1c5   :  { %v957_v29 = vadd.f32 %v956_v54, %v667_v16 }
 0x1c6   :  { %v958_v45 = vpop.f32.mrf.mxu1  ;;  %v672_v10 = vpop.f32.mrf.mxu0 }
 0x1c7   :  { %3127 = vmatmul.mubr.f32.gmra.mxu0 %v957_v29 }
 0x1c8   :  { %v961_v15 = vpop.f32.mrf.mxu1  ;;  %v674_v3 = vpop.f32.mrf.mxu0 }
 0x1c9   :  { %v962_v24 = vadd.f32 %v961_v15, %v672_v10 }
 0x1ca   :  { %v963_v59 = vpop.f32.mrf.mxu1  ;;  %v675_v52 = vpop.f32.mrf.mxu0 }
 0x1cb   :  { %3129 = vmatprep.mubr.f32.mxu0 %v962_v24 }
 0x1cc   :  { %v964_v7 = vpop.f32.mrf.mxu1  ;;  %v677_v27 = vpop.f32.mrf.mxu0 }
 0x1cd   :  { %v965_v63 = vadd.f32 %v964_v7, %v675_v52 }
 0x1ce   :  { %v966_v38 = vpop.f32.mrf.mxu1  ;;  %v680_v14 = vpop.f32.mrf.mxu0 }
 0x1cf   :  { %3130 = vmatmul.mubr.f32.gmra.mxu0 %v965_v63 }
 0x1d0   :  { %v969_v0 = vpop.f32.mrf.mxu1  ;;  %v682_v60 = vpop.f32.mrf.mxu0 }
 0x1d1   :  { %v970_v51 = vadd.f32 %v969_v0, %v680_v14 }
 0x1d2   :  { %v971_v46 = vpop.f32.mrf.mxu1  ;;  %v683_v17 = vpop.f32.mrf.mxu0 }
 0x1d3   :  { %3132 = vmatprep.mubr.f32.mxu0 %v970_v51 }
 0x1d4   :  { %v972_v21 = vpop.f32.mrf.mxu1  ;;  %v685_v47 = vpop.f32.mrf.mxu0 }
 0x1d5   :  { %v973_v2 = vadd.f32 %v972_v21, %v683_v17 }
 0x1d6   :  { %v974_v35 = vpop.f32.mrf.mxu1  ;;  %v688_v19 = vpop.f32.mrf.mxu0 }
 0x1d7   :  { %3133 = vmatmul.mubr.f32.gmra.mxu0 %v973_v2 }
 0x1d8   :  { %v977_v26 = vpop.f32.mrf.mxu1  ;;  %v690_v32 = vpop.f32.mrf.mxu0 }
 0x1d9   :  { %v978_v33 = vadd.f32 %v977_v26, %v688_v19 }
 0x1da   :  { %v979_v40 = vpop.f32.mrf.mxu1  ;;  %v691_v55 = vpop.f32.mrf.mxu0 }
 0x1db   :  { %3135 = vmatprep.mubr.f32.mxu0 %v978_v33 }
 0x1dc   :  { %v980_v58 = vpop.f32.mrf.mxu1  ;;  %v693_v43 = vpop.f32.mrf.mxu0 }
 0x1dd   :  { %v981_v9 = vadd.f32 %v980_v58, %v691_v55 }
 0x1de   :  { %v982_v44 = vpop.f32.mrf.mxu1  ;;  %v696_v22 = vpop.f32.mrf.mxu0 }
 0x1df   :  { %3136 = vmatmul.mubr.f32.gmra.mxu0 %v981_v9 }
 0x1e0   :  { %v985_v20 = vpop.f32.mrf.mxu1  ;;  %v698_v13 = vpop.f32.mrf.mxu0 }
 0x1e1   :  { %v986_v1 = vadd.f32 %v985_v20, %v696_v22 }
 0x1e2   :  { %v987_v12 = vpop.f32.mrf.mxu1  ;;  %v699_v28 = vpop.f32.mrf.mxu0 }
 0x1e3   :  { %3138 = vmatprep.mubr.f32.mxu0 %v986_v1 }
 0x1e4   :  { %v988_v16 = vpop.f32.mrf.mxu1  ;;  %v701_v29 = vpop.f32.mrf.mxu0 }
 0x1e5   :  { %v989_v54 = vadd.f32 %v988_v16, %v699_v28 }
 0x1e6   :  { %v990_v6 = vpop.f32.mrf.mxu1  ;;  %v704_v45 = vpop.f32.mrf.mxu0 }
 0x1e7   :  { %3139 = vmatmul.mubr.f32.gmra.mxu0 %v989_v54 }
 0x1e8   :  { %v993_v10 = vpop.f32.mrf.mxu1  ;;  %v706_v24 = vpop.f32.mrf.mxu0 }
 0x1e9   :  { %v994_v15 = vadd.f32 %v993_v10, %v704_v45  ;;  %v5748_v45 = vunpack.c.l.s8.bf16 %v3700_v48 }
 0x1ea   :  { %v995_v3 = vpop.f32.mrf.mxu1  ;;  %v707_v59 = vpop.f32.mrf.mxu0 }
 0x1eb   :  { %3141 = vmatprep.mubr.f32.mxu0 %v994_v15 }
 0x1ec   :  { %v996_v52 = vpop.f32.mrf.mxu1  ;;  %v709_v63 = vpop.f32.mrf.mxu0 }
 0x1ed   :  { %v997_v7 = vadd.f32 %v996_v52, %v707_v59 }
 0x1ee   :  { %v998_v27 = vpop.f32.mrf.mxu1  ;;  %v712_v38 = vpop.f32.mrf.mxu0 }
 0x1ef   :  { %3142 = vmatmul.mubr.f32.gmra.mxu0 %v997_v7 }
 0x1f0   :  { %v1001_v14 = vpop.f32.mrf.mxu1  ;;  %v714_v51 = vpop.f32.mrf.mxu0 }
 0x1f1   :  { %v1002_v0 = vadd.f32 %v1001_v14, %v712_v38 }
 0x1f2   :  { %v1003_v60 = vpop.f32.mrf.mxu1  ;;  %v715_v46 = vpop.f32.mrf.mxu0 }
 0x1f3   :  { %3144 = vmatprep.mubr.f32.mxu0 %v1002_v0  ;;  %v4634_v60 = vld [vmem:[%s5489_s4] ss:$0 sm:$0xff] }
 0x1f4   :  { %v1004_v17 = vpop.f32.mrf.mxu1  ;;  %v717_v2 = vpop.f32.mrf.mxu0 }
 0x1f5   :  { %v1005_v21 = vadd.f32 %v1004_v17, %v715_v46 }
 0x1f6   :  { %v1006_v47 = vpop.f32.mrf.mxu1  ;;  %v720_v35 = vpop.f32.mrf.mxu0 }
 0x1f7   :  { %3145 = vmatmul.mubr.f32.gmra.mxu0 %v1005_v21 }
 0x1f8   :  { %v1009_v19 = vpop.f32.mrf.mxu1  ;;  %v722_v33 = vpop.f32.mrf.mxu0 }
 0x1f9   :  { %v1010_v26 = vadd.f32 %v1009_v19, %v720_v35 }
 0x1fa   :  { %v1011_v32 = vpop.f32.mrf.mxu1  ;;  %v723_v40 = vpop.f32.mrf.mxu0 }
 0x1fb   :  { %3147 = vmatprep.mubr.f32.mxu0 %v1010_v26 }
 0x1fc   :  { %v1012_v55 = vpop.f32.mrf.mxu1  ;;  %v725_v9 = vpop.f32.mrf.mxu0 }
 0x1fd   :  { %v1013_v58 = vadd.f32 %v1012_v55, %v723_v40 }
 0x1fe   :  { %v1014_v43 = vpop.f32.mrf.mxu1  ;;  %v728_v44 = vpop.f32.mrf.mxu0 }
 0x1ff   :  { %3148 = vmatmul.mubr.f32.gmra.mxu0 %v1013_v58 }
 0x200   :  { %v1017_v22 = vpop.f32.mrf.mxu1  ;;  %v730_v1 = vpop.f32.mrf.mxu0 }
 0x201   :  { %v1018_v20 = vadd.f32 %v1017_v22, %v728_v44 }
 0x202   :  { %v1019_v13 = vpop.f32.mrf.mxu1  ;;  %v731_v12 = vpop.f32.mrf.mxu0 }
 0x203   :  { %3150 = vmatprep.mubr.f32.mxu0 %v1018_v20  ;;  %v5749_v20 = vmov 0  }
 0x204   :  { %v1020_v28 = vpop.f32.mrf.mxu1  ;;  %v733_v54 = vpop.f32.mrf.mxu0 }
 0x205   :  { %v1021_v16 = vadd.f32 %v1020_v28, %v731_v12 }
 0x206   :  { %v1022_v29 = vpop.f32.mrf.mxu1  ;;  %v4623_v6 = vpop.f32.mrf.mxu0 }
 0x207   :  { %3151 = vmatmul.mubr.f32.gmra.mxu0 %v1021_v16 }
 0x208   :  { %1849 = vmatprep.mubr.bf16.mxu0 %v5748_v45  ;;  %v4627_v10 = vpop.f32.mrf.mxu0 }
 0x20a   :  { %v4629_v15 = vpop.f32.mrf.mxu0 }
 0x20c   :  { %v1123_v24 = vpop.f32.mrf.mxu0 }
 0x20e   :  { %v3065_v3 = vpop.f32.mrf.mxu0 }
 0x210   :  { %v1133_v59 = vpop.f32.mrf.mxu0 }
 0x212   :  { %v3068_v52 = vpop.f32.mrf.mxu0 }
 0x214   :  { %v1143_v7 = vpop.f32.mrf.mxu0 }
 0x215   :  { %v1144_v45 = vadd.f32 %v4634_v60, %v1143_v7 }
 0x216   :  { %v3071_v63 = vpop.f32.mrf.mxu0 }
 0x217   :  { %v1159_v16 = vadd.f32 %v3071_v63, %v4634_v60  ;;  %v1134_v63 = vadd.f32 %v4634_v60, %v1133_v59 }
 0x218   :  { %v1153_v27 = vpop.f32.mrf.mxu0 }
 0x219   :  { %v1154_v1 = vadd.f32 %v4634_v60, %v1153_v27  ;;  %v1149_v27 = vadd.f32 %v3068_v52, %v4634_v60  ;;  %v1436_v52 = vmax.f32 %v1134_v63, 0.0 }
 0x21a   :  { %v3074_v38 = vpop.f32.mrf.mxu0 }
 0x21b   :  { %v1169_v43 = vadd.f32 %v3074_v38, %v4634_v60  ;;  %v1440_v38 = vmax.f32 %v1154_v1, 0.0  ;;  %v1119_v1 = vadd.f32 %v4623_v6, %v4634_v60 }
 0x21c   :  { %v1163_v14 = vpop.f32.mrf.mxu0 }
 0x21d   :  { %v1164_v40 = vadd.f32 %v4634_v60, %v1163_v14  ;;  %v1443_v54 = vmax.f32 %v1169_v43, 0.0 }
 0x21e   :  { %v3077_v0 = vpop.f32.mrf.mxu0 }
 0x21f   :  { %v1179_v19 = vadd.f32 %v3077_v0, %v4634_v60  ;;  %v1442_v13 = vmax.f32 %v1164_v40, 0.0 }
 0x220   :  { %v1173_v51 = vpop.f32.mrf.mxu0 }
 0x221   :  { %v1174_v2 = vadd.f32 %v4634_v60, %v1173_v51  ;;  %v1445_v44 = vmax.f32 %v1179_v19, 0.0  ;;  %v1501_v14 = vpack.c.bf16 %v1443_v54, %v1442_v13  ;;  %v1441_v51 = vmax.f32 %v1159_v16, 0.0 }
 0x222   :  { %v3080_v46 = vpop.f32.mrf.mxu0  ;;  %v1439_v19 = vmax.f32 %v1149_v27, 0.0  ;;  %v1433_v16 = vmax.f32 %v1119_v1, 0.0 }
 0x223   :  { %v1189_v17 = vadd.f32 %v3080_v46, %v4634_v60  ;;  %v1444_v55 = vmax.f32 %v1174_v2, 0.0 }
 0x224   :  { %v1183_v21 = vpop.f32.mrf.mxu0 }
 0x225   :  { %v1184_v47 = vadd.f32 %v4634_v60, %v1183_v21  ;;  %v1447_v26 = vmax.f32 %v1189_v17, 0.0  ;;  %v1502_v12 = vpack.c.bf16 %v1445_v44, %v1444_v55  ;;  %v1438_v17 = vmax.f32 %v1144_v45, 0.0 }
 0x226   :  { %v4639_v35 = vpop.f32.mrf.mxu0  ;;  %v1500_v21 = vpack.c.bf16 %v1441_v51, %v1440_v38  ;;  %v1129_v55 = vadd.f32 %v4629_v15, %v4634_v60 }
 0x227   :  { %v1446_v33 = vmax.f32 %v1184_v47, 0.0  ;;  %v1139_v47 = vadd.f32 %v3065_v3, %v4634_v60  ;;  %v1114_v3 = vadd.f32 %v4634_v60, %v4627_v10 }
 0x228   :  { %v4642_v32 = vpop.f32.mrf.mxu0 }
 0x229   :  { %v1503_v58 = vpack.c.bf16 %v1447_v26, %v1446_v33  ;;  %v1124_v26 = vadd.f32 %v4634_v60, %v1123_v24  ;;  %v1499_v33 = vpack.c.bf16 %v1439_v19, %v1438_v17  ;;  %v1435_v24 = vmax.f32 %v1129_v55, 0.0 }
 0x22a   :  { %v4645_v9 = vpop.f32.mrf.mxu0 }
 0x22b   :  { %1529 = vmatpush1.bf16.msra.mxu1 %v1503_v58  ;;  %v1437_v58 = vmax.f32 %v1139_v47, 0.0  ;;  %v1434_v43 = vmax.f32 %v1124_v26, 0.0 }
 0x22c   :  { %v4648_v22 = vpop.f32.mrf.mxu0  ;;  %1530 = vmatprep.subr.bf16.mxu1 %v5749_v20 }
 0x22d   :  { %v1498_v44 = vpack.c.bf16 %v1437_v58, %v1436_v52  ;;  %v1497_v15 = vpack.c.bf16 %v1435_v24, %v1434_v43 }
 0x22e   :  { %v4652_v28 = vpop.f32.mrf.mxu0 }
 0x22f   :  { %1531 = vmatpush1.bf16.msra.mxu1 %v1502_v12  ;;  %v1432_v12 = vmax.f32 %v1114_v3, 0.0 }
 0x230   :  { %v4655_v29 = vpop.f32.mrf.mxu0  ;;  %1532 = vmatprep.subr.bf16.mxu1 %v5749_v20 }
 0x231   :  { %v1496_v45 = vpack.c.bf16 %v1433_v16, %v1432_v12  ;;  %v1219_v12 = vadd.f32 %v4652_v28, %v4634_v60  ;;  %v1194_v28 = vadd.f32 %v4634_v60, %v4642_v32 }
 0x232   :  { %v4659_v0 = vpop.f32.mrf.mxu0 }
 0x233   :  { %1533 = vmatpush1.bf16.msra.mxu1 %v1501_v14 }
 0x234   :  { %v1223_v46 = vpop.f32.mrf.mxu0  ;;  %1534 = vmatprep.subr.bf16.mxu1 %v5749_v20 }
 0x236   :  { %v3095_v2 = vpop.f32.mrf.mxu0 }
 0x237   :  { %1535 = vmatpush1.bf16.msra.mxu1 %v1500_v21  ;;  %v1239_v3 = vadd.f32 %v3095_v2, %v4634_v60 }
 0x238   :  { %v1233_v7 = vpop.f32.mrf.mxu0  ;;  %1536 = vmatprep.subr.bf16.mxu1 %v5749_v20 }
 0x239   :  { %v1457_v24 = vmax.f32 %v1239_v3, 0.0 }
 0x23a   :  { %v3098_v40 = vpop.f32.mrf.mxu0 }
 0x23b   :  { %1537 = vmatpush1.bf16.msra.mxu1 %v1499_v33  ;;  %v1249_v26 = vadd.f32 %v3098_v40, %v4634_v60  ;;  %v1234_v33 = vadd.f32 %v4634_v60, %v1233_v7  ;;  %v1229_v40 = vadd.f32 %v4659_v0, %v4634_v60  ;;  %v1214_v7 = vadd.f32 %v4634_v60, %v4655_v29 }
 0x23c   :  { %v1243_v59 = vpop.f32.mrf.mxu0  ;;  %1538 = vmatprep.subr.bf16.mxu1 %v5749_v20  ;;  %v1204_v0 = vadd.f32 %v4634_v60, %v4648_v22  ;;  %v1453_v29 = vmax.f32 %v1219_v12, 0.0  ;;  %v1199_v22 = vadd.f32 %v4639_v35, %v4634_v60  ;;  %v5751_v35 = vunpack.c.h.s8.bf16 %v3687_v41 }
 0x23d   :  { %v1244_v21 = vadd.f32 %v4634_v60, %v1243_v59  ;;  %v1459_v43 = vmax.f32 %v1249_v26, 0.0  ;;  %v1224_v59 = vadd.f32 %v4634_v60, %v1223_v46  ;;  %v1452_v16 = vmax.f32 %v1214_v7, 0.0 }
 0x23e   :  { %v5750_v26 = vunpack.c.l.s8.bf16 %v3800_v39  ;;  %v5756_v7 = vunpack.c.h.s8.bf16 %v3845_v56 }
 0x23f   :  { %1539 = vmatpush1.bf16.msra.mxu1 %v1498_v44  ;;  %v3101_v13 = vpop.f32.mrf.mxu0  ;;  %v1458_v55 = vmax.f32 %v1244_v21, 0.0  ;;  %v1456_v44 = vmax.f32 %v1234_v33, 0.0 }
 0x240   :  { %1540 = vmatprep.subr.bf16.mxu1 %v5749_v20  ;;  %v1259_v51 = vadd.f32 %v3101_v13, %v4634_v60  ;;  %v1454_v13 = vmax.f32 %v1224_v59, 0.0 }
 0x241   :  { %v1253_v54 = vpop.f32.mrf.mxu0  ;;  %v1509_v1 = vpack.c.bf16 %v1459_v43, %v1458_v55  ;;  %v1508_v2 = vpack.c.bf16 %v1457_v24, %v1456_v44  ;;  %v5752_v55 = vunpack.c.h.s8.bf16 %v3800_v39  ;;  %v5754_v44 = vunpack.c.l.s8.bf16 %v3845_v56 }
 0x242   :  { %v1254_v6 = vadd.f32 %v4634_v60, %v1253_v54  ;;  %v1461_v52 = vmax.f32 %v1259_v51, 0.0  ;;  %v5758_v56 = vunpack.c.l.s8.bf16 %v3889_v5 }
 0x243   :  { %1541 = vmatpush1.bf16.msra.mxu1 %v1497_v15  ;;  %v1455_v15 = vmax.f32 %v1229_v40, 0.0 }
 0x244   :  { %1542 = vmatprep.subr.bf16.mxu1 %v5749_v20  ;;  %v1460_v47 = vmax.f32 %v1254_v6, 0.0 }
 0x245   :  { %v1507_v54 = vpack.c.bf16 %v1455_v15, %v1454_v13  ;;  %v5757_v13 = vunpack.c.l.s8.bf16 %v3869_v62 }
 0x246   :  { %v1510_v58 = vpack.c.bf16 %v1461_v52, %v1460_v47 }
 0x247   :  { %v3104_v38 = vpop.f32.mrf.mxu0  ;;  %1543 = vmatpush1.bf16.msra.mxu1 %v1496_v45  ;;  %v1209_v45 = vadd.f32 %v4645_v9, %v4634_v60  ;;  %v1448_v9 = vmax.f32 %v1194_v28, 0.0 }
 0x248   :  { %v1269_v10 = vadd.f32 %v3104_v38, %v4634_v60  ;;  %1544 = vmatprep.subr.bf16.mxu1 %v5749_v20 }
 0x249   :  { %v1263_v14 = vpop.f32.mrf.mxu0 }
 0x24a   :  { %v1264_v27 = vadd.f32 %v4634_v60, %v1263_v14  ;;  %v1463_v63 = vmax.f32 %v1269_v10, 0.0  ;;  %v1450_v10 = vmax.f32 %v1204_v0, 0.0  ;;  %v1506_v14 = vpack.c.bf16 %v1453_v29, %v1452_v16 }
 0x24c   :  { %v1462_v17 = vmax.f32 %v1264_v27, 0.0  ;;  %v1451_v27 = vmax.f32 %v1209_v45, 0.0 }
 0x24e   :  { %v1511_v19 = vpack.c.bf16 %v1463_v63, %v1462_v17  ;;  %v1505_v51 = vpack.c.bf16 %v1451_v27, %v1450_v10  ;;  %v1449_v17 = vmax.f32 %v1199_v22, 0.0 }
 0x24f   :  { %v4695_v46 = vpop.f32.mrf.mxu0 }
 0x250   :  { %1545 = vmatpush2.bf16.msra.mxu1 %v1511_v19  ;;  %v1504_v32 = vpack.c.bf16 %v1449_v17, %v1448_v9 }
 0x251   :  { %1546 = vmatprep.subr.bf16.mxu1 %v5749_v20  ;;  %v4702_v38 = vpop.f32.mrf.mxu0 }
 0x254   :  { %1547 = vmatpush2.bf16.msra.mxu1 %v1510_v58  ;;  %v5753_v58 = vunpack.c.l.s8.bf16 %v3825_v49 }
 0x255   :  { %1548 = vmatprep.subr.bf16.mxu1 %v5749_v20 }
 0x257   :  { %v4707_v6 = vpop.f32.mrf.mxu0 }
 0x258   :  { %1549 = vmatpush2.bf16.msra.mxu1 %v1509_v1  ;;  %v5755_v1 = vunpack.c.h.s8.bf16 %v3825_v49 }
 0x259   :  { %1550 = vmatprep.subr.bf16.mxu1 %v5749_v20  ;;  %v4712_v63 = vpop.f32.mrf.mxu0 }
 0x25c   :  { %1551 = vmatpush2.bf16.msra.mxu1 %v1508_v2 }
 0x25d   :  { %1552 = vmatprep.subr.bf16.mxu1 %v5749_v20 }
 0x25f   :  { %v3113_v21 = vpop.f32.mrf.mxu0 }
 0x260   :  { %1553 = vmatpush2.bf16.msra.mxu1 %v1507_v54 }
 0x261   :  { %1554 = vmatprep.subr.bf16.mxu1 %v5749_v20  ;;  %v1293_v47 = vpop.f32.mrf.mxu0 }
 0x264   :  { %1555 = vmatpush2.bf16.msra.mxu1 %v1506_v14  ;;  %v5759_v14 = vunpack.c.h.s8.bf16 %v3869_v62 }
 0x265   :  { %1556 = vmatprep.subr.bf16.mxu1 %v5749_v20 }
 0x267   :  { %v3116_v19 = vpop.f32.mrf.mxu0 }
 0x268   :  { %1557 = vmatpush2.bf16.msra.mxu1 %v1505_v51  ;;  %v1309_v62 = vadd.f32 %v3116_v19, %v4634_v60 }
 0x269   :  { %1558 = vmatprep.subr.bf16.mxu1 %v5749_v20  ;;  %v1303_v52 = vpop.f32.mrf.mxu0 }
 0x26c   :  { %1559 = vmatpush2.bf16.msra.mxu1 %v1504_v32  ;;  %v1304_v32 = vadd.f32 %v4634_v60, %v1303_v52  ;;  %v1299_v52 = vadd.f32 %v3113_v21, %v4634_v60  ;;  %v5763_v21 = vunpack.c.h.s8.bf16 %v3913_v11 }
 0x26f   :  { %1561 = vmatmul.mubr.bf16.vlgmr.msra.gmra.mxu1 %v5750_v26  ;;  %v3119_v33 = vpop.f32.mrf.mxu0 }
 0x270   :  { %1568 = vmatprep.mubr.bf16.mxu1 %v5751_v35  ;;  %v1319_v51 = vadd.f32 %v3119_v33, %v4634_v60  ;;  %v1294_v33 = vadd.f32 %v4634_v60, %v1293_v47  ;;  %v1289_v47 = vadd.f32 %v4707_v6, %v4634_v60 }
 0x271   :  { %v1313_v3 = vpop.f32.mrf.mxu0 }
 0x272   :  { %v1314_v22 = vadd.f32 %v4634_v60, %v1313_v3  ;;  %v5761_v3 = vunpack.c.l.s8.bf16 %v3913_v11  ;;  %v1468_v19 = vmax.f32 %v1294_v33, 0.0  ;;  %v1467_v6 = vmax.f32 %v1289_v47, 0.0 }
 0x274   :  { %v1472_v26 = vmax.f32 %v1314_v22, 0.0  ;;  %v5769_v22 = vunpack.c.l.s8.bf16 %v4007_v37 }
 0x277   :  { %1569 = vmatmul.mubr.bf16.gmra.mxu1 %v5752_v55  ;;  %v3122_v43 = vpop.f32.mrf.mxu0  ;;  %v5760_v55 = vunpack.c.h.s8.bf16 %v3889_v5  ;;  %v1284_v5 = vadd.f32 %v4634_v60, %v4712_v63  ;;  %v1274_v63 = vadd.f32 %v4634_v60, %v4702_v38  ;;  %v5765_v38 = vunpack.c.l.s8.bf16 %v3963_v25 }
 0x278   :  { %1576 = vmatprep.mubr.bf16.mxu1 %v5753_v58  ;;  %v1329_v28 = vadd.f32 %v3122_v43, %v4634_v60  ;;  %v1473_v58 = vmax.f32 %v1319_v51, 0.0  ;;  %v1470_v43 = vmax.f32 %v1304_v32, 0.0  ;;  %v5771_v32 = vunpack.c.h.s8.bf16 %v4007_v37 }
 0x279   :  { %v1323_v59 = vpop.f32.mrf.mxu0  ;;  %v1464_v11 = vmax.f32 %v1274_v63, 0.0 }
 0x27a   :  { %v1324_v54 = vadd.f32 %v4634_v60, %v1323_v59  ;;  %v1475_v17 = vmax.f32 %v1329_v28, 0.0  ;;  %v1516_v59 = vpack.c.bf16 %v1473_v58, %v1472_v26 }
 0x27c   :  { %v1474_v27 = vmax.f32 %v1324_v54, 0.0 }
 0x27e   :  { %v1517_v35 = vpack.c.bf16 %v1475_v17, %v1474_v27  ;;  %v5770_v17 = vunpack.c.l.s8.bf16 %v4030_v30 }
 0x27f   :  { %1577 = vmatmul.mubr.bf16.gmra.mxu1 %v5754_v44  ;;  %v3125_v40 = vpop.f32.mrf.mxu0  ;;  %v1471_v44 = vmax.f32 %v1309_v62, 0.0  ;;  %v5773_v62 = vunpack.c.l.s8.bf16 %v4054_v34 }
 0x280   :  { %1584 = vmatprep.mubr.bf16.mxu1 %v5755_v1  ;;  %v1339_v0 = vadd.f32 %v3125_v40, %v4634_v60 }
 0x281   :  { %v1333_v41 = vpop.f32.mrf.mxu0  ;;  %v1515_v40 = vpack.c.bf16 %v1471_v44, %v1470_v43 }
 0x282   :  { %v1334_v12 = vadd.f32 %v4634_v60, %v1333_v41  ;;  %v1477_v10 = vmax.f32 %v1339_v0, 0.0  ;;  %v5762_v41 = vunpack.c.l.s8.bf16 %v3936_v18 }
 0x284   :  { %v1476_v45 = vmax.f32 %v1334_v12, 0.0  ;;  %v1279_v12 = vadd.f32 %v4695_v46, %v4634_v60 }
 0x286   :  { %v1518_v9 = vpack.c.bf16 %v1477_v10, %v1476_v45 }
 0x287   :  { %v3128_v24 = vpop.f32.mrf.mxu0  ;;  %1585 = vmatmul.mubr.bf16.gmra.mxu1 %v5756_v7 }
 0x288   :  { %v1349_v39 = vadd.f32 %v3128_v24, %v4634_v60  ;;  %1592 = vmatprep.mubr.bf16.mxu1 %v5757_v13  ;;  %v1469_v24 = vmax.f32 %v1299_v52, 0.0 }
 0x289   :  { %v1343_v2 = vpop.f32.mrf.mxu0 }
 0x28a   :  { %v1344_v15 = vadd.f32 %v4634_v60, %v1343_v2  ;;  %v1479_v49 = vmax.f32 %v1349_v39, 0.0  ;;  %v1466_v39 = vmax.f32 %v1284_v5, 0.0  ;;  %v1514_v13 = vpack.c.bf16 %v1469_v24, %v1468_v19 }
 0x28c   :  { %v1478_v16 = vmax.f32 %v1344_v15, 0.0  ;;  %v1513_v15 = vpack.c.bf16 %v1467_v6, %v1466_v39 }
 0x28e   :  { %v1519_v29 = vpack.c.bf16 %v1479_v49, %v1478_v16  ;;  %v5764_v49 = vunpack.c.h.s8.bf16 %v3936_v18  ;;  %v1465_v16 = vmax.f32 %v1279_v12, 0.0  ;;  %v5767_v18 = vunpack.c.h.s8.bf16 %v3963_v25 }
 0x28f   :  { %1593 = vmatmul.mubr.bf16.gmra.mxu1 %v5758_v56  ;;  %v4754_v1 = vpop.f32.mrf.mxu0  ;;  %v5766_v56 = vunpack.c.l.s8.bf16 %v3983_v31 }
 0x290   :  { %1818 = vmatpush1.bf16.msra.mxu0 %v1519_v29  ;;  %1600 = vmatprep.mubr.bf16.mxu1 %v5759_v14  ;;  %v1512_v46 = vpack.c.bf16 %v1465_v16, %v1464_v11  ;;  %v5768_v14 = vunpack.c.h.s8.bf16 %v3983_v31  ;;  %v5776_v11 = vunpack.c.h.s8.bf16 %v4077_v4 }
 0x291   :  { %1819 = vmatprep.subr.bf16.mxu0 %v5749_v20  ;;  %v4765_v7 = vpop.f32.mrf.mxu0 }
 0x294   :  { %1820 = vmatpush1.bf16.msra.mxu0 %v1518_v9 }
 0x295   :  { %1821 = vmatprep.subr.bf16.mxu0 %v5749_v20 }
 0x297   :  { %1601 = vmatmul.mubr.bf16.gmra.mxu1 %v5760_v55  ;;  %v4770_v2 = vpop.f32.mrf.mxu0  ;;  %v5772_v55 = vunpack.c.h.s8.bf16 %v4030_v30  ;;  %v5774_v30 = vunpack.c.l.s8.bf16 %v4077_v4 }
 0x298   :  { %1822 = vmatpush1.bf16.msra.mxu0 %v1517_v35  ;;  %1608 = vmatprep.mubr.bf16.mxu1 %v5761_v3 }
 0x299   :  { %1823 = vmatprep.subr.bf16.mxu0 %v5749_v20  ;;  %v4775_v0 = vpop.f32.mrf.mxu0 }
 0x29a   :  { %v1364_v4 = vadd.f32 %v4634_v60, %v4775_v0 }
 0x29c   :  { %1824 = vmatpush1.bf16.msra.mxu0 %v1516_v59 }
 0x29d   :  { %1825 = vmatprep.subr.bf16.mxu0 %v5749_v20 }
 0x29f   :  { %1609 = vmatmul.mubr.bf16.gmra.mxu1 %v5762_v41  ;;  %v3137_v54 = vpop.f32.mrf.mxu0  ;;  %v5775_v41 = vunpack.c.h.s8.bf16 %v4054_v34 }
 0x2a0   :  { %1826 = vmatpush1.bf16.msra.mxu0 %v1515_v40  ;;  %1616 = vmatprep.mubr.bf16.mxu1 %v5763_v21 }
 0x2a1   :  { %1827 = vmatprep.subr.bf16.mxu0 %v5749_v20  ;;  %v1373_v45 = vpop.f32.mrf.mxu0 }
 0x2a2   :  { %v1374_v16 = vadd.f32 %v4634_v60, %v1373_v45 }
 0x2a4   :  { %1828 = vmatpush1.bf16.msra.mxu0 %v1514_v13 }
 0x2a5   :  { %1829 = vmatprep.subr.bf16.mxu0 %v5749_v20 }
 0x2a7   :  { %1617 = vmatmul.mubr.bf16.gmra.mxu1 %v5764_v49  ;;  %v3140_v29 = vpop.f32.mrf.mxu0  ;;  %v5777_v49 = vunpack.c.l.s8.bf16 %v4101_v8 }
 0x2a8   :  { %1830 = vmatpush1.bf16.msra.mxu0 %v1513_v15  ;;  %1624 = vmatprep.mubr.bf16.mxu1 %v5765_v38  ;;  %v1389_v34 = vadd.f32 %v3140_v29, %v4634_v60  ;;  %v1484_v29 = vmax.f32 %v1374_v16, 0.0 }
 0x2a9   :  { %1831 = vmatprep.subr.bf16.mxu0 %v5749_v20  ;;  %v1383_v28 = vpop.f32.mrf.mxu0 }
 0x2aa   :  { %v1384_v13 = vadd.f32 %v4634_v60, %v1383_v28 }
 0x2ac   :  { %1832 = vmatpush1.bf16.msra.mxu0 %v1512_v46  ;;  %v1486_v38 = vmax.f32 %v1384_v13, 0.0  ;;  %v2771_v13 = vld [vmem:[%s5488_s3 + $0xe0] sm:$0xff] }
 0x2ad   :  { %1833 = vmatprep.subr.bf16.mxu0 %v5749_v20 }
 0x2af   :  { %1625 = vmatmul.mubr.bf16.gmra.mxu1 %v5766_v56  ;;  %v3143_v10 = vpop.f32.mrf.mxu0  ;;  %v1379_v56 = vadd.f32 %v3137_v54, %v4634_v60  ;;  %v1354_v54 = vadd.f32 %v4634_v60, %v4765_v7 }
 0x2b0   :  { %1632 = vmatprep.mubr.bf16.mxu1 %v5767_v18  ;;  %v1399_v63 = vadd.f32 %v3143_v10, %v4634_v60  ;;  %v1487_v18 = vmax.f32 %v1389_v34, 0.0  ;;  %v5778_v10 = vunpack.c.l.s8.bf16 %v4124_v61  ;;  %v5815_v34 = vld [vmem:[#allocation25_spill] sm:$0xff] }
 0x2b1   :  { %v1393_v27 = vpop.f32.mrf.mxu0  ;;  %v1485_v45 = vmax.f32 %v1379_v56, 0.0  ;;  %v2767_v56 = vld [vmem:[%s5488_s3 + $0xc0] sm:$0xff] }
 0x2b2   :  { %v1394_v47 = vadd.f32 %v4634_v60, %v1393_v27  ;;  %v1489_v15 = vmax.f32 %v1399_v63, 0.0  ;;  %v1523_v28 = vpack.c.bf16 %v1487_v18, %v1486_v38  ;;  %v1482_v27 = vmax.f32 %v1364_v4, 0.0  ;;  %v2769_v38 = vld [vmem:[%s5488_s3 + $0xd0] sm:$0xff] }
 0x2b3   :  { %v1522_v0 = vpack.c.bf16 %v1485_v45, %v1484_v29  ;;  %v5820_v4 = vunpack.c.h.s8.bf16 %v5815_v34  ;;  %v5821_v29 = vld [vmem:[#allocation6_spill] sm:$0xff]  ;;  %v2766_v45 = vld [vmem:[%s5488_s3 + $0xb8] sm:$0xff] }
 0x2b4   :  { %v1488_v12 = vmax.f32 %v1394_v47, 0.0  ;;  %v5809_v47 = vld [vmem:[#allocation4_spill] sm:$0xff] }
 0x2b6   :  { %v1524_v46 = vpack.c.bf16 %v1489_v15, %v1488_v12  ;;  %v2770_v12 = vld [vmem:[%s5488_s3 + $0xd8] sm:$0xff]  ;;  %v5816_v15 = vunpack.c.l.s8.bf16 %v5815_v34 }
 0x2b7   :  { %1633 = vmatmul.mubr.bf16.gmra.mxu1 %v5768_v14  ;;  %v3146_v9 = vpop.f32.mrf.mxu0  ;;  %v1369_v14 = vadd.f32 %v4770_v2, %v4634_v60  ;;  %v1480_v2 = vmax.f32 %v1354_v54, 0.0  ;;  %v2764_v54 = vld [vmem:[%s5488_s3 + $0xa8] sm:$0xff]  ;;  %v5851_v34 = vld [vmem:[#allocation37_spill] sm:$0xff] }
 0x2b8   :  { %1640 = vmatprep.mubr.bf16.mxu1 %v5769_v22  ;;  %v1409_v19 = vadd.f32 %v3146_v9, %v4634_v60  ;;  %v5779_v22 = vunpack.c.h.s8.bf16 %v4101_v8  ;;  %v1359_v9 = vadd.f32 %v4754_v1, %v4634_v60  ;;  %v5783_v1 = vunpack.c.l.s8.bf16 %v4189_v36 }
 0x2b9   :  { %v1403_v51 = vpop.f32.mrf.mxu0 }
 0x2ba   :  { %v1404_v52 = vadd.f32 %v4634_v60, %v1403_v51  ;;  %v1491_v39 = vmax.f32 %v1409_v19, 0.0  ;;  %v1483_v51 = vmax.f32 %v1369_v14, 0.0  ;;  %v1481_v8 = vmax.f32 %v1359_v9, 0.0 }
 0x2bc   :  { %v1490_v24 = vmax.f32 %v1404_v52, 0.0  ;;  %v1520_v7 = vpack.c.bf16 %v1481_v8, %v1480_v2  ;;  %v5801_v52 = vld [vmem:[#allocation3_spill] sm:$0xff]  ;;  %v2763_v8 = vld [vmem:[%s5488_s3 + $0xa0] sm:$0xff] }
 0x2bd   :  { %v5807_v19 = vunpack.c.h.s8.bf16 %v5801_v52 }
 0x2be   :  { %v1525_v6 = vpack.c.bf16 %v1491_v39, %v1490_v24  ;;  %v5810_v24 = vunpack.c.l.s8.bf16 %v5809_v47  ;;  %v2772_v39 = vld [vmem:[%s5488_s3 + $0xe8] sm:$0xff] }
 0x2bf   :  { %1641 = vmatmul.mubr.bf16.gmra.mxu1 %v5770_v17  ;;  %v3149_v26 = vpop.f32.mrf.mxu0  ;;  %v1521_v17 = vpack.c.bf16 %v1483_v51, %v1482_v27  ;;  %v5825_v27 = vld [vmem:[#allocation7_spill] sm:$0xff]  ;;  %v5827_v51 = vld [vmem:[#allocation29_spill] sm:$0xff] }
 0x2c0   :  { %1648 = vmatprep.mubr.bf16.mxu1 %v5771_v32  ;;  %v1419_v43 = vadd.f32 %v3149_v26, %v4634_v60  ;;  %v5780_v32 = vunpack.c.h.s8.bf16 %v4124_v61  ;;  %v5781_v26 = vunpack.c.l.s8.bf16 %v4160_v53  ;;  %v5785_v61 = vunpack.c.h.s8.bf16 %v4160_v53 }
 0x2c1   :  { %v1413_v25 = vpop.f32.mrf.mxu0  ;;  %v5793_v53 = vunpack.c.h.s8.bf16 %v3830_v50  ;;  %v5828_v2 = vunpack.c.l.s8.bf16 %v5827_v51 }
 0x2c2   :  { %v1414_v3 = vadd.f32 %v4634_v60, %v1413_v25  ;;  %v1493_v40 = vmax.f32 %v1419_v43, 0.0  ;;  %v5784_v25 = vunpack.c.h.s8.bf16 %v3700_v48  ;;  %v5791_v48 = vld [vmem:[#allocation17_spill] sm:$0xff] }
 0x2c4   :  { %v1492_v44 = vmax.f32 %v1414_v3, 0.0  ;;  %v5796_v3 = vunpack.c.h.s8.bf16 %v5791_v48 }
 0x2c6   :  { %v1526_v21 = vpack.c.bf16 %v1493_v40, %v1492_v44  ;;  %v5802_v44 = vunpack.c.l.s8.bf16 %v5801_v52 }
 0x2c7   :  { %v3152_v35 = vpop.f32.mrf.mxu0  ;;  %1649 = vmatmul.mubr.bf16.gmra.mxu1 %v5772_v55  ;;  %v5787_v55 = vunpack.c.h.s8.bf16 %v4189_v36  ;;  %v5795_v36 = vunpack.c.h.s8.bf16 %v3852_v57 }
 0x2c8   :  { %v1429_v31 = vadd.f32 %v3152_v35, %v4634_v60  ;;  %1656 = vmatprep.mubr.bf16.mxu1 %v5773_v62  ;;  %v5786_v35 = vunpack.c.h.s8.bf16 %v3806_v42  ;;  %v5790_v62 = vunpack.c.l.s8.bf16 %v3852_v57  ;;  %v2774_v57 = vld [vmem:[%s5488_s3 + $0xf8] sm:$0xff] }
 0x2c9   :  { %v1423_v58 = vpop.f32.mrf.mxu0  ;;  %3153 = vmatprep.subr.mxu1 %v2774_v57 }
 0x2ca   :  { %v1424_v33 = vadd.f32 %v4634_v60, %v1423_v58  ;;  %v1495_v37 = vmax.f32 %v1429_v31, 0.0  ;;  %v5782_v60 = vunpack.c.l.s8.bf16 %v3806_v42  ;;  %v5789_v31 = vunpack.c.l.s8.bf16 %v4222_v23  ;;  %3154 = vmatpush3.msra.mxu1 %v2774_v57 }
 0x2cb   :  { %v5792_v58 = vunpack.c.l.s8.bf16 %v5791_v48  ;;  %v5794_v42 = vunpack.c.h.s8.bf16 %v4222_v23 }
 0x2cc   :  { %v1494_v59 = vmax.f32 %v1424_v33, 0.0  ;;  %v5797_v33 = vld [vmem:[#allocation2_spill] sm:$0xff] }
 0x2cd   :  { %v5798_v43 = vunpack.c.l.s8.bf16 %v5797_v33  ;;  %v5805_v23 = vunpack.c.h.s8.bf16 %v5797_v33  ;;  %v5837_v33 = vld [vmem:[#allocation9_spill] sm:$0xff] }
 0x2ce   :  { %v1527_v5 = vpack.c.bf16 %v1495_v37, %v1494_v59  ;;  %v5799_v37 = vld [vmem:[#allocation19_spill] sm:$0xff] }
 0x2cf   :  { %1657 = vmatmul.mubr.bf16.gmra.mxu1 %v5774_v30  ;;  %v5800_v59 = vunpack.c.l.s8.bf16 %v5799_v37  ;;  %v5806_v30 = vunpack.c.h.s8.bf16 %v5799_v37 }
 0x2d0   :  { %1834 = vmatpush2.bf16.msra.mxu0 %v1527_v5  ;;  %1664 = vmatprep.mubr.bf16.mxu1 %v5775_v41  ;;  %v2773_v41 = vld [vmem:[%s5488_s3 + $0xf0] sm:$0xff] }
 0x2d1   :  { %1835 = vmatprep.subr.bf16.mxu0 %v5749_v20  ;;  %3155 = vmatprep.subr.mxu1 %v2773_v41 }
 0x2d2   :  { %3156 = vmatpush3.msra.mxu1 %v2773_v41  ;;  %v5845_v41 = vld [vmem:[#allocation10_spill] sm:$0xff] }
 0x2d3   :  { %3157 = vmatprep.subr.mxu1 %v2772_v39 }
 0x2d4   :  { %1836 = vmatpush2.bf16.msra.mxu0 %v1526_v21  ;;  %v5811_v21 = vld [vmem:[#allocation23_spill] sm:$0xff]  ;;  %3158 = vmatpush3.msra.mxu1 %v2772_v39 }
 0x2d5   :  { %1837 = vmatprep.subr.bf16.mxu0 %v5749_v20  ;;  %v5812_v63 = vunpack.c.l.s8.bf16 %v5811_v21  ;;  %3159 = vmatprep.subr.mxu1 %v2771_v13  ;;  %v5818_v16 = vunpack.c.h.s8.bf16 %v5811_v21 }
 0x2d6   :  { %3160 = vmatpush3.msra.mxu1 %v2771_v13 }
 0x2d7   :  { %1665 = vmatmul.mubr.bf16.gmra.mxu1 %v5776_v11  ;;  %3161 = vmatprep.subr.mxu1 %v2770_v12 }
 0x2d8   :  { %1838 = vmatpush2.bf16.msra.mxu0 %v1525_v6  ;;  %1672 = vmatprep.mubr.bf16.mxu1 %v5777_v49  ;;  %v5813_v6 = vld [vmem:[#allocation5_spill] sm:$0xff]  ;;  %v5817_v49 = vunpack.c.h.s8.bf16 %v5809_v47  ;;  %v5846_v47 = vunpack.c.l.s8.bf16 %v5845_v41 }
 0x2d9   :  { %1839 = vmatprep.subr.bf16.mxu0 %v5749_v20  ;;  %v5814_v11 = vunpack.c.l.s8.bf16 %v5813_v6  ;;  %3162 = vmatpush3.msra.mxu1 %v2770_v12  ;;  %v5819_v18 = vunpack.c.h.s8.bf16 %v5813_v6  ;;  %v5849_v12 = vld [vmem:[#allocation11_spill] sm:$0xff] }
 0x2da   :  { %3163 = vmatprep.subr.mxu1 %v2769_v38  ;;  %v5850_v6 = vunpack.c.l.s8.bf16 %v5849_v12 }
 0x2db   :  { %3164 = vmatpush3.msra.mxu1 %v2769_v38 }
 0x2dc   :  { %1840 = vmatpush2.bf16.msra.mxu0 %v1524_v46  ;;  %v2768_v46 = vld [vmem:[%s5488_s3 + $0xc8] sm:$0xff] }
 0x2dd   :  { %1841 = vmatprep.subr.bf16.mxu0 %v5749_v20  ;;  %3165 = vmatprep.subr.mxu1 %v2768_v46 }
 0x2de   :  { %3166 = vmatpush3.msra.mxu1 %v2768_v46 }
 0x2df   :  { %1673 = vmatmul.mubr.bf16.gmra.mxu1 %v5778_v10  ;;  %v5823_v10 = vld [vmem:[#allocation27_spill] sm:$0xff]  ;;  %3167 = vmatprep.subr.mxu1 %v2767_v56 }
 0x2e0   :  { %1842 = vmatpush2.bf16.msra.mxu0 %v1523_v28  ;;  %1680 = vmatprep.mubr.bf16.mxu1 %v5779_v22  ;;  %v5822_v28 = vunpack.c.l.s8.bf16 %v5821_v29  ;;  %v5824_v14 = vunpack.c.l.s8.bf16 %v5823_v10  ;;  %v2765_v22 = vld [vmem:[%s5488_s3 + $0xb0] sm:$0xff] }
 0x2e1   :  { %1843 = vmatprep.subr.bf16.mxu0 %v5749_v20  ;;  %3168 = vmatpush3.msra.mxu1 %v2767_v56 }
 0x2e2   :  { %3169 = vmatprep.subr.mxu1 %v2766_v45 }
 0x2e3   :  { %3170 = vmatpush3.msra.mxu1 %v2766_v45 }
 0x2e4   :  { %1844 = vmatpush2.bf16.msra.mxu0 %v1522_v0  ;;  %3171 = vmatprep.subr.mxu1 %v2765_v22  ;;  %v5826_v0 = vunpack.c.l.s8.bf16 %v5825_v27 }
 0x2e5   :  { %1845 = vmatprep.subr.bf16.mxu0 %v5749_v20  ;;  %3172 = vmatpush3.msra.mxu1 %v2765_v22 }
 0x2e6   :  { %3173 = vmatprep.subr.mxu1 %v2764_v54 }
 0x2e7   :  { %1681 = vmatmul.mubr.bf16.gmra.mxu1 %v5780_v32  ;;  %v5830_v32 = vunpack.c.h.s8.bf16 %v5823_v10 }
 0x2e8   :  { %1846 = vmatpush2.bf16.msra.mxu0 %v1521_v17  ;;  %1688 = vmatprep.mubr.bf16.mxu1 %v5781_v26  ;;  %v5829_v17 = vunpack.c.h.s8.bf16 %v5821_v29  ;;  %v5856_v29 = vunpack.c.h.s8.bf16 %v5851_v34 }
 0x2e9   :  { %1847 = vmatprep.subr.bf16.mxu0 %v5749_v20  ;;  %v5788_v20 = vunpack.c.l.s8.bf16 %v3830_v50  ;;  %v5803_v50 = vld [vmem:[#allocation21_spill] sm:$0xff]  ;;  %3174 = vmatpush3.msra.mxu1 %v2764_v54 }
 0x2ea   :  { %v5804_v5 = vunpack.c.l.s8.bf16 %v5803_v50  ;;  %v5808_v40 = vunpack.c.h.s8.bf16 %v5803_v50  ;;  %3175 = vmatprep.subr.mxu1 %v2763_v8 }
 0x2eb   :  { %3176 = vmatpush3.msra.mxu1 %v2763_v8 }
 0x2ec   :  { %1848 = vmatpush2.bf16.msra.mxu0 %v1520_v7  ;;  %v2762_v7 = vld [vmem:[%s5488_s3 + $0x98] sm:$0xff] }
 0x2ed   :  { %3177 = vmatprep.subr.mxu1 %v2762_v7 }
 0x2ee   :  { %3178 = vmatpush3.msra.mxu1 %v2762_v7 }
 0x2ef   :  { %1850 = vmatmul.mubr.bf16.vlgmr.msra.gmra.mxu0 %v5782_v60  ;;  %1689 = vmatmul.mubr.bf16.gmra.mxu1 %v5783_v1 }
 0x2f0   :  { %1857 = vmatprep.mubr.bf16.mxu0 %v5784_v25  ;;  %1696 = vmatprep.mubr.bf16.mxu1 %v5785_v61  ;;  %v2761_v25 = vld [vmem:[%s5488_s3 + $0x90] sm:$0xff]  ;;  %v5831_v61 = vunpack.c.h.s8.bf16 %v5825_v27 }
 0x2f1   :  { %3179 = vmatprep.subr.mxu1 %v2761_v25 }
 0x2f2   :  { %3180 = vmatpush3.msra.mxu1 %v2761_v25 }
 0x2f7   :  { %1858 = vmatmul.mubr.bf16.gmra.mxu0 %v5786_v35  ;;  %1697 = vmatmul.mubr.bf16.gmra.mxu1 %v5787_v55  ;;  %v5832_v55 = vunpack.c.h.s8.bf16 %v5827_v51 }
 0x2f8   :  { %1865 = vmatprep.mubr.bf16.mxu0 %v5788_v20  ;;  %1704 = vmatprep.mubr.bf16.mxu1 %v5789_v31  ;;  %v5833_v20 = vld [vmem:[#allocation8_spill] sm:$0xff] }
 0x2f9   :  { %v5834_v31 = vunpack.c.l.s8.bf16 %v5833_v20 }
 0x2ff   :  { %1866 = vmatmul.mubr.bf16.gmra.mxu0 %v5790_v62  ;;  %1705 = vmatmul.mubr.bf16.gmra.mxu1 %v5792_v58  ;;  %v5835_v62 = vld [vmem:[#allocation31_spill] sm:$0xff] }
 0x300   :  { %1873 = vmatprep.mubr.bf16.mxu0 %v5793_v53  ;;  %1712 = vmatprep.mubr.bf16.mxu1 %v5794_v42  ;;  %v5836_v48 = vunpack.c.l.s8.bf16 %v5835_v62  ;;  %v2760_v58 = vld [vmem:[%s5488_s3 + $0x88] sm:$0xff]  ;;  %v2759_v42 = vld [vmem:[%s5488_s3 + $0x80] sm:$0xff]  ;;  %v5842_v50 = vunpack.c.h.s8.bf16 %v5835_v62 }
 0x301   :  { %3181 = vmatprep.subr.mxu1 %v2760_v58 }
 0x302   :  { %3182 = vmatpush3.msra.mxu1 %v2760_v58 }
 0x303   :  { %3183 = vmatprep.subr.mxu1 %v2759_v42 }
 0x304   :  { %3184 = vmatpush3.msra.mxu1 %v2759_v42  ;;  %v5871_v42 = vld [vmem:[#allocation15_spill] sm:$0xff] }
 0x307   :  { %1874 = vmatmul.mubr.bf16.gmra.mxu0 %v5795_v36  ;;  %1713 = vmatmul.mubr.bf16.gmra.mxu1 %v5796_v3 }
 0x308   :  { %1881 = vmatprep.mubr.bf16.mxu0 %v5798_v43  ;;  %1720 = vmatprep.mubr.bf16.mxu1 %v5800_v59  ;;  %v5838_v43 = vunpack.c.l.s8.bf16 %v5837_v33  ;;  %v5839_v59 = vld [vmem:[#allocation33_spill] sm:$0xff] }
 0x309   :  { %v5840_v52 = vunpack.c.l.s8.bf16 %v5839_v59 }
 0x30f   :  { %1882 = vmatmul.mubr.bf16.gmra.mxu0 %v5802_v44  ;;  %1721 = vmatmul.mubr.bf16.gmra.mxu1 %v5804_v5  ;;  %v5841_v44 = vunpack.c.h.s8.bf16 %v5833_v20 }
 0x310   :  { %1889 = vmatprep.mubr.bf16.mxu0 %v5805_v23  ;;  %1728 = vmatprep.mubr.bf16.mxu1 %v5806_v30  ;;  %v5843_v30 = vunpack.c.h.s8.bf16 %v5837_v33 }
 0x317   :  { %1890 = vmatmul.mubr.bf16.gmra.mxu0 %v5807_v19  ;;  %1729 = vmatmul.mubr.bf16.gmra.mxu1 %v5808_v40  ;;  %v5844_v40 = vunpack.c.h.s8.bf16 %v5839_v59 }
 0x318   :  { %1897 = vmatprep.mubr.bf16.mxu0 %v5810_v24  ;;  %1736 = vmatprep.mubr.bf16.mxu1 %v5812_v63  ;;  %v5847_v24 = vld [vmem:[#allocation35_spill] sm:$0xff] }
 0x319   :  { %v5848_v21 = vunpack.c.l.s8.bf16 %v5847_v24 }
 0x31f   :  { %1898 = vmatmul.mubr.bf16.gmra.mxu0 %v5814_v11  ;;  %1737 = vmatmul.mubr.bf16.gmra.mxu1 %v5816_v15  ;;  %v5852_v15 = vunpack.c.l.s8.bf16 %v5851_v34 }
 0x320   :  { %1905 = vmatprep.mubr.bf16.mxu0 %v5817_v49  ;;  %1744 = vmatprep.mubr.bf16.mxu1 %v5818_v16  ;;  %v5853_v49 = vunpack.c.h.s8.bf16 %v5845_v41  ;;  %v5854_v16 = vunpack.c.h.s8.bf16 %v5847_v24  ;;  %v5877_v24 = vld [vmem:[#allocation18_spill] sm:$0xff] }
 0x327   :  { %1906 = vmatmul.mubr.bf16.gmra.mxu0 %v5819_v18  ;;  %1745 = vmatmul.mubr.bf16.gmra.mxu1 %v5820_v4  ;;  %v5855_v18 = vunpack.c.h.s8.bf16 %v5849_v12 }
 0x328   :  { %1913 = vmatprep.mubr.bf16.mxu0 %v5822_v28  ;;  %1752 = vmatprep.mubr.bf16.mxu1 %v5824_v14  ;;  %v5857_v28 = vld [vmem:[#allocation12_spill] sm:$0xff]  ;;  %v5859_v14 = vld [vmem:[#allocation39_spill] sm:$0xff] }
 0x329   :  { %v5858_v10 = vunpack.c.l.s8.bf16 %v5857_v28  ;;  %v5860_v45 = vunpack.c.l.s8.bf16 %v5859_v14  ;;  %v5865_v8 = vunpack.c.h.s8.bf16 %v5857_v28  ;;  %v5883_v28 = vld [vmem:[#allocation22_spill] sm:$0xff] }
 0x32f   :  { %1914 = vmatmul.mubr.bf16.gmra.mxu0 %v5826_v0  ;;  %v4941_v9 = vpop.f32.mrf.mxu1  ;;  %1753 = vmatmul.mubr.bf16.gmra.mxu1 %v5828_v2  ;;  %v5861_v0 = vld [vmem:[#allocation13_spill] sm:$0xff] }
 0x330   :  { %1921 = vmatprep.mubr.bf16.mxu0 %v5829_v17  ;;  %1760 = vmatprep.mubr.bf16.mxu1 %v5830_v32  ;;  %v5862_v51 = vunpack.c.l.s8.bf16 %v5861_v0  ;;  %v5863_v17 = vld [vmem:[#allocation41_spill] sm:$0xff] }
 0x331   :  { %v1564_v26 = vpop.f32.mrf.mxu1  ;;  %v5864_v32 = vunpack.c.l.s8.bf16 %v5863_v17  ;;  %v5868_v20 = vunpack.c.h.s8.bf16 %v5863_v17 }
 0x332   :  { %v5866_v26 = vunpack.c.h.s8.bf16 %v5859_v14 }
 0x333   :  { %v4955_v60 = vpop.f32.mrf.mxu1 }
 0x335   :  { %v1567_v1 = vpop.f32.mrf.mxu1 }
 0x337   :  { %1922 = vmatmul.mubr.bf16.gmra.mxu0 %v5831_v61  ;;  %v4962_v35 = vpop.f32.mrf.mxu1  ;;  %1761 = vmatmul.mubr.bf16.gmra.mxu1 %v5832_v55  ;;  %v5867_v61 = vunpack.c.h.s8.bf16 %v5861_v0 }
 0x338   :  { %1929 = vmatprep.mubr.bf16.mxu0 %v5834_v31  ;;  %1768 = vmatprep.mubr.bf16.mxu1 %v5836_v48  ;;  %v5869_v31 = vld [vmem:[#allocation14_spill] sm:$0xff] }
 0x339   :  { %v1572_v53 = vpop.f32.mrf.mxu1  ;;  %v5870_v62 = vunpack.c.l.s8.bf16 %v5869_v31 }
 0x33b   :  { %v4976_v36 = vpop.f32.mrf.mxu1 }
 0x33d   :  { %v1575_v3 = vpop.f32.mrf.mxu1 }
 0x33e   :  { %v5872_v3 = vunpack.c.l.s8.bf16 %v5871_v42 }
 0x33f   :  { %1930 = vmatmul.mubr.bf16.gmra.mxu0 %v5838_v43  ;;  %v4980_v37 = vpop.f32.mrf.mxu1  ;;  %1769 = vmatmul.mubr.bf16.gmra.mxu1 %v5840_v52  ;;  %v5873_v43 = vunpack.c.h.s8.bf16 %v5869_v31 }
 0x340   :  { %1937 = vmatprep.mubr.bf16.mxu0 %v5841_v44  ;;  %1776 = vmatprep.mubr.bf16.mxu1 %v5842_v50  ;;  %v5874_v50 = vunpack.c.h.s8.bf16 %v5871_v42 }
 0x341   :  { %v1580_v5 = vpop.f32.mrf.mxu1 }
 0x343   :  { %v4988_v57 = vpop.f32.mrf.mxu1 }
 0x345   :  { %v1583_v23 = vpop.f32.mrf.mxu1 }
 0x346   :  { %v5875_v23 = vld [vmem:[#allocation16_spill] sm:$0xff] }
 0x347   :  { %1938 = vmatmul.mubr.bf16.gmra.mxu0 %v5843_v30  ;;  %v4992_v19 = vpop.f32.mrf.mxu1  ;;  %1777 = vmatmul.mubr.bf16.gmra.mxu1 %v5844_v40  ;;  %v5876_v30 = vunpack.c.l.s8.bf16 %v5875_v23 }
 0x348   :  { %1945 = vmatprep.mubr.bf16.mxu0 %v5846_v47  ;;  %1784 = vmatprep.mubr.bf16.mxu1 %v5848_v21  ;;  %v5878_v21 = vunpack.c.l.s8.bf16 %v5877_v24 }
 0x349   :  { %v1588_v63 = vpop.f32.mrf.mxu1 }
 0x34b   :  { %v5000_v39 = vpop.f32.mrf.mxu1 }
 0x34d   :  { %v1591_v13 = vpop.f32.mrf.mxu1 }
 0x34e   :  { %v5879_v13 = vunpack.c.h.s8.bf16 %v5875_v23 }
 0x34f   :  { %1946 = vmatmul.mubr.bf16.gmra.mxu0 %v5850_v6  ;;  %v5004_v11 = vpop.f32.mrf.mxu1  ;;  %1785 = vmatmul.mubr.bf16.gmra.mxu1 %v5852_v15  ;;  %v5880_v15 = vunpack.c.h.s8.bf16 %v5877_v24 }
 0x350   :  { %1953 = vmatprep.mubr.bf16.mxu0 %v5853_v49  ;;  %1792 = vmatprep.mubr.bf16.mxu1 %v5854_v16  ;;  %v5881_v16 = vld [vmem:[#allocation20_spill] sm:$0xff] }
 0x351   :  { %v1596_v38 = vpop.f32.mrf.mxu1 }
 0x352   :  { %v5882_v38 = vunpack.c.l.s8.bf16 %v5881_v16 }
 0x353   :  { %v5012_v46 = vpop.f32.mrf.mxu1 }
 0x355   :  { %v1599_v56 = vpop.f32.mrf.mxu1 }
 0x357   :  { %1954 = vmatmul.mubr.bf16.gmra.mxu0 %v5855_v18  ;;  %v5016_v4 = vpop.f32.mrf.mxu1  ;;  %1793 = vmatmul.mubr.bf16.gmra.mxu1 %v5856_v29 }
 0x358   :  { %1961 = vmatprep.mubr.bf16.mxu0 %v5858_v10  ;;  %1800 = vmatprep.mubr.bf16.mxu1 %v5860_v45  ;;  %v5884_v10 = vunpack.c.l.s8.bf16 %v5883_v28  ;;  %v5885_v45 = vunpack.c.h.s8.bf16 %v5881_v16 }
 0x359   :  { %v1604_v22 = vpop.f32.mrf.mxu1 }
 0x35b   :  { %v5024_v54 = vpop.f32.mrf.mxu1 }
 0x35d   :  { %v1607_v27 = vpop.f32.mrf.mxu1 }
 0x35f   :  { %1962 = vmatmul.mubr.bf16.gmra.mxu0 %v5862_v51  ;;  %v5028_v2 = vpop.f32.mrf.mxu1  ;;  %1801 = vmatmul.mubr.bf16.gmra.mxu1 %v5864_v32  ;;  %v5886_v51 = vunpack.c.h.s8.bf16 %v5883_v28  ;;  %v5887_v32 = vld [vmem:[#allocation24_spill] sm:$0xff] }
 0x360   :  { %1969 = vmatprep.mubr.bf16.mxu0 %v5865_v8  ;;  %1808 = vmatprep.mubr.bf16.mxu1 %v5866_v26  ;;  %v5888_v8 = vunpack.c.l.s8.bf16 %v5887_v32 }
 0x361   :  { %v1612_v7 = vpop.f32.mrf.mxu1 }
 0x363   :  { %v5036_v1 = vpop.f32.mrf.mxu1 }
 0x365   :  { %v1615_v25 = vpop.f32.mrf.mxu1 }
 0x367   :  { %1970 = vmatmul.mubr.bf16.gmra.mxu0 %v5867_v61  ;;  %v5040_v55 = vpop.f32.mrf.mxu1  ;;  %1809 = vmatmul.mubr.bf16.gmra.mxu1 %v5868_v20  ;;  %v5889_v61 = vld [vmem:[#allocation26_spill] sm:$0xff] }
 0x368   :  { %1977 = vmatprep.mubr.bf16.mxu0 %v5870_v62  ;;  %v5890_v20 = vunpack.c.l.s8.bf16 %v5889_v61  ;;  %v5891_v62 = vunpack.c.h.s8.bf16 %v5887_v32 }
 0x369   :  { %v1620_v48 = vpop.f32.mrf.mxu1 }
 0x36b   :  { %v5046_v58 = vpop.f32.mrf.mxu1 }
 0x36d   :  { %v1623_v53 = vpop.f32.mrf.mxu1 }
 0x36f   :  { %1978 = vmatmul.mubr.bf16.gmra.mxu0 %v5872_v3  ;;  %v5050_v33 = vpop.f32.mrf.mxu1  ;;  %v5892_v3 = vunpack.c.h.s8.bf16 %v5889_v61 }
 0x370   :  { %1985 = vmatprep.mubr.bf16.mxu0 %v5873_v43 }
 0x371   :  { %v1628_v59 = vpop.f32.mrf.mxu1 }
 0x372   :  { %v5893_v59 = vld [vmem:[#allocation28_spill] sm:$0xff] }
 0x373   :  { %v5054_v52 = vpop.f32.mrf.mxu1 }
 0x375   :  { %v1631_v44 = vpop.f32.mrf.mxu1 }
 0x376   :  { %v5894_v44 = vunpack.c.l.s8.bf16 %v5893_v59 }
 0x377   :  { %1986 = vmatmul.mubr.bf16.gmra.mxu0 %v5874_v50  ;;  %v5058_v5 = vpop.f32.mrf.mxu1 }
 0x378   :  { %1993 = vmatprep.mubr.bf16.mxu0 %v5876_v30 }
 0x379   :  { %v1636_v40 = vpop.f32.mrf.mxu1 }
 0x37b   :  { %v5062_v41 = vpop.f32.mrf.mxu1 }
 0x37d   :  { %v1639_v47 = vpop.f32.mrf.mxu1 }
 0x37e   :  { %v5895_v47 = vld [vmem:[#allocation30_spill] sm:$0xff] }
 0x37f   :  { %1994 = vmatmul.mubr.bf16.gmra.mxu0 %v5878_v21  ;;  %v5066_v63 = vpop.f32.mrf.mxu1  ;;  %v5896_v24 = vunpack.c.l.s8.bf16 %v5895_v47 }
 0x380   :  { %2001 = vmatprep.mubr.bf16.mxu0 %v5879_v13 }
 0x381   :  { %v1644_v12 = vpop.f32.mrf.mxu1 }
 0x382   :  { %v5897_v12 = vunpack.c.h.s8.bf16 %v5893_v59 }
 0x383   :  { %v5070_v6 = vpop.f32.mrf.mxu1 }
 0x385   :  { %v1647_v34 = vpop.f32.mrf.mxu1 }
 0x387   :  { %2002 = vmatmul.mubr.bf16.gmra.mxu0 %v5880_v15  ;;  %v5074_v49 = vpop.f32.mrf.mxu1 }
 0x388   :  { %2009 = vmatprep.mubr.bf16.mxu0 %v5882_v38 }
 0x389   :  { %v1652_v56 = vpop.f32.mrf.mxu1 }
 0x38b   :  { %v5078_v18 = vpop.f32.mrf.mxu1 }
 0x38d   :  { %v1655_v29 = vpop.f32.mrf.mxu1 }
 0x38f   :  { %2010 = vmatmul.mubr.bf16.gmra.mxu0 %v5884_v10  ;;  %v5082_v14 = vpop.f32.mrf.mxu1 }
 0x390   :  { %2017 = vmatprep.mubr.bf16.mxu0 %v5885_v45  ;;  %v5898_v45 = vunpack.c.h.s8.bf16 %v5895_v47 }
 0x391   :  { %v1660_v22 = vpop.f32.mrf.mxu1 }
 0x393   :  { %v5086_v27 = vpop.f32.mrf.mxu1 }
 0x395   :  { %v1663_v0 = vpop.f32.mrf.mxu1 }
 0x396   :  { %v5899_v0 = vld [vmem:[#allocation32_spill] sm:$0xff] }
 0x397   :  { %2018 = vmatmul.mubr.bf16.gmra.mxu0 %v5886_v51  ;;  %v5090_v17 = vpop.f32.mrf.mxu1  ;;  %v5900_v51 = vunpack.c.l.s8.bf16 %v5899_v0  ;;  %v5903_v59 = vunpack.c.h.s8.bf16 %v5899_v0 }
 0x398   :  { %2025 = vmatprep.mubr.bf16.mxu0 %v5888_v8 }
 0x399   :  { %v1668_v26 = vpop.f32.mrf.mxu1 }
 0x39b   :  { %v5094_v7 = vpop.f32.mrf.mxu1 }
 0x39d   :  { %v1671_v25 = vpop.f32.mrf.mxu1 }
 0x39f   :  { %2026 = vmatmul.mubr.bf16.gmra.mxu0 %v5890_v20  ;;  %v5098_v31 = vpop.f32.mrf.mxu1 }
 0x3a0   :  { %2033 = vmatprep.mubr.bf16.mxu0 %v5891_v62 }
 0x3a1   :  { %v1676_v48 = vpop.f32.mrf.mxu1 }
 0x3a2   :  { %v5901_v48 = vld [vmem:[#allocation34_spill] sm:$0xff] }
 0x3a3   :  { %v5102_v53 = vpop.f32.mrf.mxu1 }
 0x3a5   :  { %v1679_v42 = vpop.f32.mrf.mxu1 }
 0x3a6   :  { %v5902_v42 = vunpack.c.l.s8.bf16 %v5901_v48 }
 0x3a7   :  { %2034 = vmatmul.mubr.bf16.gmra.mxu0 %v5892_v3  ;;  %v5106_v43 = vpop.f32.mrf.mxu1 }
 0x3a8   :  { %2041 = vmatprep.mubr.bf16.mxu0 %v5894_v44 }
 0x3a9   :  { %v1684_v50 = vpop.f32.mrf.mxu1 }
 0x3ab   :  { %v5110_v23 = vpop.f32.mrf.mxu1 }
 0x3ad   :  { %v1687_v30 = vpop.f32.mrf.mxu1 }
 0x3af   :  { %v1851_v40 = vpop.f32.mrf.mxu0  ;;  %2042 = vmatmul.mubr.bf16.gmra.mxu0 %v5896_v24  ;;  %v5114_v21 = vpop.f32.mrf.mxu1 }
 0x3b0   :  { %v1852_v13 = vadd.f32 %v1851_v40, %v4941_v9  ;;  %2049 = vmatprep.mubr.bf16.mxu0 %v5897_v12  ;;  %v5904_v12 = vunpack.c.h.s8.bf16 %v5901_v48 }
 0x3b1   :  { %v1853_v34 = vpop.f32.mrf.mxu0  ;;  %v1692_v15 = vpop.f32.mrf.mxu1 }
 0x3b2   :  { %3185 = vmatprep.mubr.f32.mxu1 %v1852_v13  ;;  %v5905_v15 = vld [vmem:[#allocation36_spill] sm:$0xff] }
 0x3b3   :  { %v1854_v16 = vpop.f32.mrf.mxu0  ;;  %v5119_v38 = vpop.f32.mrf.mxu1 }
 0x3b4   :  { %v1855_v56 = vadd.f32 %v1854_v16, %v4955_v60  ;;  %v5906_v16 = vunpack.c.l.s8.bf16 %v5905_v15 }
 0x3b5   :  { %v1856_v29 = vpop.f32.mrf.mxu0  ;;  %v1695_v28 = vpop.f32.mrf.mxu1 }
 0x3b6   :  { %3186 = vmatmul.mubr.f32.vlgmr.msra.gmra.mxu1 %v1855_v56 }
 0x3b7   :  { %v1859_v10 = vpop.f32.mrf.mxu0  ;;  %2050 = vmatmul.mubr.bf16.gmra.mxu0 %v5898_v45  ;;  %v5124_v22 = vpop.f32.mrf.mxu1 }
 0x3b8   :  { %v1860_v9 = vadd.f32 %v1859_v10, %v4962_v35  ;;  %2057 = vmatprep.mubr.bf16.mxu0 %v5900_v51  ;;  %v5907_v51 = vld [vmem:[#allocation38_spill] sm:$0xff] }
 0x3b9   :  { %v1861_v32 = vpop.f32.mrf.mxu0  ;;  %v1700_v8 = vpop.f32.mrf.mxu1 }
 0x3ba   :  { %3188 = vmatprep.mubr.f32.mxu1 %v1860_v9  ;;  %v5908_v32 = vunpack.c.l.s8.bf16 %v5907_v51 }
 0x3bb   :  { %v1862_v26 = vpop.f32.mrf.mxu0  ;;  %v5129_v25 = vpop.f32.mrf.mxu1 }
 0x3bc   :  { %v1863_v60 = vadd.f32 %v1862_v26, %v4976_v36  ;;  %v5909_v26 = vunpack.c.h.s8.bf16 %v5905_v15 }
 0x3bd   :  { %v1864_v61 = vpop.f32.mrf.mxu0  ;;  %v1703_v20 = vpop.f32.mrf.mxu1 }
 0x3be   :  { %3189 = vmatmul.mubr.f32.gmra.mxu1 %v1863_v60 }
 0x3bf   :  { %v1867_v62 = vpop.f32.mrf.mxu0  ;;  %2058 = vmatmul.mubr.bf16.gmra.mxu0 %v5902_v42  ;;  %v5134_v3 = vpop.f32.mrf.mxu1 }
 0x3c0   :  { %v1868_v35 = vadd.f32 %v1867_v62, %v4980_v37  ;;  %2065 = vmatprep.mubr.bf16.mxu0 %v5903_v59  ;;  %v5910_v59 = vunpack.c.h.s8.bf16 %v5907_v51 }
 0x3c1   :  { %v1869_v44 = vpop.f32.mrf.mxu0  ;;  %v1708_v50 = vpop.f32.mrf.mxu1 }
 0x3c2   :  { %3191 = vmatprep.mubr.f32.mxu1 %v1868_v35  ;;  %v5911_v50 = vld [vmem:[#allocation40_spill] sm:$0xff] }
 0x3c3   :  { %v1870_v30 = vpop.f32.mrf.mxu0  ;;  %v5139_v40 = vpop.f32.mrf.mxu1 }
 0x3c4   :  { %v1871_v36 = vadd.f32 %v1870_v30, %v4988_v57  ;;  %v5912_v30 = vunpack.c.l.s8.bf16 %v5911_v50 }
 0x3c5   :  { %v1872_v47 = vpop.f32.mrf.mxu0  ;;  %v1711_v24 = vpop.f32.mrf.mxu1 }
 0x3c6   :  { %3192 = vmatmul.mubr.f32.gmra.mxu1 %v1871_v36 }
 0x3c7   :  { %v1875_v13 = vpop.f32.mrf.mxu0  ;;  %2066 = vmatmul.mubr.bf16.gmra.mxu0 %v5904_v12  ;;  %v5144_v34 = vpop.f32.mrf.mxu1 }
 0x3c8   :  { %v1876_v37 = vadd.f32 %v1875_v13, %v4992_v19  ;;  %2073 = vmatprep.mubr.bf16.mxu0 %v5906_v16  ;;  %v5913_v16 = vld [vmem:[#allocation42_spill] sm:$0xff] }
 0x3c9   :  { %v1877_v56 = vpop.f32.mrf.mxu0  ;;  %v1716_v29 = vpop.f32.mrf.mxu1 }
 0x3ca   :  { %3194 = vmatprep.mubr.f32.mxu1 %v1876_v37  ;;  %v5914_v56 = vunpack.c.l.s8.bf16 %v5913_v16 }
 0x3cb   :  { %v1878_v28 = vpop.f32.mrf.mxu0  ;;  %v5149_v10 = vpop.f32.mrf.mxu1 }
 0x3cc   :  { %v1879_v57 = vadd.f32 %v1878_v28, %v5000_v39  ;;  %v5915_v28 = vunpack.c.h.s8.bf16 %v5911_v50 }
 0x3cd   :  { %v1880_v45 = vpop.f32.mrf.mxu0  ;;  %v1719_v9 = vpop.f32.mrf.mxu1 }
 0x3ce   :  { %3195 = vmatmul.mubr.f32.gmra.mxu1 %v1879_v57 }
 0x3cf   :  { %v1883_v0 = vpop.f32.mrf.mxu0  ;;  %2074 = vmatmul.mubr.bf16.gmra.mxu0 %v5908_v32  ;;  %v5154_v8 = vpop.f32.mrf.mxu1 }
 0x3d0   :  { %v1884_v19 = vadd.f32 %v1883_v0, %v5004_v11  ;;  %2081 = vmatprep.mubr.bf16.mxu0 %v5909_v26  ;;  %v5916_v26 = vunpack.c.h.s8.bf16 %v5913_v16 }
 0x3d1   :  { %v1885_v60 = vpop.f32.mrf.mxu0  ;;  %v1724_v61 = vpop.f32.mrf.mxu1 }
 0x3d2   :  { %3197 = vmatprep.mubr.f32.mxu1 %v1884_v19 }
 0x3d3   :  { %v1886_v20 = vpop.f32.mrf.mxu0  ;;  %v5159_v62 = vpop.f32.mrf.mxu1 }
 0x3d4   :  { %v1887_v39 = vadd.f32 %v1886_v20, %v5012_v46 }
 0x3d5   :  { %v1888_v48 = vpop.f32.mrf.mxu0  ;;  %v1727_v42 = vpop.f32.mrf.mxu1 }
 0x3d6   :  { %3198 = vmatmul.mubr.f32.gmra.mxu1 %v1887_v39 }
 0x3d7   :  { %v1891_v35 = vpop.f32.mrf.mxu0  ;;  %2082 = vmatmul.mubr.bf16.gmra.mxu0 %v5910_v59  ;;  %v5164_v44 = vpop.f32.mrf.mxu1 }
 0x3d8   :  { %v1892_v11 = vadd.f32 %v1891_v35, %v5016_v4  ;;  %2089 = vmatprep.mubr.bf16.mxu0 %v5912_v30 }
 0x3d9   :  { %v1893_v36 = vpop.f32.mrf.mxu0  ;;  %v1732_v47 = vpop.f32.mrf.mxu1 }
 0x3da   :  { %3200 = vmatprep.mubr.f32.mxu1 %v1892_v11 }
 0x3db   :  { %v1894_v24 = vpop.f32.mrf.mxu0  ;;  %v5169_v13 = vpop.f32.mrf.mxu1 }
 0x3dc   :  { %v1895_v46 = vadd.f32 %v1894_v24, %v5024_v54 }
 0x3dd   :  { %v1896_v12 = vpop.f32.mrf.mxu0  ;;  %v1735_v37 = vpop.f32.mrf.mxu1 }
 0x3de   :  { %3201 = vmatmul.mubr.f32.gmra.mxu1 %v1895_v46 }
 0x3df   :  { %v1899_v15 = vpop.f32.mrf.mxu0  ;;  %2090 = vmatmul.mubr.bf16.gmra.mxu0 %v5914_v56  ;;  %v5174_v29 = vpop.f32.mrf.mxu1 }
 0x3e0   :  { %v1900_v4 = vadd.f32 %v1899_v15, %v5028_v2  ;;  %2097 = vmatprep.mubr.bf16.mxu0 %v5915_v28 }
 0x3e1   :  { %v1901_v57 = vpop.f32.mrf.mxu0  ;;  %v1740_v45 = vpop.f32.mrf.mxu1 }
 0x3e2   :  { %3203 = vmatprep.mubr.f32.mxu1 %v1900_v4 }
 0x3e3   :  { %v1902_v9 = vpop.f32.mrf.mxu0  ;;  %v5179_v0 = vpop.f32.mrf.mxu1 }
 0x3e4   :  { %v1903_v54 = vadd.f32 %v1902_v9, %v5036_v1 }
 0x3e5   :  { %v1904_v51 = vpop.f32.mrf.mxu0  ;;  %v1743_v32 = vpop.f32.mrf.mxu1 }
 0x3e6   :  { %3204 = vmatmul.mubr.f32.gmra.mxu1 %v1903_v54 }
 0x3e7   :  { %v1907_v19 = vpop.f32.mrf.mxu0  ;;  %2098 = vmatmul.mubr.bf16.gmra.mxu0 %v5916_v26  ;;  %v5184_v60 = vpop.f32.mrf.mxu1 }
 0x3e8   :  { %v1908_v2 = vadd.f32 %v1907_v19, %v5040_v55 }
 0x3e9   :  { %v1909_v61 = vpop.f32.mrf.mxu0  ;;  %v1748_v20 = vpop.f32.mrf.mxu1 }
 0x3ea   :  { %3206 = vmatprep.mubr.f32.mxu1 %v1908_v2 }
 0x3eb   :  { %v1910_v39 = vpop.f32.mrf.mxu0  ;;  %v5187_v48 = vpop.f32.mrf.mxu1 }
 0x3ec   :  { %v1911_v42 = vadd.f32 %v1910_v39, %v5046_v58 }
 0x3ed   :  { %v1912_v1 = vpop.f32.mrf.mxu0  ;;  %v1751_v35 = vpop.f32.mrf.mxu1 }
 0x3ee   :  { %3207 = vmatmul.mubr.f32.gmra.mxu1 %v1911_v42 }
 0x3ef   :  { %v1915_v59 = vpop.f32.mrf.mxu0  ;;  %v5190_v11 = vpop.f32.mrf.mxu1 }
 0x3f0   :  { %v1916_v50 = vadd.f32 %v1915_v59, %v5050_v33 }
 0x3f1   :  { %v1917_v30 = vpop.f32.mrf.mxu0  ;;  %v1756_v36 = vpop.f32.mrf.mxu1 }
 0x3f2   :  { %3209 = vmatprep.mubr.f32.mxu1 %v1916_v50 }
 0x3f3   :  { %v1918_v55 = vpop.f32.mrf.mxu0  ;;  %v5193_v47 = vpop.f32.mrf.mxu1 }
 0x3f4   :  { %v1919_v24 = vadd.f32 %v1918_v55, %v5054_v52 }
 0x3f5   :  { %v1920_v46 = vpop.f32.mrf.mxu0  ;;  %v1759_v12 = vpop.f32.mrf.mxu1 }
 0x3f6   :  { %3210 = vmatmul.mubr.f32.gmra.mxu1 %v1919_v24 }
 0x3f7   :  { %v1923_v58 = vpop.f32.mrf.mxu0  ;;  %v5196_v37 = vpop.f32.mrf.mxu1 }
 0x3f8   :  { %v1924_v15 = vadd.f32 %v1923_v58, %v5058_v5 }
 0x3f9   :  { %v1925_v16 = vpop.f32.mrf.mxu0  ;;  %v1764_v56 = vpop.f32.mrf.mxu1 }
 0x3fa   :  { %3212 = vmatprep.mubr.f32.mxu1 %v1924_v15 }
 0x3fb   :  { %v1926_v33 = vpop.f32.mrf.mxu0  ;;  %v5199_v4 = vpop.f32.mrf.mxu1 }
 0x3fc   :  { %v1927_v28 = vadd.f32 %v1926_v33, %v5062_v41 }
 0x3fd   :  { %v1928_v57 = vpop.f32.mrf.mxu0  ;;  %v1767_v45 = vpop.f32.mrf.mxu1 }
 0x3fe   :  { %3213 = vmatmul.mubr.f32.gmra.mxu1 %v1927_v28 }
 0x3ff   :  { %v1931_v52 = vpop.f32.mrf.mxu0  ;;  %v5202_v9 = vpop.f32.mrf.mxu1 }
 0x400   :  { %v1932_v54 = vadd.f32 %v1931_v52, %v5066_v63 }
 0x401   :  { %v1933_v51 = vpop.f32.mrf.mxu0  ;;  %v1772_v32 = vpop.f32.mrf.mxu1 }
 0x402   :  { %3215 = vmatprep.mubr.f32.mxu1 %v1932_v54 }
 0x403   :  { %v1934_v5 = vpop.f32.mrf.mxu0  ;;  %v5205_v19 = vpop.f32.mrf.mxu1 }
 0x404   :  { %v1935_v26 = vadd.f32 %v1934_v5, %v5070_v6 }
 0x405   :  { %v1936_v2 = vpop.f32.mrf.mxu0  ;;  %v1775_v61 = vpop.f32.mrf.mxu1 }
 0x406   :  { %3216 = vmatmul.mubr.f32.gmra.mxu1 %v1935_v26 }
 0x407   :  { %v1939_v41 = vpop.f32.mrf.mxu0  ;;  %v5208_v20 = vpop.f32.mrf.mxu1 }
 0x408   :  { %v1940_v39 = vadd.f32 %v1939_v41, %v5074_v49 }
 0x409   :  { %v1941_v42 = vpop.f32.mrf.mxu0  ;;  %v1780_v1 = vpop.f32.mrf.mxu1 }
 0x40a   :  { %3218 = vmatprep.mubr.f32.mxu1 %v1940_v39 }
 0x40b   :  { %v1942_v63 = vpop.f32.mrf.mxu0  ;;  %v5211_v35 = vpop.f32.mrf.mxu1 }
 0x40c   :  { %v1943_v59 = vadd.f32 %v1942_v63, %v5078_v18 }
 0x40d   :  { %v1944_v50 = vpop.f32.mrf.mxu0  ;;  %v1783_v30 = vpop.f32.mrf.mxu1 }
 0x40e   :  { %3219 = vmatmul.mubr.f32.gmra.mxu1 %v1943_v59 }
 0x40f   :  { %v1947_v6 = vpop.f32.mrf.mxu0  ;;  %v5214_v36 = vpop.f32.mrf.mxu1 }
 0x410   :  { %v1948_v55 = vadd.f32 %v1947_v6, %v5082_v14 }
 0x411   :  { %v1949_v24 = vpop.f32.mrf.mxu0  ;;  %v1788_v46 = vpop.f32.mrf.mxu1 }
 0x412   :  { %3221 = vmatprep.mubr.f32.mxu1 %v1948_v55 }
 0x413   :  { %v1950_v49 = vpop.f32.mrf.mxu0  ;;  %v5217_v12 = vpop.f32.mrf.mxu1 }
 0x414   :  { %v1951_v58 = vadd.f32 %v1950_v49, %v5086_v27 }
 0x415   :  { %v1952_v15 = vpop.f32.mrf.mxu0  ;;  %v1791_v16 = vpop.f32.mrf.mxu1 }
 0x416   :  { %3222 = vmatmul.mubr.f32.gmra.mxu1 %v1951_v58 }
 0x417   :  { %v1955_v18 = vpop.f32.mrf.mxu0  ;;  %v5220_v56 = vpop.f32.mrf.mxu1 }
 0x418   :  { %v1956_v33 = vadd.f32 %v1955_v18, %v5090_v17 }
 0x419   :  { %v1957_v28 = vpop.f32.mrf.mxu0  ;;  %v1796_v57 = vpop.f32.mrf.mxu1 }
 0x41a   :  { %3224 = vmatprep.mubr.f32.mxu1 %v1956_v33 }
 0x41b   :  { %v1958_v14 = vpop.f32.mrf.mxu0  ;;  %v5223_v45 = vpop.f32.mrf.mxu1 }
 0x41c   :  { %v1959_v52 = vadd.f32 %v1958_v14, %v5094_v7 }
 0x41d   :  { %v1960_v54 = vpop.f32.mrf.mxu0  ;;  %v1799_v51 = vpop.f32.mrf.mxu1 }
 0x41e   :  { %3225 = vmatmul.mubr.f32.gmra.mxu1 %v1959_v52 }
 0x41f   :  { %v1963_v27 = vpop.f32.mrf.mxu0  ;;  %v5226_v32 = vpop.f32.mrf.mxu1 }
 0x420   :  { %v1964_v5 = vadd.f32 %v1963_v27, %v5098_v31 }
 0x421   :  { %v1965_v26 = vpop.f32.mrf.mxu0  ;;  %v1804_v2 = vpop.f32.mrf.mxu1 }
 0x422   :  { %3227 = vmatprep.mubr.f32.mxu1 %v1964_v5 }
 0x423   :  { %v1966_v17 = vpop.f32.mrf.mxu0  ;;  %v5229_v61 = vpop.f32.mrf.mxu1 }
 0x424   :  { %v1967_v41 = vadd.f32 %v1966_v17, %v5102_v53 }
 0x425   :  { %v1968_v39 = vpop.f32.mrf.mxu0  ;;  %v1807_v42 = vpop.f32.mrf.mxu1 }
 0x426   :  { %3228 = vmatmul.mubr.f32.gmra.mxu1 %v1967_v41 }
 0x427   :  { %v1971_v7 = vpop.f32.mrf.mxu0  ;;  %v5232_v1 = vpop.f32.mrf.mxu1 }
 0x428   :  { %v1972_v63 = vadd.f32 %v1971_v7, %v5106_v43 }
 0x429   :  { %v1973_v59 = vpop.f32.mrf.mxu0  ;;  %v1812_v50 = vpop.f32.mrf.mxu1 }
 0x42a   :  { %3230 = vmatprep.mubr.f32.mxu1 %v1972_v63 }
 0x42b   :  { %v1974_v31 = vpop.f32.mrf.mxu0  ;;  %v5235_v30 = vpop.f32.mrf.mxu1 }
 0x42c   :  { %v1975_v6 = vadd.f32 %v1974_v31, %v5110_v23 }
 0x42d   :  { %v1976_v55 = vpop.f32.mrf.mxu0  ;;  %v1815_v24 = vpop.f32.mrf.mxu1 }
 0x42e   :  { %3231 = vmatmul.mubr.f32.gmra.mxu1 %v1975_v6 }
 0x42f   :  { %v1979_v53 = vpop.f32.mrf.mxu0 }
 0x430   :  { %v1980_v46 = vadd.f32 %v1979_v53, %v5114_v21 }
 0x431   :  { %v1981_v49 = vpop.f32.mrf.mxu0 }
 0x432   :  { %3233 = vmatprep.mubr.f32.mxu1 %v1980_v46 }
 0x433   :  { %v1982_v58 = vpop.f32.mrf.mxu0 }
 0x434   :  { %v1983_v15 = vadd.f32 %v1982_v58, %v5119_v38 }
 0x435   :  { %v1984_v43 = vpop.f32.mrf.mxu0 }
 0x436   :  { %3234 = vmatmul.mubr.f32.gmra.mxu1 %v1983_v15 }
 0x437   :  { %v1987_v16 = vpop.f32.mrf.mxu0 }
 0x438   :  { %v1988_v18 = vadd.f32 %v1987_v16, %v5124_v22 }
 0x439   :  { %v1989_v33 = vpop.f32.mrf.mxu0 }
 0x43a   :  { %3236 = vmatprep.mubr.f32.mxu1 %v1988_v18 }
 0x43b   :  { %v1990_v28 = vpop.f32.mrf.mxu0 }
 0x43c   :  { %v1991_v23 = vadd.f32 %v1990_v28, %v5129_v25 }
 0x43d   :  { %v1992_v57 = vpop.f32.mrf.mxu0 }
 0x43e   :  { %3237 = vmatmul.mubr.f32.gmra.mxu1 %v1991_v23 }
 0x43f   :  { %v1995_v14 = vpop.f32.mrf.mxu0 }
 0x440   :  { %v1996_v21 = vadd.f32 %v1995_v14, %v5134_v3 }
 0x441   :  { %v1997_v52 = vpop.f32.mrf.mxu0 }
 0x442   :  { %3239 = vmatprep.mubr.f32.mxu1 %v1996_v21 }
 0x443   :  { %v1998_v54 = vpop.f32.mrf.mxu0 }
 0x444   :  { %v1999_v38 = vadd.f32 %v1998_v54, %v5139_v40 }
 0x445   :  { %v2000_v51 = vpop.f32.mrf.mxu0 }
 0x446   :  { %3240 = vmatmul.mubr.f32.gmra.mxu1 %v1999_v38 }
 0x447   :  { %v2003_v27 = vpop.f32.mrf.mxu0 }
 0x448   :  { %v2004_v22 = vadd.f32 %v2003_v27, %v5144_v34 }
 0x449   :  { %v2005_v5 = vpop.f32.mrf.mxu0 }
 0x44a   :  { %3242 = vmatprep.mubr.f32.mxu1 %v2004_v22 }
 0x44b   :  { %v2006_v26 = vpop.f32.mrf.mxu0 }
 0x44c   :  { %v2007_v25 = vadd.f32 %v2006_v26, %v5149_v10 }
 0x44d   :  { %v2008_v2 = vpop.f32.mrf.mxu0 }
 0x44e   :  { %3243 = vmatmul.mubr.f32.gmra.mxu1 %v2007_v25 }
 0x44f   :  { %v2011_v17 = vpop.f32.mrf.mxu0 }
 0x450   :  { %v2012_v3 = vadd.f32 %v2011_v17, %v5154_v8 }
 0x451   :  { %v2013_v41 = vpop.f32.mrf.mxu0 }
 0x452   :  { %3245 = vmatprep.mubr.f32.mxu1 %v2012_v3 }
 0x453   :  { %v2014_v39 = vpop.f32.mrf.mxu0 }
 0x454   :  { %v2015_v40 = vadd.f32 %v2014_v39, %v5159_v62 }
 0x455   :  { %v2016_v42 = vpop.f32.mrf.mxu0 }
 0x456   :  { %3246 = vmatmul.mubr.f32.gmra.mxu1 %v2015_v40 }
 0x457   :  { %v2019_v7 = vpop.f32.mrf.mxu0 }
 0x458   :  { %v2020_v34 = vadd.f32 %v2019_v7, %v5164_v44 }
 0x459   :  { %v2021_v63 = vpop.f32.mrf.mxu0 }
 0x45a   :  { %3248 = vmatprep.mubr.f32.mxu1 %v2020_v34 }
 0x45b   :  { %v2022_v59 = vpop.f32.mrf.mxu0 }
 0x45c   :  { %v2023_v10 = vadd.f32 %v2022_v59, %v5169_v13 }
 0x45d   :  { %v2024_v50 = vpop.f32.mrf.mxu0 }
 0x45e   :  { %3249 = vmatmul.mubr.f32.gmra.mxu1 %v2023_v10 }
 0x45f   :  { %v2027_v31 = vpop.f32.mrf.mxu0 }
 0x460   :  { %v2028_v8 = vadd.f32 %v2027_v31, %v5174_v29 }
 0x461   :  { %v2029_v6 = vpop.f32.mrf.mxu0 }
 0x462   :  { %3251 = vmatprep.mubr.f32.mxu1 %v2028_v8 }
 0x463   :  { %v2030_v55 = vpop.f32.mrf.mxu0 }
 0x464   :  { %v2031_v62 = vadd.f32 %v2030_v55, %v5179_v0 }
 0x465   :  { %v2032_v24 = vpop.f32.mrf.mxu0 }
 0x466   :  { %3252 = vmatmul.mubr.f32.gmra.mxu1 %v2031_v62 }
 0x467   :  { %v2035_v53 = vpop.f32.mrf.mxu0 }
 0x468   :  { %v2036_v44 = vadd.f32 %v2035_v53, %v5184_v60 }
 0x469   :  { %v2037_v46 = vpop.f32.mrf.mxu0 }
 0x46a   :  { %3254 = vmatprep.mubr.f32.mxu1 %v2036_v44 }
 0x46b   :  { %v2038_v49 = vpop.f32.mrf.mxu0 }
 0x46c   :  { %v2039_v13 = vadd.f32 %v2038_v49, %v5187_v48 }
 0x46d   :  { %v2040_v58 = vpop.f32.mrf.mxu0 }
 0x46e   :  { %3255 = vmatmul.mubr.f32.gmra.mxu1 %v2039_v13 }
 0x46f   :  { %v2043_v15 = vpop.f32.mrf.mxu0 }
 0x470   :  { %v2044_v29 = vadd.f32 %v2043_v15, %v5190_v11 }
 0x471   :  { %v2045_v43 = vpop.f32.mrf.mxu0 }
 0x472   :  { %3257 = vmatprep.mubr.f32.mxu1 %v2044_v29 }
 0x473   :  { %v2046_v16 = vpop.f32.mrf.mxu0 }
 0x474   :  { %v2047_v0 = vadd.f32 %v2046_v16, %v5193_v47 }
 0x475   :  { %v2048_v18 = vpop.f32.mrf.mxu0 }
 0x476   :  { %3258 = vmatmul.mubr.f32.gmra.mxu1 %v2047_v0  ;;  %v5263_v2 = vpop.f32.mrf.mxu1 }
 0x477   :  { %v2051_v33 = vpop.f32.mrf.mxu0 }
 0x478   :  { %v2052_v60 = vadd.f32 %v2051_v33, %v5196_v37  ;;  %v5266_v3 = vpop.f32.mrf.mxu1 }
 0x479   :  { %v2053_v28 = vpop.f32.mrf.mxu0 }
 0x47a   :  { %3260 = vmatprep.mubr.f32.mxu1 %v2052_v60 }
 0x47b   :  { %v2054_v23 = vpop.f32.mrf.mxu0 }
 0x47c   :  { %v2055_v48 = vadd.f32 %v2054_v23, %v5199_v4 }
 0x47d   :  { %v2056_v57 = vpop.f32.mrf.mxu0 }
 0x47e   :  { %3261 = vmatmul.mubr.f32.gmra.mxu1 %v2055_v48  ;;  %v5269_v39 = vpop.f32.mrf.mxu1 }
 0x47f   :  { %v2059_v14 = vpop.f32.mrf.mxu0 }
 0x480   :  { %v2060_v11 = vadd.f32 %v2059_v14, %v5202_v9  ;;  %v5272_v7 = vpop.f32.mrf.mxu1 }
 0x481   :  { %v2061_v21 = vpop.f32.mrf.mxu0 }
 0x482   :  { %3263 = vmatprep.mubr.f32.mxu1 %v2060_v11  ;;  %v5295_v21 = vld [vmem:[%s5489_s4 + $0x1] ss:$0 sm:$0xff] }
 0x483   :  { %v2062_v52 = vpop.f32.mrf.mxu0 }
 0x484   :  { %v2063_v47 = vadd.f32 %v2062_v52, %v5205_v19 }
 0x485   :  { %v2064_v54 = vpop.f32.mrf.mxu0 }
 0x486   :  { %3264 = vmatmul.mubr.f32.gmra.mxu1 %v2063_v47 }
 0x487   :  { %v2067_v38 = vpop.f32.mrf.mxu0 }
 0x488   :  { %v2068_v37 = vadd.f32 %v2067_v38, %v5208_v20 }
 0x489   :  { %v2069_v51 = vpop.f32.mrf.mxu0 }
 0x48a   :  { %3266 = vmatprep.mubr.f32.mxu1 %v2068_v37 }
 0x48b   :  { %v2070_v27 = vpop.f32.mrf.mxu0 }
 0x48c   :  { %v2071_v4 = vadd.f32 %v2070_v27, %v5211_v35 }
 0x48d   :  { %v2072_v22 = vpop.f32.mrf.mxu0 }
 0x48e   :  { %3267 = vmatmul.mubr.f32.gmra.mxu1 %v2071_v4 }
 0x48f   :  { %v2075_v5 = vpop.f32.mrf.mxu0 }
 0x490   :  { %v2076_v9 = vadd.f32 %v2075_v5, %v5214_v36 }
 0x491   :  { %v2077_v26 = vpop.f32.mrf.mxu0 }
 0x492   :  { %3269 = vmatprep.mubr.f32.mxu1 %v2076_v9 }
 0x493   :  { %v2078_v25 = vpop.f32.mrf.mxu0 }
 0x494   :  { %v2079_v19 = vadd.f32 %v2078_v25, %v5217_v12  ;;  %v5274_v12 = vpop.f32.mrf.mxu1 }
 0x495   :  { %v2080_v17 = vpop.f32.mrf.mxu0 }
 0x496   :  { %3270 = vmatmul.mubr.f32.gmra.mxu1 %v2079_v19 }
 0x497   :  { %v2083_v20 = vpop.f32.mrf.mxu0 }
 0x498   :  { %v2084_v41 = vadd.f32 %v2083_v20, %v5220_v56  ;;  %v5277_v56 = vpop.f32.mrf.mxu1 }
 0x499   :  { %v2085_v35 = vpop.f32.mrf.mxu0 }
 0x49a   :  { %3272 = vmatprep.mubr.f32.mxu1 %v2084_v41  ;;  %v5280_v8 = vpop.f32.mrf.mxu1 }
 0x49b   :  { %v2086_v40 = vpop.f32.mrf.mxu0 }
 0x49c   :  { %v2087_v36 = vadd.f32 %v2086_v40, %v5223_v45  ;;  %v5283_v62 = vpop.f32.mrf.mxu1 }
 0x49d   :  { %v2088_v42 = vpop.f32.mrf.mxu0 }
 0x49e   :  { %3273 = vmatmul.mubr.f32.gmra.mxu1 %v2087_v36  ;;  %v2233_v36 = vadd.f32 %v5280_v8, %v5295_v21  ;;  %v2213_v8 = vadd.f32 %v5269_v39, %v5295_v21 }
 0x49f   :  { %v2091_v34 = vpop.f32.mrf.mxu0 }
 0x4a0   :  { %v2092_v63 = vadd.f32 %v2091_v34, %v5226_v32  ;;  %v3199_v32 = vpop.f32.mrf.mxu1  ;;  %v2228_v34 = vadd.f32 %v5295_v21, %v5283_v62  ;;  %v2516_v62 = vld [vmem:[%s5490_s5] sm:$0xff] }
 0x4a1   :  { %v2093_v59 = vpop.f32.mrf.mxu0  ;;  %v2243_v20 = vadd.f32 %v3199_v32, %v5295_v21  ;;  %v2674_v32 = vld [vmem:[%s5491_s6 + $0x70] sm:$0xff] }
 0x4a2   :  { %3275 = vmatprep.mubr.f32.mxu1 %v2092_v63  ;;  %v2237_v46 = vpop.f32.mrf.mxu1  ;;  %v2223_v59 = vadd.f32 %v5274_v12, %v5295_v21  ;;  %v2208_v12 = vadd.f32 %v5295_v21, %v5272_v7  ;;  %v2198_v7 = vadd.f32 %v5295_v21, %v5266_v3  ;;  %v2675_v3 = vld [vmem:[%s5491_s6 + $0x78] sm:$0xff] }
 0x4a3   :  { %v2094_v10 = vpop.f32.mrf.mxu0  ;;  %v2238_v35 = vadd.f32 %v5295_v21, %v2237_v46  ;;  %v2672_v46 = vld [vmem:[%s5491_s6 + $0x60] sm:$0xff] }
 0x4a4   :  { %v2095_v50 = vadd.f32 %v2094_v10, %v5229_v61  ;;  %v3202_v49 = vpop.f32.mrf.mxu1 }
 0x4a5   :  { %v2096_v31 = vpop.f32.mrf.mxu0  ;;  %v2253_v26 = vadd.f32 %v3202_v49, %v5295_v21 }
 0x4a6   :  { %3276 = vmatmul.mubr.f32.gmra.mxu1 %v2095_v50  ;;  %v2247_v61 = vpop.f32.mrf.mxu1  ;;  %v2218_v50 = vadd.f32 %v5295_v21, %v5277_v56  ;;  %v2203_v56 = vadd.f32 %v5263_v2, %v5295_v21  ;;  %v2519_v2 = vld [vmem:[%s5490_s5 + $0x18] sm:$0xff] }
 0x4a7   :  { %v2099_v45 = vpop.f32.mrf.mxu0  ;;  %v2248_v19 = vadd.f32 %v5295_v21, %v2247_v61  ;;  %v2671_v61 = vld [vmem:[%s5491_s6 + $0x58] sm:$0xff] }
 0x4a8   :  { %v2100_v6 = vadd.f32 %v2099_v45, %v5232_v1  ;;  %v3205_v13 = vpop.f32.mrf.mxu1 }
 0x4a9   :  { %v2101_v55 = vpop.f32.mrf.mxu0  ;;  %v2263_v4 = vadd.f32 %v3205_v13, %v5295_v21 }
 0x4aa   :  { %3278 = vmatprep.mubr.f32.mxu1 %v2100_v6  ;;  %v2257_v58 = vpop.f32.mrf.mxu1  ;;  %v2517_v55 = vld [vmem:[%s5490_s5 + $0x8] sm:$0xff] }
 0x4ab   :  { %v2102_v24 = vpop.f32.mrf.mxu0  ;;  %v2258_v5 = vadd.f32 %v5295_v21, %v2257_v58  ;;  %2584 = vmatprep.mubr.f32.mxu0 %v2517_v55  ;;  %v2670_v58 = vld [vmem:[%s5491_s6 + $0x50] sm:$0xff] }
 0x4ac   :  { %v2103_v53 = vadd.f32 %v2102_v24, %v5235_v30  ;;  %v3320_v24 = vmov 0.0  }
 0x4ad   :  { %v2104_v44 = vpop.f32.mrf.mxu0 }
 0x4ae   :  { %3279 = vmatmul.mubr.f32.gmra.mxu1 %v2103_v53  ;;  %v3208_v15 = vpop.f32.mrf.mxu1  ;;  %v2673_v44 = vld [vmem:[%s5491_s6 + $0x68] sm:$0xff] }
 0x4af   :  { %v2273_v54 = vadd.f32 %v3208_v15, %v5295_v21  ;;  %2654 = vmatprep.mubr.f32.mxu1 %v2519_v2  ;;  %v2669_v15 = vld [vmem:[%s5491_s6 + $0x48] sm:$0xff] }
 0x4b0   :  { %v2267_v29 = vpop.f32.mrf.mxu1 }
 0x4b1   :  { %v2268_v51 = vadd.f32 %v5295_v21, %v2267_v29 }
 0x4b6   :  { %v5286_v43 = vpop.f32.mrf.mxu1 }
 0x4b7   :  { %v2283_v6 = vadd.f32 %v5286_v43, %v5295_v21  ;;  %v2668_v43 = vld [vmem:[%s5491_s6 + $0x40] sm:$0xff] }
 0x4b8   :  { %v5288_v1 = vpop.f32.mrf.mxu1 }
 0x4b9   :  { %v2278_v39 = vadd.f32 %v5295_v21, %v5288_v1 }
 0x4be   :  { %v3214_v16 = vpop.f32.mrf.mxu1 }
 0x4bf   :  { %v2293_v31 = vadd.f32 %v3214_v16, %v5295_v21  ;;  %v2667_v16 = vld [vmem:[%s5491_s6 + $0x38] sm:$0xff] }
 0x4c0   :  { %v5290_v0 = vpop.f32.mrf.mxu1 }
 0x4c1   :  { %v2288_v45 = vadd.f32 %v5295_v21, %v5290_v0  ;;  %v2666_v0 = vld [vmem:[%s5491_s6 + $0x30] sm:$0xff] }
 0x4c6   :  { %v3217_v18 = vpop.f32.mrf.mxu1 }
 0x4c7   :  { %v2303_v63 = vadd.f32 %v3217_v18, %v5295_v21 }
 0x4c8   :  { %v2297_v33 = vpop.f32.mrf.mxu1 }
 0x4c9   :  { %v2298_v10 = vadd.f32 %v5295_v21, %v2297_v33  ;;  %v2665_v33 = vld [vmem:[%s5491_s6 + $0x28] sm:$0xff] }
 0x4ce   :  { %v3220_v60 = vpop.f32.mrf.mxu1 }
 0x4cf   :  { %v2313_v40 = vadd.f32 %v3220_v60, %v5295_v21 }
 0x4d0   :  { %v2307_v30 = vpop.f32.mrf.mxu1 }
 0x4d1   :  { %v2308_v42 = vadd.f32 %v5295_v21, %v2307_v30  ;;  %v2664_v30 = vld [vmem:[%s5491_s6 + $0x20] sm:$0xff] }
 0x4d6   :  { %v3223_v28 = vpop.f32.mrf.mxu1 }
 0x4d7   :  { %v2323_v17 = vadd.f32 %v3223_v28, %v5295_v21 }
 0x4d8   :  { %v2317_v23 = vpop.f32.mrf.mxu1 }
 0x4d9   :  { %v2318_v41 = vadd.f32 %v5295_v21, %v2317_v23 }
 0x4de   :  { %v3226_v48 = vpop.f32.mrf.mxu1 }
 0x4df   :  { %v2333_v9 = vadd.f32 %v3226_v48, %v5295_v21 }
 0x4e0   :  { %v2327_v57 = vpop.f32.mrf.mxu1 }
 0x4e1   :  { %v2328_v25 = vadd.f32 %v5295_v21, %v2327_v57 }
 0x4e6   :  { %v3229_v14 = vpop.f32.mrf.mxu1 }
 0x4e7   :  { %v2343_v27 = vadd.f32 %v3229_v14, %v5295_v21 }
 0x4e8   :  { %v2337_v11 = vpop.f32.mrf.mxu1 }
 0x4e9   :  { %v2338_v22 = vadd.f32 %v5295_v21, %v2337_v11 }
 0x4ee   :  { %v3232_v52 = vpop.f32.mrf.mxu1 }
 0x4ef   :  { %v2353_v47 = vadd.f32 %v3232_v52, %v5295_v21 }
 0x4f0   :  { %v2347_v38 = vpop.f32.mrf.mxu1 }
 0x4f1   :  { %v2348_v37 = vadd.f32 %v5295_v21, %v2347_v38  ;;  %2938 = vmatprep.subr.mxu0 %v2353_v47 }
 0x4f2   :  { %2939 = vmatpush3.msra.mxu0 %v2273_v54 }
 0x4f3   :  { %2940 = vmatprep.subr.mxu0 %v2348_v37 }
 0x4f4   :  { %2941 = vmatpush3.msra.mxu0 %v2268_v51 }
 0x4f5   :  { %2942 = vmatprep.subr.mxu0 %v2343_v27 }
 0x4f6   :  { %2943 = vmatpush3.msra.mxu0 %v2263_v4  ;;  %v5356_v53 = vpop.f32.mrf.mxu1 }
 0x4f7   :  { %2944 = vmatprep.subr.mxu0 %v2338_v22 }
 0x4f8   :  { %2945 = vmatpush3.msra.mxu0 %v2258_v5  ;;  %v5366_v49 = vpop.f32.mrf.mxu1 }
 0x4f9   :  { %2946 = vmatprep.subr.mxu0 %v2333_v9 }
 0x4fa   :  { %2947 = vmatpush3.msra.mxu0 %v2253_v26 }
 0x4fb   :  { %2948 = vmatprep.subr.mxu0 %v2328_v25 }
 0x4fc   :  { %2949 = vmatpush3.msra.mxu0 %v2248_v19 }
 0x4fd   :  { %2950 = vmatprep.subr.mxu0 %v2323_v17 }
 0x4fe   :  { %2951 = vmatpush3.msra.mxu0 %v2243_v20  ;;  %v5372_v13 = vpop.f32.mrf.mxu1 }
 0x4ff   :  { %2952 = vmatprep.subr.mxu0 %v2318_v41 }
 0x500   :  { %2953 = vmatpush3.msra.mxu0 %v2238_v35  ;;  %v5382_v29 = vpop.f32.mrf.mxu1 }
 0x501   :  { %2954 = vmatprep.subr.mxu0 %v2313_v40 }
 0x502   :  { %2955 = vmatpush3.msra.mxu0 %v2233_v36 }
 0x503   :  { %2956 = vmatprep.subr.mxu0 %v2308_v42 }
 0x504   :  { %2957 = vmatpush3.msra.mxu0 %v2228_v34 }
 0x505   :  { %2958 = vmatprep.subr.mxu0 %v2303_v63 }
 0x506   :  { %2959 = vmatpush3.msra.mxu0 %v2223_v59  ;;  %v5388_v1 = vpop.f32.mrf.mxu1 }
 0x507   :  { %2960 = vmatprep.subr.mxu0 %v2298_v10 }
 0x508   :  { %2961 = vmatpush3.msra.mxu0 %v2218_v50  ;;  %v5398_v18 = vpop.f32.mrf.mxu1 }
 0x509   :  { %2962 = vmatprep.subr.mxu0 %v2293_v31 }
 0x50a   :  { %2963 = vmatpush3.msra.mxu0 %v2213_v8 }
 0x50b   :  { %2964 = vmatprep.subr.mxu0 %v2288_v45 }
 0x50c   :  { %2965 = vmatpush3.msra.mxu0 %v2208_v12 }
 0x50d   :  { %2966 = vmatprep.subr.mxu0 %v2283_v6 }
 0x50e   :  { %2967 = vmatpush3.msra.mxu0 %v2203_v56  ;;  %v5404_v60 = vpop.f32.mrf.mxu1 }
 0x50f   :  { %2968 = vmatprep.subr.mxu0 %v2278_v39  ;;  %v2393_v2 = vadd.f32 %v5404_v60, %v5295_v21  ;;  %v2662_v60 = vld [vmem:[%s5491_s6 + $0x10] sm:$0xff] }
 0x510   :  { %2969 = vmatpush3.msra.mxu0 %v2198_v7  ;;  %v2387_v28 = vpop.f32.mrf.mxu1 }
 0x511   :  { %2585 = vmatmul.mubr.f32.vlgmr.msra.gmra.mxu0 %v2516_v62  ;;  %3281 = vmatprep.subr.mxu0 %v3320_v24 }
 0x512   :  { %3282 = vmatpush3.msra.mxu0 %v2675_v3  ;;  %3313 = vmatprep.mubr.msk.f32.mxu0 %vm3321_vm0, %v3320_v24 }
 0x513   :  { %3283 = vmatprep.subr.mxu0 %v3320_v24 }
 0x514   :  { %3284 = vmatpush3.msra.mxu0 %v2674_v32  ;;  %v2388_v32 = vadd.f32 %v5295_v21, %v2387_v28 }
 0x515   :  { %3285 = vmatprep.subr.mxu0 %v3320_v24 }
 0x516   :  { %3286 = vmatpush3.msra.mxu0 %v2673_v44  ;;  %v3247_v23 = vpop.f32.mrf.mxu1 }
 0x517   :  { %3287 = vmatprep.subr.mxu0 %v3320_v24  ;;  %v2403_v39 = vadd.f32 %v3247_v23, %v5295_v21 }
 0x518   :  { %3288 = vmatpush3.msra.mxu0 %v2672_v46  ;;  %v2397_v48 = vpop.f32.mrf.mxu1  ;;  %v2383_v46 = vadd.f32 %v5388_v1, %v5295_v21  ;;  %v2368_v1 = vadd.f32 %v5295_v21, %v5382_v29  ;;  %v2518_v29 = vld [vmem:[%s5490_s5 + $0x10] sm:$0xff] }
 0x519   :  { %3289 = vmatprep.subr.mxu0 %v3320_v24  ;;  %v2398_v7 = vadd.f32 %v5295_v21, %v2397_v48 }
 0x51a   :  { %3290 = vmatpush3.msra.mxu0 %v2671_v61 }
 0x51b   :  { %3291 = vmatprep.subr.mxu0 %v3320_v24 }
 0x51c   :  { %3292 = vmatpush3.msra.mxu0 %v2670_v58  ;;  %v2378_v58 = vadd.f32 %v5295_v21, %v5398_v18  ;;  %v2363_v18 = vadd.f32 %v5356_v53, %v5295_v21  ;;  %v2663_v53 = vld [vmem:[%s5491_s6 + $0x18] sm:$0xff] }
 0x51d   :  { %3293 = vmatprep.subr.mxu0 %v3320_v24 }
 0x51e   :  { %3294 = vmatpush3.msra.mxu0 %v2669_v15  ;;  %v3250_v57 = vpop.f32.mrf.mxu1 }
 0x51f   :  { %3295 = vmatprep.subr.mxu0 %v3320_v24  ;;  %v2413_v45 = vadd.f32 %v3250_v57, %v5295_v21 }
 0x520   :  { %3296 = vmatpush3.msra.mxu0 %v2668_v43  ;;  %v2407_v14 = vpop.f32.mrf.mxu1  ;;  %v2373_v43 = vadd.f32 %v5372_v13, %v5295_v21 }
 0x521   :  { %3297 = vmatprep.subr.mxu0 %v3320_v24  ;;  %v2408_v6 = vadd.f32 %v5295_v21, %v2407_v14 }
 0x522   :  { %3298 = vmatpush3.msra.mxu0 %v2667_v16 }
 0x523   :  { %3299 = vmatprep.subr.mxu0 %v3320_v24 }
 0x524   :  { %3300 = vmatpush3.msra.mxu0 %v2666_v0 }
 0x525   :  { %3301 = vmatprep.subr.mxu0 %v3320_v24 }
 0x526   :  { %3302 = vmatpush3.msra.mxu0 %v2665_v33  ;;  %v3253_v11 = vpop.f32.mrf.mxu1  ;;  %v2358_v33 = vadd.f32 %v5295_v21, %v5366_v49  ;;  %v2660_v49 = vld [vmem:[%s5491_s6] sm:$0xff] }
 0x527   :  { %3303 = vmatprep.subr.mxu0 %v3320_v24  ;;  %v2423_v10 = vadd.f32 %v3253_v11, %v5295_v21 }
 0x528   :  { %3304 = vmatpush3.msra.mxu0 %v2664_v30  ;;  %v2417_v52 = vpop.f32.mrf.mxu1 }
 0x529   :  { %3305 = vmatprep.subr.mxu0 %v3320_v24  ;;  %v2418_v31 = vadd.f32 %v5295_v21, %v2417_v52  ;;  %v2777_v52 = vld [vmem:[%s5492_s7] ss:$0 sm:$0xff] }
 0x52a   :  { %3306 = vmatpush3.msra.mxu0 %v2663_v53 }
 0x52b   :  { %3307 = vmatprep.subr.mxu0 %v3320_v24 }
 0x52c   :  { %3308 = vmatpush3.msra.mxu0 %v2662_v60 }
 0x52d   :  { %3309 = vmatprep.subr.mxu0 %v3320_v24 }
 0x52e   :  { %v3256_v47 = vpop.f32.mrf.mxu1 }
 0x52f   :  { %v2433_v36 = vadd.f32 %v3256_v47, %v5295_v21 }
 0x530   :  { %v2427_v54 = vpop.f32.mrf.mxu1 }
 0x531   :  { %v2428_v63 = vadd.f32 %v5295_v21, %v2427_v54 }
 0x536   :  { %v5412_v38 = vpop.f32.mrf.mxu1 }
 0x537   :  { %v2443_v0 = vadd.f32 %v5412_v38, %v5295_v21 }
 0x538   :  { %v5414_v37 = vpop.f32.mrf.mxu1 }
 0x539   :  { %v2438_v13 = vadd.f32 %v5295_v21, %v5414_v37 }
 0x53e   :  { %v3262_v51 = vpop.f32.mrf.mxu1 }
 0x53f   :  { %v2453_v15 = vadd.f32 %v3262_v51, %v5295_v21 }
 0x540   :  { %v5416_v27 = vpop.f32.mrf.mxu1 }
 0x541   :  { %v2448_v16 = vadd.f32 %v5295_v21, %v5416_v27 }
 0x546   :  { %v3265_v4 = vpop.f32.mrf.mxu1 }
 0x547   :  { %v2463_v44 = vadd.f32 %v3265_v4, %v5295_v21 }
 0x548   :  { %v2457_v22 = vpop.f32.mrf.mxu1 }
 0x549   :  { %v2458_v61 = vadd.f32 %v5295_v21, %v2457_v22 }
 0x54e   :  { %v3268_v5 = vpop.f32.mrf.mxu1 }
 0x54f   :  { %v2473_v62 = vadd.f32 %v3268_v5, %v5295_v21 }
 0x550   :  { %v2467_v9 = vpop.f32.mrf.mxu1 }
 0x551   :  { %v2468_v3 = vadd.f32 %v5295_v21, %v2467_v9 }
 0x556   :  { %v3271_v26 = vpop.f32.mrf.mxu1 }
 0x557   :  { %v2483_v56 = vadd.f32 %v3271_v26, %v5295_v21 }
 0x558   :  { %v2477_v25 = vpop.f32.mrf.mxu1 }
 0x559   :  { %v2478_v55 = vadd.f32 %v5295_v21, %v2477_v25 }
 0x55e   :  { %v3274_v19 = vpop.f32.mrf.mxu1 }
 0x55f   :  { %v2493_v8 = vadd.f32 %v3274_v19, %v5295_v21 }
 0x560   :  { %v2487_v17 = vpop.f32.mrf.mxu1 }
 0x561   :  { %v2488_v12 = vadd.f32 %v5295_v21, %v2487_v17 }
 0x566   :  { %v3277_v20 = vpop.f32.mrf.mxu1 }
 0x567   :  { %v2503_v59 = vadd.f32 %v3277_v20, %v5295_v21 }
 0x568   :  { %v2497_v41 = vpop.f32.mrf.mxu1 }
 0x569   :  { %v2498_v50 = vadd.f32 %v5295_v21, %v2497_v41 }
 0x56e   :  { %v3280_v35 = vpop.f32.mrf.mxu1 }
 0x56f   :  { %v2513_v40 = vadd.f32 %v3280_v35, %v5295_v21 }
 0x570   :  { %v2507_v42 = vpop.f32.mrf.mxu1 }
 0x571   :  { %v2508_v34 = vadd.f32 %v5295_v21, %v2507_v42  ;;  %2973 = vmatprep.subr.mxu1 %v2513_v40  ;;  %v2661_v21 = vld [vmem:[%s5491_s6 + $0x8] sm:$0xff] }
 0x572   :  { %2974 = vmatpush3.msra.mxu1 %v2433_v36  ;;  %3310 = vmatpush3.msra.mxu0 %v2661_v21 }
 0x573   :  { %2975 = vmatprep.subr.mxu1 %v2508_v34  ;;  %3311 = vmatprep.subr.mxu0 %v3320_v24 }
 0x574   :  { %2976 = vmatpush3.msra.mxu1 %v2428_v63  ;;  %3312 = vmatpush3.msra.mxu0 %v2660_v49 }
 0x575   :  { %2977 = vmatprep.subr.mxu1 %v2503_v59 }
 0x576   :  { %2978 = vmatpush3.msra.mxu1 %v2423_v10 }
 0x577   :  { %2979 = vmatprep.subr.mxu1 %v2498_v50 }
 0x578   :  { %2980 = vmatpush3.msra.mxu1 %v2418_v31 }
 0x579   :  { %2981 = vmatprep.subr.mxu1 %v2493_v8 }
 0x57a   :  { %2982 = vmatpush3.msra.mxu1 %v2413_v45 }
 0x57b   :  { %2983 = vmatprep.subr.mxu1 %v2488_v12 }
 0x57c   :  { %2984 = vmatpush3.msra.mxu1 %v2408_v6 }
 0x57d   :  { %2985 = vmatprep.subr.mxu1 %v2483_v56 }
 0x57e   :  { %2986 = vmatpush3.msra.mxu1 %v2403_v39 }
 0x57f   :  { %2987 = vmatprep.subr.mxu1 %v2478_v55 }
 0x580   :  { %2988 = vmatpush3.msra.mxu1 %v2398_v7 }
 0x581   :  { %2989 = vmatprep.subr.mxu1 %v2473_v62 }
 0x582   :  { %2990 = vmatpush3.msra.mxu1 %v2393_v2 }
 0x583   :  { %2991 = vmatprep.subr.mxu1 %v2468_v3 }
 0x584   :  { %2992 = vmatpush3.msra.mxu1 %v2388_v32 }
 0x585   :  { %2993 = vmatprep.subr.mxu1 %v2463_v44 }
 0x586   :  { %2994 = vmatpush3.msra.mxu1 %v2383_v46 }
 0x587   :  { %2995 = vmatprep.subr.mxu1 %v2458_v61 }
 0x588   :  { %2996 = vmatpush3.msra.mxu1 %v2378_v58 }
 0x589   :  { %2997 = vmatprep.subr.mxu1 %v2453_v15 }
 0x58a   :  { %2998 = vmatpush3.msra.mxu1 %v2373_v43 }
 0x58b   :  { %2999 = vmatprep.subr.mxu1 %v2448_v16 }
 0x58c   :  { %3000 = vmatpush3.msra.mxu1 %v2368_v1 }
 0x58d   :  { %3001 = vmatprep.subr.mxu1 %v2443_v0 }
 0x58e   :  { %3002 = vmatpush3.msra.mxu1 %v2363_v18 }
 0x58f   :  { %3003 = vmatprep.subr.mxu1 %v2438_v13 }
 0x590   :  { %3004 = vmatpush3.msra.mxu1 %v2358_v33 }
 0x591   :  { %2655 = vmatmul.mubr.f32.vlgmr.msra.gmra.mxu1 %v2518_v29 }
 0x5d1   :  { %v2970_v30 = vpop.f32.mrf.mxu0 }
 0x5d3   :  { %v2971_v23 = vpop.f32.mrf.mxu0 }
 0x5d4   :  { %v2972_v57 = vadd.f32 %v2971_v23, %v2970_v30 }
 0x651   :  { %v3005_v28 = vpop.f32.mrf.mxu1 }
 0x653   :  { %v3006_v48 = vpop.f32.mrf.mxu1 }
 0x654   :  { %v3007_v14 = vadd.f32 %v3006_v48, %v3005_v28 }
 0x656   :  { %v2657_v11 = vadd.f32 %v3007_v14, %v2972_v57 }
 0x658   :  { %3314 = vmatmul.mubr.f32.vlgmr.msra.gmra.mxu0 %v2657_v11 }
 0x718   :  { %v2749_v47 = vpop.f32.mrf.mxu0 }
 0x719   :  { %v2750_v54 = vadd.f32 %v2777_v52, %v2749_v47 }
 0x71a   :  { %v3315_v38 = vpop.f32.mrf.mxu0 }
 0x71b   :  { %2753 = vst [vmem:[%s5493_s8] sm:$0xff] %v2750_v54 }

</bundles_post_ra>
